<compile_context>
chip_gen: v5e
topology: v5e:2x2
jax: 0.10.0
libtpu: 0.0.40
codegen_flags: <defaults>
</compile_context>

<pallas_src>
import functools
import math

import jax
import jax.numpy as jnp
from jax.experimental import pallas as pl
from jax.experimental.pallas import tpu as pltpu


def _round_up(x, m):
    return ((x + m - 1) // m) * m


def _pick_tile(n, max_t):
    """Largest multiple-of-128 tile <= max_t dividing n, else n (full dim)."""
    if n <= max_t:
        return n
    t = (max_t // 128) * 128
    while t >= 128:
        if n % t == 0:
            return t
        t -= 128
    return n


# ----------------------------------------------------------------------------
# Kernels
# ----------------------------------------------------------------------------
def _linear_kernel(x_ref, w_ref, b_ref, o_ref, *, activation):
    # x: (tm, K), w: (K, tn) bf16, b: (1, tn) f32.  bf16 MXU, f32 accumulate.
    x = x_ref[...].astype(jnp.bfloat16)
    y = jnp.dot(x, w_ref[...], preferred_element_type=jnp.float32)
    y = y + b_ref[...]
    if activation == "relu":
        y = jnp.maximum(y, 0.0)
    o_ref[...] = y.astype(o_ref.dtype)


def _linear_add_ln_kernel(x_ref, w_ref, b_ref, res_ref, g_ref, bln_ref, o_ref):
    # Fused epilogue: y = LayerNorm(residual + (x @ w + b)), eps=1e-5.
    x = x_ref[...].astype(jnp.bfloat16)
    y = jnp.dot(x, w_ref[...], preferred_element_type=jnp.float32)
    y = y + b_ref[...] + res_ref[...]
    mean = jnp.mean(y, axis=-1, keepdims=True)
    var = jnp.mean((y - mean) ** 2, axis=-1, keepdims=True)
    yhat = (y - mean) * jax.lax.rsqrt(var + 1e-5)
    o_ref[...] = (yhat * g_ref[...] + bln_ref[...]).astype(o_ref.dtype)


def _ffn_kernel(x_ref, w1_ref, b1_ref, w2_ref, b2_ref, g_ref, bln_ref,
                o_ref, acc_ref):
    # Fused fc1 -> ReLU -> fc2 -> +residual -> LayerNorm.
    # Grid axis 1 tiles the FFN (hidden) dimension F; the (M, F) activation is
    # never materialized in HBM.  x block stays resident across F steps and
    # doubles as the residual in the epilogue.
    k = pl.program_id(1)

    @pl.when(k == 0)
    def _():
        acc_ref[...] = jnp.zeros_like(acc_ref)

    x = x_ref[...].astype(jnp.bfloat16)                       # (tm, E)
    h = jnp.dot(x, w1_ref[...], preferred_element_type=jnp.float32)
    h = jnp.maximum(h + b1_ref[...], 0.0)                     # (tm, tf) f32
    acc_ref[...] += jnp.dot(h.astype(jnp.bfloat16), w2_ref[...],
                            preferred_element_type=jnp.float32)

    @pl.when(k == pl.num_programs(1) - 1)
    def _():
        y = acc_ref[...] + b2_ref[...] + x_ref[...]           # residual in f32
        mean = jnp.mean(y, axis=-1, keepdims=True)
        var = jnp.mean((y - mean) ** 2, axis=-1, keepdims=True)
        yhat = (y - mean) * jax.lax.rsqrt(var + 1e-5)
        o_ref[...] = (yhat * g_ref[...] + bln_ref[...]).astype(o_ref.dtype)


def _flash_attn_kernel(q_ref, k_ref, v_ref, bias_ref, o_ref,
                       m_sc, l_sc, acc_sc, *, num_heads, head_dim, scale):
    # Flash-style self-attention: one (batch, q_tile) output block, kv tiles on
    # the last ("arbitrary") grid axis with online-softmax scratch.
    kv = pl.program_id(2)

    @pl.when(kv == 0)
    def _():
        m_sc[...] = jnp.full_like(m_sc, -jnp.inf)
        l_sc[...] = jnp.zeros_like(l_sc)
        acc_sc[...] = jnp.zeros_like(acc_sc)

    tq = q_ref.shape[1]
    tk = k_ref.shape[1]
    # Head split happens in-VMEM (relayout), never as an HBM transpose.
    q = jnp.swapaxes(q_ref[0].reshape(tq, num_heads, head_dim), 0, 1)  # (H,tq,Dh)
    k = jnp.swapaxes(k_ref[0].reshape(tk, num_heads, head_dim), 0, 1)  # (H,tk,Dh)
    v = jnp.swapaxes(v_ref[0].reshape(tk, num_heads, head_dim), 0, 1)  # (H,tk,Dh)

    s = jnp.einsum("hqd,hkd->hqk", q, k,
                   preferred_element_type=jnp.float32) * scale         # (H,tq,tk)
    s = s + bias_ref[0]                                                 # key-pad mask

    m_prev = m_sc[...]
    m_new = jnp.maximum(m_prev, s.max(-1, keepdims=True))
    alpha = jnp.exp(m_prev - m_new)
    p = jnp.exp(s - m_new)
    l_sc[...] = alpha * l_sc[...] + p.sum(-1, keepdims=True)
    acc_sc[...] = alpha * acc_sc[...] + jnp.einsum(
        "hqk,hkd->hqd", p.astype(jnp.bfloat16), v,
        preferred_element_type=jnp.float32)
    m_sc[...] = m_new

    @pl.when(kv == pl.num_programs(2) - 1)
    def _():
        out = acc_sc[...] * pl.reciprocal(l_sc[...], approx=True)      # (H,tq,Dh)
        out = jnp.swapaxes(out, 0, 1).reshape(tq, num_heads * head_dim)
        o_ref[0] = out.astype(o_ref.dtype)                             # lane-dense


# ----------------------------------------------------------------------------
# Wrappers (pallas_call with BlockSpecs / grid)
# ----------------------------------------------------------------------------
def linear(x, w, b, activation=None, out_dtype=jnp.float32, max_row_tile=512):
    # x: (M, K); w: (K, N) bf16; b: (N,) f32.
    M, K = x.shape
    N = w.shape[1]
    tm = max_row_tile if M >= max_row_tile else _round_up(M, 8)
    Mp = _round_up(M, tm)
    if Mp != M:
        x = jnp.pad(x, ((0, Mp - M), (0, 0)))
    tn = _pick_tile(N, 1024)
    out = pl.pallas_call(
        functools.partial(_linear_kernel, activation=activation),
        out_shape=jax.ShapeDtypeStruct((Mp, N), out_dtype),
        grid=(Mp // tm, N // tn),
        in_specs=[
            pl.BlockSpec((tm, K), lambda i, j: (i, 0)),
            pl.BlockSpec((K, tn), lambda i, j: (0, j)),
            pl.BlockSpec((1, tn), lambda i, j: (0, j)),
        ],
        out_specs=pl.BlockSpec((tm, tn), lambda i, j: (i, j)),
        compiler_params=pltpu.CompilerParams(
            dimension_semantics=("parallel", "parallel")),
    )(x, w, b.reshape(1, N))
    return out[:M] if Mp != M else out


def linear_add_layernorm(x, w, b, res, gamma, beta, max_row_tile=256):
    # Fused (x @ w + b) + res -> LayerNorm.  Used for the attention out-proj
    # (K = N = E, small weight; F-sized weights go through the fused FFN).
    M, K = x.shape
    N = w.shape[1]
    tm = max_row_tile if M >= max_row_tile else _round_up(M, 8)
    Mp = _round_up(M, tm)
    if Mp != M:
        x = jnp.pad(x, ((0, Mp - M), (0, 0)))
        res = jnp.pad(res, ((0, Mp - M), (0, 0)))
    out = pl.pallas_call(
        _linear_add_ln_kernel,
        out_shape=jax.ShapeDtypeStruct((Mp, N), jnp.float32),
        grid=(Mp // tm,),
        in_specs=[
            pl.BlockSpec((tm, K), lambda i: (i, 0)),
            pl.BlockSpec((K, N), lambda i: (0, 0)),
            pl.BlockSpec((1, N), lambda i: (0, 0)),
            pl.BlockSpec((tm, N), lambda i: (i, 0)),
            pl.BlockSpec((1, N), lambda i: (0, 0)),
            pl.BlockSpec((1, N), lambda i: (0, 0)),
        ],
        out_specs=pl.BlockSpec((tm, N), lambda i: (i, 0)),
        compiler_params=pltpu.CompilerParams(dimension_semantics=("parallel",)),
    )(x, w, b.reshape(1, N), res, gamma.reshape(1, N), beta.reshape(1, N))
    return out[:M] if Mp != M else out


def ffn_residual_layernorm(x, w1, b1, w2, b2, gamma, beta, max_row_tile=256):
    # Fused fc1+ReLU+fc2+residual+LayerNorm.  x: (M, E) f32 (also the residual).
    M, E = x.shape
    F = w1.shape[1]
    tm = max_row_tile if M >= max_row_tile else _round_up(M, 8)
    Mp = _round_up(M, tm)
    if Mp != M:
        x = jnp.pad(x, ((0, Mp - M), (0, 0)))
    tf = _pick_tile(F, 512)
    out = pl.pallas_call(
        _ffn_kernel,
        out_shape=jax.ShapeDtypeStruct((Mp, E), jnp.float32),
        grid=(Mp // tm, F // tf),
        in_specs=[
            pl.BlockSpec((tm, E), lambda i, k: (i, 0)),
            pl.BlockSpec((E, tf), lambda i, k: (0, k)),
            pl.BlockSpec((1, tf), lambda i, k: (0, k)),
            pl.BlockSpec((tf, E), lambda i, k: (k, 0)),
            pl.BlockSpec((1, E), lambda i, k: (0, 0)),
            pl.BlockSpec((1, E), lambda i, k: (0, 0)),
            pl.BlockSpec((1, E), lambda i, k: (0, 0)),
        ],
        out_specs=pl.BlockSpec((tm, E), lambda i, k: (i, 0)),
        scratch_shapes=[pltpu.VMEM((tm, E), jnp.float32)],
        compiler_params=pltpu.CompilerParams(
            dimension_semantics=("parallel", "arbitrary")),
    )(x, w1, b1.reshape(1, F), w2, b2.reshape(1, E),
      gamma.reshape(1, E), beta.reshape(1, E))
    return out[:M] if Mp != M else out


def attention(qkv, pad_mask, num_heads, head_dim, scale, max_tile=256):
    # qkv: (B, S, 3E) bf16 from the fused projection; pad_mask: (B, S), 1 = pad.
    B, S, threeE = qkv.shape
    E = num_heads * head_dim
    t = min(max_tile, _round_up(S, 8))
    Sp = _round_up(S, t)
    if Sp != S:
        qkv = jnp.pad(qkv, ((0, 0), (0, Sp - S), (0, 0)))
        pad_mask = jnp.pad(pad_mask, ((0, 0), (0, Sp - S)), constant_values=1.0)
    bias = jnp.where(pad_mask > 0, -1e30, 0.0).astype(jnp.float32).reshape(B, 1, Sp)

    bias_spec = pl.BlockSpec((1, 1, t), lambda b, qi, ki: (b, 0, ki))
    if E % 128 == 0:
        # Read Q/K/V directly out of the fused qkv array via column blocks
        # (no HBM slicing copies).
        in_specs = [
            pl.BlockSpec((1, t, E), lambda b, qi, ki: (b, qi, 0)),
            pl.BlockSpec((1, t, E), lambda b, qi, ki: (b, ki, 1)),
            pl.BlockSpec((1, t, E), lambda b, qi, ki: (b, ki, 2)),
            bias_spec,
        ]
        args = (qkv, qkv, qkv, bias)
    else:
        # Lane-alignment fallback for small / unaligned E (wrapper-level slices).
        q, k, v = qkv[..., :E], qkv[..., E:2 * E], qkv[..., 2 * E:]
        in_specs = [
            pl.BlockSpec((1, t, E), lambda b, qi, ki: (b, qi, 0)),
            pl.BlockSpec((1, t, E), lambda b, qi, ki: (b, ki, 0)),
            pl.BlockSpec((1, t, E), lambda b, qi, ki: (b, ki, 0)),
            bias_spec,
        ]
        args = (q, k, v, bias)

    out = pl.pallas_call(
        functools.partial(_flash_attn_kernel, num_heads=num_heads,
                          head_dim=head_dim, scale=scale),
        out_shape=jax.ShapeDtypeStruct((B, Sp, E), jnp.bfloat16),
        grid=(B, Sp // t, Sp // t),
        in_specs=in_specs,
        out_specs=pl.BlockSpec((1, t, E), lambda b, qi, ki: (b, qi, 0)),
        scratch_shapes=[
            pltpu.VMEM((num_heads, t, 1), jnp.float32),
            pltpu.VMEM((num_heads, t, 1), jnp.float32),
            pltpu.VMEM((num_heads, t, head_dim), jnp.float32),
        ],
        compiler_params=pltpu.CompilerParams(
            dimension_semantics=("parallel", "parallel", "arbitrary")),
    )(*args)
    return out[:, :S] if Sp != S else out


# ----------------------------------------------------------------------------
# Full layer forward (post-LN, ReLU, eval mode)
# ----------------------------------------------------------------------------
def transformer_encoder_layer(x, encoder_padding_mask, params, num_heads):
    S, B, E = x.shape
    Dh = E // num_heads
    scale = Dh ** -0.5

    # Single layout change up front: batch-major so per-batch attention blocks
    # are contiguous (no split/merge-head HBM transposes anywhere).
    xb = jnp.transpose(x, (1, 0, 2))                  # (B, S, E)
    x2d = xb.reshape(B * S, E)

    # --- self-attention block ---
    residual = x2d                                    # f32 residual stream
    qkv = linear(x2d, params["wqkv"], params["bqkv"],
                 out_dtype=jnp.bfloat16)              # (B*S, 3E) bf16
    attn = attention(qkv.reshape(B, S, 3 * E), encoder_padding_mask,
                     num_heads, Dh, scale)            # (B, S, E) bf16
    x2d = linear_add_layernorm(attn.reshape(B * S, E),
                               params["wo"], params["bo"],
                               residual, params["ln0_g"], params["ln0_b"])
    # TODO(synk): dropout omitted (eval mode == identity); self_attn_mask=None only.

    # --- feed-forward block (fully fused: fc1 -> ReLU -> fc2 -> +res -> LN) ---
    x2d = ffn_residual_layernorm(x2d, params["w1"], params["b1"],
                                 params["w2"], params["b2"],
                                 params["ln1_g"], params["ln1_b"])
    # TODO(synk): gelu activation option (args.gelu) not implemented; ReLU default.

    return jnp.transpose(x2d.reshape(B, S, E), (1, 0, 2))   # (S, B, E)


# ----------------------------------------------------------------------------
# Deterministic parameter init (xavier_uniform weights, zero biases, LN=1/0)
# ----------------------------------------------------------------------------
def xavier_uniform(key, out_features, in_features):
    bound = math.sqrt(6.0 / (in_features + out_features))
    w = jax.random.uniform(key, (out_features, in_features), jnp.float32, -bound, bound)
    return w.T  # kernels expect (in, out) so that y = x @ w + b


def make_params(key, embed_dim, ffn_dim):
    keys = jax.random.split(key, 6)
    E, F = embed_dim, ffn_dim
    wq = xavier_uniform(keys[0], E, E)
    wk = xavier_uniform(keys[1], E, E)
    wv = xavier_uniform(keys[2], E, E)
    return {
        # MXU operands stored bf16 (halves weight DMA); accumulation is f32.
        "wqkv": jnp.concatenate([wq, wk, wv], axis=1).astype(jnp.bfloat16),
        "bqkv": jnp.zeros((3 * E,), jnp.float32),
        "wo": xavier_uniform(keys[3], E, E).astype(jnp.bfloat16),
        "bo": jnp.zeros((E,), jnp.float32),
        "w1": xavier_uniform(keys[4], F, E).astype(jnp.bfloat16),
        "b1": jnp.zeros((F,), jnp.float32),
        "w2": xavier_uniform(keys[5], E, F).astype(jnp.bfloat16),
        "b2": jnp.zeros((E,), jnp.float32),
        "ln0_g": jnp.ones((E,), jnp.float32), "ln0_b": jnp.zeros((E,), jnp.float32),
        "ln1_g": jnp.ones((E,), jnp.float32), "ln1_b": jnp.zeros((E,), jnp.float32),
    }


if __name__ == "__main__":
    SEQ, BATCH, EMBED, HEADS, FFN = 16, 2, 128, 4, 512

    root = jax.random.PRNGKey(0)
    k_x, k_p = jax.random.split(root)
    x = jax.random.normal(k_x, (SEQ, BATCH, EMBED), jnp.float32)

    # batch 0: no padding; batch 1: last 3 source positions padded (==1)
    pad_mask = jnp.zeros((BATCH, SEQ), jnp.float32).at[1, SEQ - 3:].set(1.0)

    params = make_params(k_p, EMBED, FFN)

    fwd = jax.jit(functools.partial(transformer_encoder_layer, num_heads=HEADS))
    out = fwd(x, pad_mask, params)
    out = jax.block_until_ready(out)

    assert out.shape == (SEQ, BATCH, EMBED)
    assert bool(jnp.all(jnp.isfinite(out)))
    print("KERNEL_OK")
</pallas_src>

<mosaic_0001>
module attributes {stable_mosaic.version = 11 : i64} {
  func.func @_linear_kernel(%arg0: i32, %arg1: i32, %arg2: memref<32x128xf32, #tpu.memory_space<vmem>>, %arg3: memref<128x384xbf16, #tpu.memory_space<vmem>>, %arg4: memref<1x384xf32, #tpu.memory_space<vmem>>, %arg5: memref<32x384xbf16, #tpu.memory_space<vmem>>) attributes {dimension_semantics = [#tpu.dimension_semantics<parallel>, #tpu.dimension_semantics<parallel>], iteration_bounds = array<i64: 1, 1>, scalar_prefetch = 0 : i64, scratch_operands = 0 : i64, tpu.core_type = #tpu.core_type<tc>, window_params = [{transform_indices = @transform_0, window_bounds = array<i64: 32, 128>}, {transform_indices = @transform_1, window_bounds = array<i64: 128, 384>}, {transform_indices = @transform_2, window_bounds = array<i64: 1, 384>}, {transform_indices = @transform_3, window_bounds = array<i64: 32, 384>}]} {
    %c0 = arith.constant 0 : index
    %c0_0 = arith.constant 0 : index
    %0 = vector.load %arg2[%c0, %c0_0] : memref<32x128xf32, #tpu.memory_space<vmem>>, vector<32x128xf32>
    %1 = arith.truncf %0 : vector<32x128xf32> to vector<32x128xbf16>
    %c0_1 = arith.constant 0 : index
    %c0_2 = arith.constant 0 : index
    %2 = vector.load %arg3[%c0_1, %c0_2] : memref<128x384xbf16, #tpu.memory_space<vmem>>, vector<128x384xbf16>
    %cst = arith.constant dense<0.000000e+00> : vector<32x384xf32>
    %3 = tpu.matmul %1, %2, %cst {dimension_numbers = #tpu.dot_dimension_numbers<[1], [0], [0], [1], [0, 0, 1, 1], [], []>} : vector<32x128xbf16>, vector<128x384xbf16>, vector<32x384xf32> -> vector<32x384xf32>
    %c0_3 = arith.constant 0 : index
    %c0_4 = arith.constant 0 : index
    %4 = vector.load %arg4[%c0_3, %c0_4] : memref<1x384xf32, #tpu.memory_space<vmem>>, vector<1x384xf32>
    %5 = vector.broadcast %4 : vector<1x384xf32> to vector<32x384xf32>
    %6 = arith.addf %3, %5 : vector<32x384xf32>
    %7 = arith.truncf %6 : vector<32x384xf32> to vector<32x384xbf16>
    %c0_5 = arith.constant 0 : index
    %c0_6 = arith.constant 0 : index
    %8 = vector.load %arg5[%c0_5, %c0_6] : memref<32x384xbf16, #tpu.memory_space<vmem>>, vector<32x384xbf16>
    tpu.vector_store %arg5[%c0_5, %c0_6], %7 {strides = array<i32>} : memref<32x384xbf16, #tpu.memory_space<vmem>>, vector<32x384xbf16>,
    return
  }
  func.func @transform_0(%arg0: i32, %arg1: i32) -> (i32, i32) {
    %c0_i32 = arith.constant 0 : i32
    %c0_i32_0 = arith.constant 0 : i32
    return %arg0, %c0_i32 : i32, i32
  }
  func.func @transform_1(%arg0: i32, %arg1: i32) -> (i32, i32) {
    %c0_i32 = arith.constant 0 : i32
    %c0_i32_0 = arith.constant 0 : i32
    return %c0_i32, %arg1 : i32, i32
  }
  func.func @transform_2(%arg0: i32, %arg1: i32) -> (i32, i32) {
    %c0_i32 = arith.constant 0 : i32
    %c0_i32_0 = arith.constant 0 : i32
    return %c0_i32, %arg1 : i32, i32
  }
  func.func @transform_3(%arg0: i32, %arg1: i32) -> (i32, i32) {
    %c0_i32 = arith.constant 0 : i32
    return %arg0, %arg1 : i32, i32
  }
}

module attributes {stable_mosaic.version = 11 : i64} {
  func.func @_flash_attn_kernel(%arg0: i32, %arg1: i32, %arg2: i32, %arg3: memref<1x16x128xbf16, #tpu.memory_space<vmem>>, %arg4: memref<1x16x128xbf16, #tpu.memory_space<vmem>>, %arg5: memref<1x16x128xbf16, #tpu.memory_space<vmem>>, %arg6: memref<1x1x16xf32, #tpu.memory_space<vmem>>, %arg7: memref<1x16x128xbf16, #tpu.memory_space<vmem>>, %arg8: memref<4x16x1xf32, #tpu.memory_space<vmem>>, %arg9: memref<4x16x1xf32, #tpu.memory_space<vmem>>, %arg10: memref<4x16x32xf32, #tpu.memory_space<vmem>>) attributes {dimension_semantics = [#tpu.dimension_semantics<parallel>, #tpu.dimension_semantics<parallel>, #tpu.dimension_semantics<arbitrary>], iteration_bounds = array<i64: 2, 1, 1>, scalar_prefetch = 0 : i64, scratch_operands = 3 : i64, tpu.core_type = #tpu.core_type<tc>, window_params = [{transform_indices = @transform_0, window_bounds = array<i64: 1, 16, 128>}, {transform_indices = @transform_1, window_bounds = array<i64: 1, 16, 128>}, {transform_indices = @transform_2, window_bounds = array<i64: 1, 16, 128>}, {transform_indices = @transform_3, window_bounds = array<i64: 1, 1, 16>}, {transform_indices = @transform_4, window_bounds = array<i64: 1, 16, 128>}]} {
    %c0_i32 = arith.constant 0 : i32
    %0 = arith.cmpi eq, %arg2, %c0_i32 : i32
    %1 = arith.extui %0 : i1 to i32
    %c0_i32_0 = arith.constant 0 : i32
    %2 = arith.cmpi ne, %1, %c0_i32_0 : i32
    scf.if %2 {
      %cst_36 = arith.constant 0xFF800000 : f32
      %49 = vector.broadcast %cst_36 : f32 to vector<4x16x1xf32>
      %c0_37 = arith.constant 0 : index
      %c0_38 = arith.constant 0 : index
      %c0_39 = arith.constant 0 : index
      %50 = vector.load %arg8[%c0_37, %c0_38, %c0_39] : memref<4x16x1xf32, #tpu.memory_space<vmem>>, vector<4x16x1xf32>
      tpu.vector_store %arg8[%c0_37, %c0_38, %c0_39], %49 {strides = array<i32>} : memref<4x16x1xf32, #tpu.memory_space<vmem>>, vector<4x16x1xf32>,
      %cst_40 = arith.constant 0.000000e+00 : f32
      %51 = vector.broadcast %cst_40 : f32 to vector<4x16x1xf32>
      %c0_41 = arith.constant 0 : index
      %c0_42 = arith.constant 0 : index
      %c0_43 = arith.constant 0 : index
      %52 = vector.load %arg9[%c0_41, %c0_42, %c0_43] : memref<4x16x1xf32, #tpu.memory_space<vmem>>, vector<4x16x1xf32>
      tpu.vector_store %arg9[%c0_41, %c0_42, %c0_43], %51 {strides = array<i32>} : memref<4x16x1xf32, #tpu.memory_space<vmem>>, vector<4x16x1xf32>,
      %cst_44 = arith.constant 0.000000e+00 : f32
      %53 = vector.broadcast %cst_44 : f32 to vector<4x16x32xf32>
      %c0_45 = arith.constant 0 : index
      %c0_46 = arith.constant 0 : index
      %c0_47 = arith.constant 0 : index
      %54 = vector.load %arg10[%c0_45, %c0_46, %c0_47] : memref<4x16x32xf32, #tpu.memory_space<vmem>>, vector<4x16x32xf32>
      tpu.vector_store %arg10[%c0_45, %c0_46, %c0_47], %53 {strides = array<i32>} : memref<4x16x32xf32, #tpu.memory_space<vmem>>, vector<4x16x32xf32>,
    } else {
    }
    %c0 = arith.constant 0 : index
    %c0_1 = arith.constant 0 : index
    %c0_2 = arith.constant 0 : index
    %3 = vector.load %arg3[%c0, %c0_1, %c0_2] : memref<1x16x128xbf16, #tpu.memory_space<vmem>>, vector<1x16x128xbf16>
    %4 = vector.shape_cast %3 : vector<1x16x128xbf16> to vector<16x128xbf16>
    %5 = vector.shape_cast %4 : vector<16x128xbf16> to vector<16x4x32xbf16>
    %6 = tpu.transpose %5, [1, 0, 2] : vector<16x4x32xbf16> -> vector<4x16x32xbf16>
    %c0_3 = arith.constant 0 : index
    %c0_4 = arith.constant 0 : index
    %c0_5 = arith.constant 0 : index
    %7 = vector.load %arg4[%c0_3, %c0_4, %c0_5] : memref<1x16x128xbf16, #tpu.memory_space<vmem>>, vector<1x16x128xbf16>
    %8 = vector.shape_cast %7 : vector<1x16x128xbf16> to vector<16x128xbf16>
    %9 = vector.shape_cast %8 : vector<16x128xbf16> to vector<16x4x32xbf16>
    %10 = tpu.transpose %9, [1, 0, 2] : vector<16x4x32xbf16> -> vector<4x16x32xbf16>
    %c0_6 = arith.constant 0 : index
    %c0_7 = arith.constant 0 : index
    %c0_8 = arith.constant 0 : index
    %11 = vector.load %arg5[%c0_6, %c0_7, %c0_8] : memref<1x16x128xbf16, #tpu.memory_space<vmem>>, vector<1x16x128xbf16>
    %12 = vector.shape_cast %11 : vector<1x16x128xbf16> to vector<16x128xbf16>
    %13 = vector.shape_cast %12 : vector<16x128xbf16> to vector<16x4x32xbf16>
    %14 = tpu.transpose %13, [1, 0, 2] : vector<16x4x32xbf16> -> vector<4x16x32xbf16>
    "tpu.trace_start"() <{level = 10 : i32, message = "hqd,hkd->hqk"}> : () -> ()
    %cst = arith.constant dense<0.000000e+00> : vector<4x16x16xf32>
    %15 = tpu.matmul %6, %10, %cst {dimension_numbers = #tpu.dot_dimension_numbers<[2], [2], [1], [1], [0, 0, 0, 1, 1, 1], [0], [0]>} : vector<4x16x32xbf16>, vector<4x16x32xbf16>, vector<4x16x16xf32> -> vector<4x16x16xf32>
    "tpu.trace_stop"() : () -> ()
    %cst_9 = arith.constant 0.176776692 : f32
    %16 = vector.broadcast %cst_9 : f32 to vector<4x16x16xf32>
    %17 = arith.mulf %15, %16 : vector<4x16x16xf32>
    %c0_10 = arith.constant 0 : index
    %c0_11 = arith.constant 0 : index
    %c0_12 = arith.constant 0 : index
    %18 = vector.load %arg6[%c0_10, %c0_11, %c0_12] : memref<1x1x16xf32, #tpu.memory_space<vmem>>, vector<1x1x16xf32>
    %19 = vector.shape_cast %18 : vector<1x1x16xf32> to vector<1x16xf32>
    %20 = vector.shape_cast %19 : vector<1x16xf32> to vector<1x1x16xf32>
    %21 = vector.broadcast %20 : vector<1x1x16xf32> to vector<4x16x16xf32>
    %22 = arith.addf %17, %21 : vector<4x16x16xf32>
    %c0_13 = arith.constant 0 : index
    %c0_14 = arith.constant 0 : index
    %c0_15 = arith.constant 0 : index
    %23 = vector.load %arg8[%c0_13, %c0_14, %c0_15] : memref<4x16x1xf32, #tpu.memory_space<vmem>>, vector<4x16x1xf32>
    %cst_16 = arith.constant dense<0xFF800000> : vector<4x16xf32>
    %24 = vector.multi_reduction <maximumf>, %22, %cst_16 [2] : vector<4x16x16xf32> to vector<4x16xf32>
    %25 = vector.shape_cast %24 : vector<4x16xf32> to vector<4x16x1xf32>
    %26 = arith.maximumf %23, %25 : vector<4x16x1xf32>
    %27 = arith.subf %23, %26 : vector<4x16x1xf32>
    %28 = math.exp %27 : vector<4x16x1xf32>
    %29 = vector.broadcast %26 : vector<4x16x1xf32> to vector<4x16x16xf32>
    %30 = arith.subf %22, %29 : vector<4x16x16xf32>
    %31 = math.exp %30 : vector<4x16x16xf32>
    %c0_17 = arith.constant 0 : index
    %c0_18 = arith.constant 0 : index
    %c0_19 = arith.constant 0 : index
    %32 = vector.load %arg9[%c0_17, %c0_18, %c0_19] : memref<4x16x1xf32, #tpu.memory_space<vmem>>, vector<4x16x1xf32>
    %33 = arith.mulf %28, %32 : vector<4x16x1xf32>
    %cst_20 = arith.constant dense<0.000000e+00> : vector<4x16xf32>
    %34 = vector.multi_reduction <add>, %31, %cst_20 [2] : vector<4x16x16xf32> to vector<4x16xf32>
    %35 = vector.shape_cast %34 : vector<4x16xf32> to vector<4x16x1xf32>
    %36 = arith.addf %33, %35 : vector<4x16x1xf32>
    %c0_21 = arith.constant 0 : index
    %c0_22 = arith.constant 0 : index
    %c0_23 = arith.constant 0 : index
    %37 = vector.load %arg9[%c0_21, %c0_22, %c0_23] : memref<4x16x1xf32, #tpu.memory_space<vmem>>, vector<4x16x1xf32>
    tpu.vector_store %arg9[%c0_21, %c0_22, %c0_23], %36 {strides = array<i32>} : memref<4x16x1xf32, #tpu.memory_space<vmem>>, vector<4x16x1xf32>,
    %c0_24 = arith.constant 0 : index
    %c0_25 = arith.constant 0 : index
    %c0_26 = arith.constant 0 : index
    %38 = vector.load %arg10[%c0_24, %c0_25, %c0_26] : memref<4x16x32xf32, #tpu.memory_space<vmem>>, vector<4x16x32xf32>
    %39 = vector.broadcast %28 : vector<4x16x1xf32> to vector<4x16x32xf32>
    %40 = arith.mulf %39, %38 : vector<4x16x32xf32>
    %41 = arith.truncf %31 : vector<4x16x16xf32> to vector<4x16x16xbf16>
    "tpu.trace_start"() <{level = 10 : i32, message = "hqk,hkd->hqd"}> : () -> ()
    %cst_27 = arith.constant dense<0.000000e+00> : vector<4x16x32xf32>
    %42 = tpu.matmul %41, %14, %cst_27 {dimension_numbers = #tpu.dot_dimension_numbers<[2], [1], [1], [2], [0, 0, 0, 1, 1, 2], [0], [0]>} : vector<4x16x16xbf16>, vector<4x16x32xbf16>, vector<4x16x32xf32> -> vector<4x16x32xf32>
    "tpu.trace_stop"() : () -> ()
    %43 = arith.addf %40, %42 : vector<4x16x32xf32>
    %c0_28 = arith.constant 0 : index
    %c0_29 = arith.constant 0 : index
    %c0_30 = arith.constant 0 : index
    %44 = vector.load %arg10[%c0_28, %c0_29, %c0_30] : memref<4x16x32xf32, #tpu.memory_space<vmem>>, vector<4x16x32xf32>
    tpu.vector_store %arg10[%c0_28, %c0_29, %c0_30], %43 {strides = array<i32>} : memref<4x16x32xf32, #tpu.memory_space<vmem>>, vector<4x16x32xf32>,
    %c0_31 = arith.constant 0 : index
    %c0_32 = arith.constant 0 : index
    %c0_33 = arith.constant 0 : index
    %45 = vector.load %arg8[%c0_31, %c0_32, %c0_33] : memref<4x16x1xf32, #tpu.memory_space<vmem>>, vector<4x16x1xf32>
    tpu.vector_store %arg8[%c0_31, %c0_32, %c0_33], %26 {strides = array<i32>} : memref<4x16x1xf32, #tpu.memory_space<vmem>>, vector<4x16x1xf32>,
    %c0_i32_34 = arith.constant 0 : i32
    %46 = arith.cmpi eq, %arg2, %c0_i32_34 : i32
    %47 = arith.extui %46 : i1 to i32
    %c0_i32_35 = arith.constant 0 : i32
    %48 = arith.cmpi ne, %47, %c0_i32_35 : i32
    scf.if %48 {
      %c0_36 = arith.constant 0 : index
      %c0_37 = arith.constant 0 : index
      %c0_38 = arith.constant 0 : index
      %49 = vector.load %arg10[%c0_36, %c0_37, %c0_38] : memref<4x16x32xf32, #tpu.memory_space<vmem>>, vector<4x16x32xf32>
      %c0_39 = arith.constant 0 : index
      %c0_40 = arith.constant 0 : index
      %c0_41 = arith.constant 0 : index
      %50 = vector.load %arg9[%c0_39, %c0_40, %c0_41] : memref<4x16x1xf32, #tpu.memory_space<vmem>>, vector<4x16x1xf32>
      %51 = tpu.reciprocal %50 {approx = true} : vector<4x16x1xf32> -> vector<4x16x1xf32>
      %52 = vector.broadcast %51 : vector<4x16x1xf32> to vector<4x16x32xf32>
      %53 = arith.mulf %49, %52 : vector<4x16x32xf32>
      %54 = tpu.transpose %53, [1, 0, 2] : vector<4x16x32xf32> -> vector<16x4x32xf32>
      %55 = vector.shape_cast %54 : vector<16x4x32xf32> to vector<16x128xf32>
      %56 = arith.truncf %55 : vector<16x128xf32> to vector<16x128xbf16>
      %c0_42 = arith.constant 0 : index
      %c0_43 = arith.constant 0 : index
      %c0_44 = arith.constant 0 : index
      %57 = vector.load %arg7[%c0_42, %c0_43, %c0_44] : memref<1x16x128xbf16, #tpu.memory_space<vmem>>, vector<1x16x128xbf16>
      %58 = vector.shape_cast %57 : vector<1x16x128xbf16> to vector<16x128xbf16>
      %59 = vector.shape_cast %56 : vector<16x128xbf16> to vector<1x16x128xbf16>
      tpu.vector_store %arg7[%c0_42, %c0_43, %c0_44], %59 {strides = array<i32>} : memref<1x16x128xbf16, #tpu.memory_space<vmem>>, vector<1x16x128xbf16>,
    } else {
    }
    return
  }
  func.func @transform_0(%arg0: i32, %arg1: i32, %arg2: i32) -> (i32, i32, i32) {
    %c0_i32 = arith.constant 0 : i32
    %c0_i32_0 = arith.constant 0 : i32
    return %arg0, %arg1, %c0_i32 : i32, i32, i32
  }
  func.func @transform_1(%arg0: i32, %arg1: i32, %arg2: i32) -> (i32, i32, i32) {
    %c1_i32 = arith.constant 1 : i32
    %c0_i32 = arith.constant 0 : i32
    return %arg0, %arg2, %c1_i32 : i32, i32, i32
  }
  func.func @transform_2(%arg0: i32, %arg1: i32, %arg2: i32) -> (i32, i32, i32) {
    %c2_i32 = arith.constant 2 : i32
    %c0_i32 = arith.constant 0 : i32
    return %arg0, %arg2, %c2_i32 : i32, i32, i32
  }
  func.func @transform_3(%arg0: i32, %arg1: i32, %arg2: i32) -> (i32, i32, i32) {
    %c0_i32 = arith.constant 0 : i32
    %c0_i32_0 = arith.constant 0 : i32
    return %arg0, %c0_i32, %arg2 : i32, i32, i32
  }
  func.func @transform_4(%arg0: i32, %arg1: i32, %arg2: i32) -> (i32, i32, i32) {
    %c0_i32 = arith.constant 0 : i32
    %c0_i32_0 = arith.constant 0 : i32
    return %arg0, %arg1, %c0_i32 : i32, i32, i32
  }
}

module attributes {stable_mosaic.version = 11 : i64} {
  func.func @_linear_add_ln_kernel(%arg0: i32, %arg1: memref<32x128xbf16, #tpu.memory_space<vmem>>, %arg2: memref<128x128xbf16, #tpu.memory_space<vmem>>, %arg3: memref<1x128xf32, #tpu.memory_space<vmem>>, %arg4: memref<32x128xf32, #tpu.memory_space<vmem>>, %arg5: memref<1x128xf32, #tpu.memory_space<vmem>>, %arg6: memref<1x128xf32, #tpu.memory_space<vmem>>, %arg7: memref<32x128xf32, #tpu.memory_space<vmem>>) attributes {dimension_semantics = [#tpu.dimension_semantics<parallel>], iteration_bounds = array<i64: 1>, scalar_prefetch = 0 : i64, scratch_operands = 0 : i64, tpu.core_type = #tpu.core_type<tc>, window_params = [{transform_indices = @transform_0, window_bounds = array<i64: 32, 128>}, {pipeline_mode = #tpu.pipeline_mode<synchronous>, transform_indices = @transform_1, window_bounds = array<i64: 128, 128>}, {pipeline_mode = #tpu.pipeline_mode<synchronous>, transform_indices = @transform_2, window_bounds = array<i64: 1, 128>}, {transform_indices = @transform_3, window_bounds = array<i64: 32, 128>}, {pipeline_mode = #tpu.pipeline_mode<synchronous>, transform_indices = @transform_4, window_bounds = array<i64: 1, 128>}, {pipeline_mode = #tpu.pipeline_mode<synchronous>, transform_indices = @transform_5, window_bounds = array<i64: 1, 128>}, {transform_indices = @transform_6, window_bounds = array<i64: 32, 128>}]} {
    %c0 = arith.constant 0 : index
    %c0_0 = arith.constant 0 : index
    %0 = vector.load %arg1[%c0, %c0_0] : memref<32x128xbf16, #tpu.memory_space<vmem>>, vector<32x128xbf16>
    %c0_1 = arith.constant 0 : index
    %c0_2 = arith.constant 0 : index
    %1 = vector.load %arg2[%c0_1, %c0_2] : memref<128x128xbf16, #tpu.memory_space<vmem>>, vector<128x128xbf16>
    %cst = arith.constant dense<0.000000e+00> : vector<32x128xf32>
    %2 = tpu.matmul %0, %1, %cst {dimension_numbers = #tpu.dot_dimension_numbers<[1], [0], [0], [1], [0, 0, 1, 1], [], []>} : vector<32x128xbf16>, vector<128x128xbf16>, vector<32x128xf32> -> vector<32x128xf32>
    %c0_3 = arith.constant 0 : index
    %c0_4 = arith.constant 0 : index
    %3 = vector.load %arg3[%c0_3, %c0_4] : memref<1x128xf32, #tpu.memory_space<vmem>>, vector<1x128xf32>
    %4 = vector.broadcast %3 : vector<1x128xf32> to vector<32x128xf32>
    %5 = arith.addf %2, %4 : vector<32x128xf32>
    %c0_5 = arith.constant 0 : index
    %c0_6 = arith.constant 0 : index
    %6 = vector.load %arg4[%c0_5, %c0_6] : memref<32x128xf32, #tpu.memory_space<vmem>>, vector<32x128xf32>
    %7 = arith.addf %5, %6 : vector<32x128xf32>
    %cst_7 = arith.constant dense<0.000000e+00> : vector<32xf32>
    %8 = vector.multi_reduction <add>, %7, %cst_7 [1] : vector<32x128xf32> to vector<32xf32>
    %9 = vector.shape_cast %8 : vector<32xf32> to vector<32x1xf32>
    %cst_8 = arith.constant 1.280000e+02 : f32
    %10 = vector.broadcast %cst_8 : f32 to vector<32x1xf32>
    %11 = arith.divf %9, %10 : vector<32x1xf32>
    %12 = vector.broadcast %11 : vector<32x1xf32> to vector<32x128xf32>
    %13 = arith.subf %7, %12 : vector<32x128xf32>
    %14 = arith.mulf %13, %13 : vector<32x128xf32>
    %cst_9 = arith.constant dense<0.000000e+00> : vector<32xf32>
    %15 = vector.multi_reduction <add>, %14, %cst_9 [1] : vector<32x128xf32> to vector<32xf32>
    %16 = vector.shape_cast %15 : vector<32xf32> to vector<32x1xf32>
    %cst_10 = arith.constant 1.280000e+02 : f32
    %17 = vector.broadcast %cst_10 : f32 to vector<32x1xf32>
    %18 = arith.divf %16, %17 : vector<32x1xf32>
    %19 = vector.broadcast %11 : vector<32x1xf32> to vector<32x128xf32>
    %20 = arith.subf %7, %19 : vector<32x128xf32>
    %cst_11 = arith.constant 9.99999974E-6 : f32
    %21 = vector.broadcast %cst_11 : f32 to vector<32x1xf32>
    %22 = arith.addf %18, %21 : vector<32x1xf32>
    %23 = math.rsqrt %22 : vector<32x1xf32>
    %24 = vector.broadcast %23 : vector<32x1xf32> to vector<32x128xf32>
    %25 = arith.mulf %20, %24 : vector<32x128xf32>
    %c0_12 = arith.constant 0 : index
    %c0_13 = arith.constant 0 : index
    %26 = vector.load %arg5[%c0_12, %c0_13] : memref<1x128xf32, #tpu.memory_space<vmem>>, vector<1x128xf32>
    %27 = vector.broadcast %26 : vector<1x128xf32> to vector<32x128xf32>
    %28 = arith.mulf %25, %27 : vector<32x128xf32>
    %c0_14 = arith.constant 0 : index
    %c0_15 = arith.constant 0 : index
    %29 = vector.load %arg6[%c0_14, %c0_15] : memref<1x128xf32, #tpu.memory_space<vmem>>, vector<1x128xf32>
    %30 = vector.broadcast %29 : vector<1x128xf32> to vector<32x128xf32>
    %31 = arith.addf %28, %30 : vector<32x128xf32>
    %c0_16 = arith.constant 0 : index
    %c0_17 = arith.constant 0 : index
    %32 = vector.load %arg7[%c0_16, %c0_17] : memref<32x128xf32, #tpu.memory_space<vmem>>, vector<32x128xf32>
    tpu.vector_store %arg7[%c0_16, %c0_17], %31 {strides = array<i32>} : memref<32x128xf32, #tpu.memory_space<vmem>>, vector<32x128xf32>,
    return
  }
  func.func @transform_0(%arg0: i32) -> (i32, i32) {
    %c0_i32 = arith.constant 0 : i32
    %c0_i32_0 = arith.constant 0 : i32
    return %arg0, %c0_i32 : i32, i32
  }
  func.func @transform_1(%arg0: i32) -> (i32, i32) {
    %c0_i32 = arith.constant 0 : i32
    %c0_i32_0 = arith.constant 0 : i32
    %c0_i32_1 = arith.constant 0 : i32
    return %c0_i32, %c0_i32_0 : i32, i32
  }
  func.func @transform_2(%arg0: i32) -> (i32, i32) {
    %c0_i32 = arith.constant 0 : i32
    %c0_i32_0 = arith.constant 0 : i32
    %c0_i32_1 = arith.constant 0 : i32
    return %c0_i32, %c0_i32_0 : i32, i32
  }
  func.func @transform_3(%arg0: i32) -> (i32, i32) {
    %c0_i32 = arith.constant 0 : i32
    %c0_i32_0 = arith.constant 0 : i32
    return %arg0, %c0_i32 : i32, i32
  }
  func.func @transform_4(%arg0: i32) -> (i32, i32) {
    %c0_i32 = arith.constant 0 : i32
    %c0_i32_0 = arith.constant 0 : i32
    %c0_i32_1 = arith.constant 0 : i32
    return %c0_i32, %c0_i32_0 : i32, i32
  }
  func.func @transform_5(%arg0: i32) -> (i32, i32) {
    %c0_i32 = arith.constant 0 : i32
    %c0_i32_0 = arith.constant 0 : i32
    %c0_i32_1 = arith.constant 0 : i32
    return %c0_i32, %c0_i32_0 : i32, i32
  }
  func.func @transform_6(%arg0: i32) -> (i32, i32) {
    %c0_i32 = arith.constant 0 : i32
    %c0_i32_0 = arith.constant 0 : i32
    return %arg0, %c0_i32 : i32, i32
  }
}

module attributes {stable_mosaic.version = 11 : i64} {
  func.func @_ffn_kernel(%arg0: i32, %arg1: i32, %arg2: memref<32x128xf32, #tpu.memory_space<vmem>>, %arg3: memref<128x512xbf16, #tpu.memory_space<vmem>>, %arg4: memref<1x512xf32, #tpu.memory_space<vmem>>, %arg5: memref<512x128xbf16, #tpu.memory_space<vmem>>, %arg6: memref<1x128xf32, #tpu.memory_space<vmem>>, %arg7: memref<1x128xf32, #tpu.memory_space<vmem>>, %arg8: memref<1x128xf32, #tpu.memory_space<vmem>>, %arg9: memref<32x128xf32, #tpu.memory_space<vmem>>, %arg10: memref<32x128xf32, #tpu.memory_space<vmem>>) attributes {dimension_semantics = [#tpu.dimension_semantics<parallel>, #tpu.dimension_semantics<arbitrary>], iteration_bounds = array<i64: 1, 1>, scalar_prefetch = 0 : i64, scratch_operands = 1 : i64, tpu.core_type = #tpu.core_type<tc>, window_params = [{transform_indices = @transform_0, window_bounds = array<i64: 32, 128>}, {transform_indices = @transform_1, window_bounds = array<i64: 128, 512>}, {transform_indices = @transform_2, window_bounds = array<i64: 1, 512>}, {transform_indices = @transform_3, window_bounds = array<i64: 512, 128>}, {pipeline_mode = #tpu.pipeline_mode<synchronous>, transform_indices = @transform_4, window_bounds = array<i64: 1, 128>}, {pipeline_mode = #tpu.pipeline_mode<synchronous>, transform_indices = @transform_5, window_bounds = array<i64: 1, 128>}, {pipeline_mode = #tpu.pipeline_mode<synchronous>, transform_indices = @transform_6, window_bounds = array<i64: 1, 128>}, {transform_indices = @transform_7, window_bounds = array<i64: 32, 128>}]} {
    %c0_i32 = arith.constant 0 : i32
    %0 = arith.cmpi eq, %arg1, %c0_i32 : i32
    %1 = arith.extui %0 : i1 to i32
    %c0_i32_0 = arith.constant 0 : i32
    %2 = arith.cmpi ne, %1, %c0_i32_0 : i32
    scf.if %2 {
      %cst_16 = arith.constant 0.000000e+00 : f32
      %21 = vector.broadcast %cst_16 : f32 to vector<32x128xf32>
      %c0_17 = arith.constant 0 : index
      %c0_18 = arith.constant 0 : index
      %22 = vector.load %arg10[%c0_17, %c0_18] : memref<32x128xf32, #tpu.memory_space<vmem>>, vector<32x128xf32>
      tpu.vector_store %arg10[%c0_17, %c0_18], %21 {strides = array<i32>} : memref<32x128xf32, #tpu.memory_space<vmem>>, vector<32x128xf32>,
    } else {
    }
    %c0 = arith.constant 0 : index
    %c0_1 = arith.constant 0 : index
    %3 = vector.load %arg2[%c0, %c0_1] : memref<32x128xf32, #tpu.memory_space<vmem>>, vector<32x128xf32>
    %4 = arith.truncf %3 : vector<32x128xf32> to vector<32x128xbf16>
    %c0_2 = arith.constant 0 : index
    %c0_3 = arith.constant 0 : index
    %5 = vector.load %arg3[%c0_2, %c0_3] : memref<128x512xbf16, #tpu.memory_space<vmem>>, vector<128x512xbf16>
    %cst = arith.constant dense<0.000000e+00> : vector<32x512xf32>
    %6 = tpu.matmul %4, %5, %cst {dimension_numbers = #tpu.dot_dimension_numbers<[1], [0], [0], [1], [0, 0, 1, 1], [], []>} : vector<32x128xbf16>, vector<128x512xbf16>, vector<32x512xf32> -> vector<32x512xf32>
    %c0_4 = arith.constant 0 : index
    %c0_5 = arith.constant 0 : index
    %7 = vector.load %arg4[%c0_4, %c0_5] : memref<1x512xf32, #tpu.memory_space<vmem>>, vector<1x512xf32>
    %8 = vector.broadcast %7 : vector<1x512xf32> to vector<32x512xf32>
    %9 = arith.addf %6, %8 : vector<32x512xf32>
    %cst_6 = arith.constant 0.000000e+00 : f32
    %10 = vector.broadcast %cst_6 : f32 to vector<32x512xf32>
    %11 = arith.maximumf %9, %10 : vector<32x512xf32>
    %c0_7 = arith.constant 0 : index
    %c0_8 = arith.constant 0 : index
    %12 = vector.load %arg10[%c0_7, %c0_8] : memref<32x128xf32, #tpu.memory_space<vmem>>, vector<32x128xf32>
    %13 = arith.truncf %11 : vector<32x512xf32> to vector<32x512xbf16>
    %c0_9 = arith.constant 0 : index
    %c0_10 = arith.constant 0 : index
    %14 = vector.load %arg5[%c0_9, %c0_10] : memref<512x128xbf16, #tpu.memory_space<vmem>>, vector<512x128xbf16>
    %cst_11 = arith.constant dense<0.000000e+00> : vector<32x128xf32>
    %15 = tpu.matmul %13, %14, %cst_11 {dimension_numbers = #tpu.dot_dimension_numbers<[1], [0], [0], [1], [0, 0, 1, 1], [], []>} : vector<32x512xbf16>, vector<512x128xbf16>, vector<32x128xf32> -> vector<32x128xf32>
    %16 = arith.addf %12, %15 : vector<32x128xf32>
    %c0_12 = arith.constant 0 : index
    %c0_13 = arith.constant 0 : index
    %17 = vector.load %arg10[%c0_12, %c0_13] : memref<32x128xf32, #tpu.memory_space<vmem>>, vector<32x128xf32>
    tpu.vector_store %arg10[%c0_12, %c0_13], %16 {strides = array<i32>} : memref<32x128xf32, #tpu.memory_space<vmem>>, vector<32x128xf32>,
    %c0_i32_14 = arith.constant 0 : i32
    %18 = arith.cmpi eq, %arg1, %c0_i32_14 : i32
    %19 = arith.extui %18 : i1 to i32
    %c0_i32_15 = arith.constant 0 : i32
    %20 = arith.cmpi ne, %19, %c0_i32_15 : i32
    scf.if %20 {
      %c0_16 = arith.constant 0 : index
      %c0_17 = arith.constant 0 : index
      %21 = vector.load %arg10[%c0_16, %c0_17] : memref<32x128xf32, #tpu.memory_space<vmem>>, vector<32x128xf32>
      %c0_18 = arith.constant 0 : index
      %c0_19 = arith.constant 0 : index
      %22 = vector.load %arg6[%c0_18, %c0_19] : memref<1x128xf32, #tpu.memory_space<vmem>>, vector<1x128xf32>
      %23 = vector.broadcast %22 : vector<1x128xf32> to vector<32x128xf32>
      %24 = arith.addf %21, %23 : vector<32x128xf32>
      %c0_20 = arith.constant 0 : index
      %c0_21 = arith.constant 0 : index
      %25 = vector.load %arg2[%c0_20, %c0_21] : memref<32x128xf32, #tpu.memory_space<vmem>>, vector<32x128xf32>
      %26 = arith.addf %24, %25 : vector<32x128xf32>
      %cst_22 = arith.constant dense<0.000000e+00> : vector<32xf32>
      %27 = vector.multi_reduction <add>, %26, %cst_22 [1] : vector<32x128xf32> to vector<32xf32>
      %28 = vector.shape_cast %27 : vector<32xf32> to vector<32x1xf32>
      %cst_23 = arith.constant 1.280000e+02 : f32
      %29 = vector.broadcast %cst_23 : f32 to vector<32x1xf32>
      %30 = arith.divf %28, %29 : vector<32x1xf32>
      %31 = vector.broadcast %30 : vector<32x1xf32> to vector<32x128xf32>
      %32 = arith.subf %26, %31 : vector<32x128xf32>
      %33 = arith.mulf %32, %32 : vector<32x128xf32>
      %cst_24 = arith.constant dense<0.000000e+00> : vector<32xf32>
      %34 = vector.multi_reduction <add>, %33, %cst_24 [1] : vector<32x128xf32> to vector<32xf32>
      %35 = vector.shape_cast %34 : vector<32xf32> to vector<32x1xf32>
      %cst_25 = arith.constant 1.280000e+02 : f32
      %36 = vector.broadcast %cst_25 : f32 to vector<32x1xf32>
      %37 = arith.divf %35, %36 : vector<32x1xf32>
      %38 = vector.broadcast %30 : vector<32x1xf32> to vector<32x128xf32>
      %39 = arith.subf %26, %38 : vector<32x128xf32>
      %cst_26 = arith.constant 9.99999974E-6 : f32
      %40 = vector.broadcast %cst_26 : f32 to vector<32x1xf32>
      %41 = arith.addf %37, %40 : vector<32x1xf32>
      %42 = math.rsqrt %41 : vector<32x1xf32>
      %43 = vector.broadcast %42 : vector<32x1xf32> to vector<32x128xf32>
      %44 = arith.mulf %39, %43 : vector<32x128xf32>
      %c0_27 = arith.constant 0 : index
      %c0_28 = arith.constant 0 : index
      %45 = vector.load %arg7[%c0_27, %c0_28] : memref<1x128xf32, #tpu.memory_space<vmem>>, vector<1x128xf32>
      %46 = vector.broadcast %45 : vector<1x128xf32> to vector<32x128xf32>
      %47 = arith.mulf %44, %46 : vector<32x128xf32>
      %c0_29 = arith.constant 0 : index
      %c0_30 = arith.constant 0 : index
      %48 = vector.load %arg8[%c0_29, %c0_30] : memref<1x128xf32, #tpu.memory_space<vmem>>, vector<1x128xf32>
      %49 = vector.broadcast %48 : vector<1x128xf32> to vector<32x128xf32>
      %50 = arith.addf %47, %49 : vector<32x128xf32>
      %c0_31 = arith.constant 0 : index
      %c0_32 = arith.constant 0 : index
      %51 = vector.load %arg9[%c0_31, %c0_32] : memref<32x128xf32, #tpu.memory_space<vmem>>, vector<32x128xf32>
      tpu.vector_store %arg9[%c0_31, %c0_32], %50 {strides = array<i32>} : memref<32x128xf32, #tpu.memory_space<vmem>>, vector<32x128xf32>,
    } else {
    }
    return
  }
  func.func @transform_0(%arg0: i32, %arg1: i32) -> (i32, i32) {
    %c0_i32 = arith.constant 0 : i32
    %c0_i32_0 = arith.constant 0 : i32
    return %arg0, %c0_i32 : i32, i32
  }
  func.func @transform_1(%arg0: i32, %arg1: i32) -> (i32, i32) {
    %c0_i32 = arith.constant 0 : i32
    %c0_i32_0 = arith.constant 0 : i32
    return %c0_i32, %arg1 : i32, i32
  }
  func.func @transform_2(%arg0: i32, %arg1: i32) -> (i32, i32) {
    %c0_i32 = arith.constant 0 : i32
    %c0_i32_0 = arith.constant 0 : i32
    return %c0_i32, %arg1 : i32, i32
  }
  func.func @transform_3(%arg0: i32, %arg1: i32) -> (i32, i32) {
    %c0_i32 = arith.constant 0 : i32
    %c0_i32_0 = arith.constant 0 : i32
    return %arg1, %c0_i32 : i32, i32
  }
  func.func @transform_4(%arg0: i32, %arg1: i32) -> (i32, i32) {
    %c0_i32 = arith.constant 0 : i32
    %c0_i32_0 = arith.constant 0 : i32
    %c0_i32_1 = arith.constant 0 : i32
    return %c0_i32, %c0_i32_0 : i32, i32
  }
  func.func @transform_5(%arg0: i32, %arg1: i32) -> (i32, i32) {
    %c0_i32 = arith.constant 0 : i32
    %c0_i32_0 = arith.constant 0 : i32
    %c0_i32_1 = arith.constant 0 : i32
    return %c0_i32, %c0_i32_0 : i32, i32
  }
  func.func @transform_6(%arg0: i32, %arg1: i32) -> (i32, i32) {
    %c0_i32 = arith.constant 0 : i32
    %c0_i32_0 = arith.constant 0 : i32
    %c0_i32_1 = arith.constant 0 : i32
    return %c0_i32, %c0_i32_0 : i32, i32
  }
  func.func @transform_7(%arg0: i32, %arg1: i32) -> (i32, i32) {
    %c0_i32 = arith.constant 0 : i32
    %c0_i32_0 = arith.constant 0 : i32
    return %arg0, %c0_i32 : i32, i32
  }
}

</mosaic_0001>

<bundles_post_ra>
// kernel: transformer_encoder_layer.4
= control target key start
LH: loop header
LB: loop body
LE: loop exit
PB: predicated region body
PF: predicated region fallthrough
CT: control target
= control target key end

     0   :  { %8 = vsyncpa [#allocation3], 0  ;;  %s439_s15 = smov [#allocation2]   ;;  %s440_s17 = smov 192   ;;  %s504_s0 = inlined_call_operand.vmem [shape: f32[32,128], index: 0, kind: input, shape index: {}]   ;;  %s505_s1 = inlined_call_operand.hbm [shape: bf16[128,384], index: 1, kind: input, shape index: {}]   ;;  %s506_s2 = inlined_call_operand.vmem [shape: f32[1,384], index: 2, kind: input, shape index: {}]   ;;  %s507_s3 = inlined_call_operand.vmem [shape: bf16[32,384], index: 3, kind: output, shape index: {}]  }
   0x1   :  { %s15_s14 = sshll.u32 %s505_s1, 4  ;;  %s17_s16 = sshll.u32 %s439_s15, 4  ;;  %s16_s14 = int_to_ptr.hbm [resolvable:$true] %s15_s14  ;;  %s18_s16 = int_to_ptr.vmem [resolvable:$true] %s17_s16 }
   0x2   :  { %s441_s18 = smov 12  }
   0x3   :  { %23 = dma.hbm_to_vmem [thread:$0]  %s16_s14, 3072, %s18_s16, [#allocation3], %s440_s17, %s440_s17, %s441_s18  }
   0x4   :  { %437 = dma.done.wait [#allocation3], 3072  }
   0x5   :  { %438 = vsyncadd [#allocation3], 4294964224  ;;  %v368_v0 = vld [vmem:[#allocation2 + $0xa8] sm:$0xf]  ;;  %v400_v1 = vld [vmem:[#allocation2 + $0xb0] sm:$0xf0] }
   0x6   :  { %v399_v2 = vld [vmem:[#allocation2 + $0xac] sm:$0xf]  ;;  %v369_v3 = vor.u32 %v400_v1, %v368_v0  ;;  %v370_v4 = vld [vmem:[#allocation2 + $0xb4] sm:$0xf0]  ;;  %v376_v5 = vld [vmem:[#allocation2 + $0xb0] sm:$0xf] }
   0x7   :  { %v401_v6 = vld [vmem:[#allocation2 + $0xb8] sm:$0xf0]  ;;  %v373_v7 = vor.u32 %v399_v2, %v370_v4  ;;  %v356_v9 = vld [vmem:[#allocation2 + $0x90] sm:$0xf]  ;;  %v396_v11 = vld [vmem:[#allocation2 + $0x94] sm:$0xf] }
   0x8   :  { %v377_v8 = vor.u32 %v401_v6, %v376_v5  ;;  %v397_v10 = vld [vmem:[#allocation2 + $0x98] sm:$0xf0]  ;;  %204 = vmatpush.bf16.msra.mxu0 %v369_v3  ;;  %v358_v13 = vld [vmem:[#allocation2 + $0x9c] sm:$0xf0]  ;;  %v364_v14 = vld [vmem:[#allocation2 + $0x98] sm:$0xf]  ;;  %402 = vmatpush.bf16.msra.mxu3 %v369_v3 }
   0x9   :  { %v357_v12 = vor.u32 %v397_v10, %v356_v9  ;;  %v398_v15 = vld [vmem:[#allocation2 + $0xa0] sm:$0xf0]  ;;  %223 = vmatpush.bf16.msra.mxu1 %v373_v7  ;;  %v361_v16 = vor.u32 %v396_v11, %v358_v13  ;;  %v344_v18 = vld [vmem:[#allocation2 + $0x78] sm:$0xf]  ;;  %v393_v20 = vld [vmem:[#allocation2 + $0x7c] sm:$0xf] }
   0xa   :  { %242 = vmatpush.bf16.msra.mxu2 %v377_v8  ;;  %v365_v17 = vor.u32 %v398_v15, %v364_v14  ;;  %v394_v19 = vld [vmem:[#allocation2 + $0x80] sm:$0xf0]  ;;  %v346_v21 = vld [vmem:[#allocation2 + $0x84] sm:$0xf0]  ;;  %v352_v22 = vld [vmem:[#allocation2 + $0x80] sm:$0xf] }
   0xb   :  { %v395_v23 = vld [vmem:[#allocation2 + $0x88] sm:$0xf0]  ;;  %v345_v24 = vor.u32 %v394_v19, %v344_v18  ;;  %v349_v25 = vor.u32 %v393_v20, %v346_v21  ;;  %v332_v27 = vld [vmem:[#allocation2 + $0x60] sm:$0xf]  ;;  %v390_v29 = vld [vmem:[#allocation2 + $0x64] sm:$0xf] }
   0xc   :  { %205 = vmatpush.bf16.msra.mxu0 %v357_v12  ;;  %403 = vmatpush.bf16.msra.mxu3 %v357_v12  ;;  %v353_v26 = vor.u32 %v395_v23, %v352_v22  ;;  %v391_v28 = vld [vmem:[#allocation2 + $0x68] sm:$0xf0]  ;;  %v334_v30 = vld [vmem:[#allocation2 + $0x6c] sm:$0xf0]  ;;  %v340_v31 = vld [vmem:[#allocation2 + $0x68] sm:$0xf] }
   0xd   :  { %224 = vmatpush.bf16.msra.mxu1 %v361_v16  ;;  %v392_v32 = vld [vmem:[#allocation2 + $0x70] sm:$0xf0]  ;;  %v333_v33 = vor.u32 %v391_v28, %v332_v27  ;;  %v337_v34 = vor.u32 %v390_v29, %v334_v30  ;;  %v320_v36 = vld [vmem:[#allocation2 + $0x48] sm:$0xf]  ;;  %v387_v38 = vld [vmem:[#allocation2 + $0x4c] sm:$0xf] }
   0xe   :  { %243 = vmatpush.bf16.msra.mxu2 %v365_v17  ;;  %v341_v35 = vor.u32 %v392_v32, %v340_v31  ;;  %v388_v37 = vld [vmem:[#allocation2 + $0x50] sm:$0xf0]  ;;  %v322_v39 = vld [vmem:[#allocation2 + $0x54] sm:$0xf0]  ;;  %v328_v40 = vld [vmem:[#allocation2 + $0x50] sm:$0xf] }
   0xf   :  { %v389_v41 = vld [vmem:[#allocation2 + $0x58] sm:$0xf0]  ;;  %v321_v42 = vor.u32 %v388_v37, %v320_v36  ;;  %v325_v43 = vor.u32 %v387_v38, %v322_v39  ;;  %v308_v45 = vld [vmem:[#allocation2 + $0x30] sm:$0xf]  ;;  %v384_v47 = vld [vmem:[#allocation2 + $0x34] sm:$0xf] }
  0x10   :  { %206 = vmatpush.bf16.msra.mxu0 %v345_v24  ;;  %404 = vmatpush.bf16.msra.mxu3 %v345_v24  ;;  %v329_v44 = vor.u32 %v389_v41, %v328_v40  ;;  %v385_v46 = vld [vmem:[#allocation2 + $0x38] sm:$0xf0]  ;;  %v310_v48 = vld [vmem:[#allocation2 + $0x3c] sm:$0xf0]  ;;  %v316_v49 = vld [vmem:[#allocation2 + $0x38] sm:$0xf] }
  0x11   :  { %225 = vmatpush.bf16.msra.mxu1 %v349_v25  ;;  %v386_v50 = vld [vmem:[#allocation2 + $0x40] sm:$0xf0]  ;;  %v309_v51 = vor.u32 %v385_v46, %v308_v45  ;;  %v313_v52 = vor.u32 %v384_v47, %v310_v48  ;;  %v296_v54 = vld [vmem:[#allocation2 + $0x18] sm:$0xf]  ;;  %v381_v56 = vld [vmem:[#allocation2 + $0x1c] sm:$0xf] }
  0x12   :  { %244 = vmatpush.bf16.msra.mxu2 %v353_v26  ;;  %v317_v53 = vor.u32 %v386_v50, %v316_v49  ;;  %v382_v55 = vld [vmem:[#allocation2 + $0x20] sm:$0xf0]  ;;  %v298_v57 = vld [vmem:[#allocation2 + $0x24] sm:$0xf0]  ;;  %v304_v58 = vld [vmem:[#allocation2 + $0x20] sm:$0xf] }
  0x13   :  { %v383_v59 = vld [vmem:[#allocation2 + $0x28] sm:$0xf0]  ;;  %v297_v60 = vor.u32 %v382_v55, %v296_v54  ;;  %v301_v61 = vor.u32 %v381_v56, %v298_v57  ;;  %v284_v63 = vld [vmem:[#allocation2] sm:$0xf]  ;;  %v378_v1 = vld [vmem:[#allocation2 + $0x4] sm:$0xf] }
  0x14   :  { %207 = vmatpush.bf16.msra.mxu0 %v333_v33  ;;  %405 = vmatpush.bf16.msra.mxu3 %v333_v33  ;;  %v305_v62 = vor.u32 %v383_v59, %v304_v58  ;;  %v379_v0 = vld [vmem:[#allocation2 + $0x8] sm:$0xf0]  ;;  %v286_v2 = vld [vmem:[#allocation2 + $0xc] sm:$0xf0]  ;;  %v292_v3 = vld [vmem:[#allocation2 + $0x8] sm:$0xf] }
  0x15   :  { %226 = vmatpush.bf16.msra.mxu1 %v337_v34  ;;  %v380_v4 = vld [vmem:[#allocation2 + $0x10] sm:$0xf0]  ;;  %v30_v5 = vld [vmem:[%s504_s0] sm:$0xff]  ;;  %v285_v6 = vor.u32 %v379_v0, %v284_v63  ;;  %v31_v7 = vld [vmem:[%s504_s0 + $0x8] sm:$0xff]  ;;  %v289_v10 = vor.u32 %v378_v1, %v286_v2 }
  0x16   :  { %245 = vmatpush.bf16.msra.mxu2 %v341_v35  ;;  %v32_v8 = vld [vmem:[%s504_s0 + $0x10] sm:$0xff]  ;;  %v33_v9 = vld [vmem:[%s504_s0 + $0x18] sm:$0xff]  ;;  %v293_v11 = vor.u32 %v380_v4, %v292_v3  ;;  %v34_v12 = vpack.c.bf16 %v31_v7, %v30_v5  ;;  %v68_v14 = vld [vmem:[%s506_s2] sm:$0x7] }
  0x17   :  { %v35_v13 = vpack.c.bf16 %v33_v9, %v32_v8  ;;  %v70_v15 = vperm.slane %v68_v14, 0  ;;  %v71_v16 = vperm.slane %v68_v14, 1  ;;  %v72_v22 = vperm.slane %v68_v14, 2 }
  0x18   :  { %208 = vmatpush.bf16.msra.mxu0 %v321_v42  ;;  %406 = vmatpush.bf16.msra.mxu3 %v321_v42 }
  0x19   :  { %227 = vmatpush.bf16.msra.mxu1 %v325_v43 }
  0x1a   :  { %246 = vmatpush.bf16.msra.mxu2 %v329_v44 }
  0x1c   :  { %209 = vmatpush.bf16.msra.mxu0 %v309_v51  ;;  %407 = vmatpush.bf16.msra.mxu3 %v309_v51 }
  0x1d   :  { %228 = vmatpush.bf16.msra.mxu1 %v313_v52 }
  0x1e   :  { %247 = vmatpush.bf16.msra.mxu2 %v317_v53 }
  0x20   :  { %210 = vmatpush.bf16.msra.mxu0 %v297_v60  ;;  %408 = vmatpush.bf16.msra.mxu3 %v297_v60 }
  0x21   :  { %229 = vmatpush.bf16.msra.mxu1 %v301_v61 }
  0x22   :  { %248 = vmatpush.bf16.msra.mxu2 %v305_v62 }
  0x24   :  { %211 = vmatpush.bf16.msra.mxu0 %v285_v6  ;;  %409 = vmatpush.bf16.msra.mxu3 %v285_v6 }
  0x25   :  { %230 = vmatpush.bf16.msra.mxu1 %v289_v10 }
  0x26   :  { %249 = vmatpush.bf16.msra.mxu2 %v293_v11 }
  0x27   :  { %212 = vmatmul.bf16.vlgmr.msra.gmra.mxu0 %v34_v12  ;;  %217 = vmatmul.bf16.vlgmr.msra.gmra.mxu3 %v35_v13 }
  0x28   :  { %231 = vmatmul.bf16.vlgmr.msra.gmra.mxu1 %v34_v12 }
  0x29   :  { %250 = vmatmul.bf16.vlgmr.msra.gmra.mxu2 %v34_v12 }
  0x38   :  { %236 = vmatmul.bf16.gmra.mxu1 %v35_v13 }
  0x39   :  { %255 = vmatmul.bf16.gmra.mxu2 %v35_v13 }
  0xa4   :  { %v213_v17 = vpop.f32.mrf.mxu0 }
  0xa5   :  { %v214_v18 = vadd.f32 %v213_v17, %v70_v15  ;;  %v232_v19 = vpop.f32.mrf.mxu1 }
  0xa6   :  { %v233_v20 = vadd.f32 %v232_v19, %v71_v16 }
  0xa8   :  { %v261_v21 = vpack.c.bf16 %v233_v20, %v214_v18 }
  0xaa   :  { %269 = vst [vmem:[%s507_s3] sm:$0xff] %v261_v21  ;;  %v218_v31 = vpop.f32.mrf.mxu3 }
  0xab   :  { %v219_v33 = vadd.f32 %v218_v31, %v70_v15 }
  0xac   :  { %v251_v23 = vpop.f32.mrf.mxu2  ;;  %v215_v25 = vpop.f32.mrf.mxu0 }
  0xad   :  { %v252_v24 = vadd.f32 %v251_v23, %v72_v22  ;;  %v216_v26 = vadd.f32 %v215_v25, %v70_v15  ;;  %v234_v27 = vpop.f32.mrf.mxu1 }
  0xae   :  { %v235_v29 = vadd.f32 %v234_v27, %v71_v16 }
  0xaf   :  { %v262_v28 = vpack.c.bf16 %v252_v24, %v252_v24 }
  0xb0   :  { %v263_v30 = vpack.c.bf16 %v235_v29, %v216_v26 }
  0xb1   :  { %270 = vst [vmem:[%s507_s3 + $0x8] sm:$0xf] %v262_v28 }
  0xb2   :  { %271 = vst [vmem:[%s507_s3 + $0xc] sm:$0xff] %v263_v30  ;;  %v220_v39 = vpop.f32.mrf.mxu3 }
  0xb3   :  { %v221_v43 = vadd.f32 %v220_v39, %v70_v15 }
  0xb4   :  { %v253_v32 = vpop.f32.mrf.mxu2 }
  0xb5   :  { %v254_v34 = vadd.f32 %v253_v32, %v72_v22  ;;  %v237_v35 = vpop.f32.mrf.mxu1 }
  0xb6   :  { %v238_v37 = vadd.f32 %v237_v35, %v71_v16 }
  0xb7   :  { %v264_v36 = vpack.c.bf16 %v254_v34, %v254_v34 }
  0xb8   :  { %v265_v38 = vpack.c.bf16 %v238_v37, %v219_v33 }
  0xb9   :  { %272 = vst [vmem:[%s507_s3 + $0x14] sm:$0xf] %v264_v36 }
  0xba   :  { %273 = vst [vmem:[%s507_s3 + $0x18] sm:$0xff] %v265_v38 }
  0xbc   :  { %v256_v40 = vpop.f32.mrf.mxu2 }
  0xbd   :  { %v257_v41 = vadd.f32 %v256_v40, %v72_v22  ;;  %v239_v42 = vpop.f32.mrf.mxu1 }
  0xbe   :  { %v240_v45 = vadd.f32 %v239_v42, %v71_v16 }
  0xbf   :  { %v266_v44 = vpack.c.bf16 %v257_v41, %v257_v41 }
  0xc0   :  { %v267_v46 = vpack.c.bf16 %v240_v45, %v221_v43 }
  0xc1   :  { %274 = vst [vmem:[%s507_s3 + $0x20] sm:$0xf] %v266_v44 }
  0xc2   :  { %275 = vst [vmem:[%s507_s3 + $0x24] sm:$0xff] %v267_v46 }
  0xc4   :  { %v258_v47 = vpop.f32.mrf.mxu2 }
  0xc5   :  { %v259_v48 = vadd.f32 %v258_v47, %v72_v22 }
  0xc7   :  { %v268_v49 = vpack.c.bf16 %v259_v48, %v259_v48 }
  0xc9   :  { %276 = vst [vmem:[%s507_s3 + $0x2c] sm:$0xf] %v268_v49 }
  0xca   :  { %281 = vsyncpa [#allocation3], 1 }

// kernel: transformer_encoder_layer.6
= control target key start
LH: loop header
LB: loop body
LE: loop exit
PB: predicated region body
PF: predicated region fallthrough
CT: control target
= control target key end

     0   :  { %v317_v27 = vmov 128.0   ;;  %s426_s1 = inlined_call_operand.vmem [shape: bf16[128,128], index: 1, kind: input, shape index: {}]   ;;  %s427_s2 = inlined_call_operand.vmem [shape: f32[1,128], index: 2, kind: input, shape index: {}]   ;;  %s428_s0 = inlined_call_operand.vmem [shape: bf16[32,128], index: 0, kind: input, shape index: {}]   ;;  %s429_s3 = inlined_call_operand.vmem [shape: f32[32,128], index: 3, kind: input, shape index: {}]   ;;  %s430_s4 = inlined_call_operand.vmem [shape: f32[1,128], index: 4, kind: input, shape index: {}]   ;;  %s431_s5 = inlined_call_operand.vmem [shape: f32[1,128], index: 5, kind: input, shape index: {}]   ;;  %s432_s6 = inlined_call_operand.vmem [shape: f32[32,128], index: 6, kind: output, shape index: {}]  }
   0x1   :  { %v294_v0 = vld [vmem:[%s426_s1 + $0x38] sm:$0xff]  ;;  %v293_v1 = vld [vmem:[%s426_s1 + $0x30] sm:$0xff]  ;;  %v292_v2 = vld [vmem:[%s426_s1 + $0x28] sm:$0xff]  ;;  %307 = vrcp.f32 %v317_v27 }
   0x2   :  { %107 = vmatpush.bf16.msra.mxu0 %v294_v0  ;;  %295 = vmatpush.bf16.msra.mxu1 %v294_v0  ;;  %v291_v3 = vld [vmem:[%s426_s1 + $0x20] sm:$0xff]  ;;  %v290_v4 = vld [vmem:[%s426_s1 + $0x18] sm:$0xff]  ;;  %v289_v5 = vld [vmem:[%s426_s1 + $0x10] sm:$0xff] }
   0x3   :  { %v288_v6 = vld [vmem:[%s426_s1 + $0x8] sm:$0xff]  ;;  %v287_v7 = vld [vmem:[%s426_s1] sm:$0xff]  ;;  %v128_v13 = vld [vmem:[%s429_s3 + $0x10] sm:$0xff] }
   0x4   :  { %v285_v8 = vld [vmem:[%s428_s0] sm:$0xff]  ;;  %v286_v9 = vld [vmem:[%s428_s0 + $0x8] sm:$0xff]  ;;  %v129_v19 = vld [vmem:[%s429_s3 + $0x18] sm:$0xff] }
   0x5   :  { %v304_v10 = vld [vmem:[%s427_s2] ss:$0 sm:$0xff]  ;;  %v127_v22 = vld [vmem:[%s429_s3 + $0x8] sm:$0xff] }
   0x6   :  { %108 = vmatpush.bf16.msra.mxu0 %v293_v1  ;;  %296 = vmatpush.bf16.msra.mxu1 %v293_v1  ;;  %v126_v14 = vld [vmem:[%s429_s3] sm:$0xff] }
   0x7   :  { %v308_v28 = vpop.eup %307 }
   0x8   :  { %v143_v29 = vmul.f32 128.0, %v308_v28  ;;  %vm147_vm0 = vweird.f32 %v308_v28 }
   0xa   :  { %109 = vmatpush.bf16.msra.mxu0 %v292_v2  ;;  %297 = vmatpush.bf16.msra.mxu1 %v292_v2  ;;  %v144_v30 = vsub.f32 1.0, %v143_v29 }
   0xc   :  { %v145_v31 = vmul.f32 %v308_v28, %v144_v30 }
   0xe   :  { %110 = vmatpush.bf16.msra.mxu0 %v291_v3  ;;  %298 = vmatpush.bf16.msra.mxu1 %v291_v3  ;;  %v146_v32 = vadd.f32 %v308_v28, %v145_v31 }
  0x10   :  { %v148_v33 = vsel %vm147_vm0, %v308_v28, %v146_v32 }
  0x12   :  { %111 = vmatpush.bf16.msra.mxu0 %v290_v4  ;;  %299 = vmatpush.bf16.msra.mxu1 %v290_v4 }
  0x16   :  { %112 = vmatpush.bf16.msra.mxu0 %v289_v5  ;;  %300 = vmatpush.bf16.msra.mxu1 %v289_v5 }
  0x1a   :  { %113 = vmatpush.bf16.msra.mxu0 %v288_v6  ;;  %301 = vmatpush.bf16.msra.mxu1 %v288_v6 }
  0x1e   :  { %114 = vmatpush.bf16.msra.mxu0 %v287_v7  ;;  %302 = vmatpush.bf16.msra.mxu1 %v287_v7 }
  0x21   :  { %115 = vmatmul.bf16.vlgmr.msra.gmra.mxu0 %v285_v8  ;;  %120 = vmatmul.bf16.vlgmr.msra.gmra.mxu1 %v286_v9 }
  0x9e   :  { %v116_v11 = vpop.f32.mrf.mxu0  ;;  %v121_v12 = vpop.f32.mrf.mxu1 }
  0x9f   :  { %v117_v15 = vadd.f32 %v304_v10, %v116_v11  ;;  %v122_v16 = vadd.f32 %v304_v10, %v121_v12  ;;  %v305_v12 = vld [vmem:[%s430_s4] ss:$0 sm:$0xff] }
  0xa1   :  { %v132_v17 = vadd.f32 %v128_v13, %v122_v16  ;;  %v130_v18 = vadd.f32 %v126_v14, %v117_v15 }
  0xa3   :  { %138 = vadd.xlane.f32.xlu1 %v132_v17  ;;  %134 = vadd.xlane.f32.xlu0 %v130_v18 }
  0xa6   :  { %v118_v20 = vpop.f32.mrf.mxu0  ;;  %v123_v21 = vpop.f32.mrf.mxu1 }
  0xa7   :  { %v119_v23 = vadd.f32 %v304_v10, %v118_v20  ;;  %v124_v24 = vadd.f32 %v304_v10, %v123_v21 }
  0xa9   :  { %v133_v25 = vadd.f32 %v129_v19, %v124_v24  ;;  %v131_v26 = vadd.f32 %v127_v22, %v119_v23 }
  0xab   :  { %140 = vadd.xlane.f32.xlu1 %v133_v25  ;;  %136 = vadd.xlane.f32.xlu0 %v131_v26 }
 0x116   :  { %v139_v34 = vpop.xlane.xlu1 %138  ;;  %v135_v35 = vpop.xlane.xlu0 %134 }
 0x117   :  { %v151_v36 = vmul.f32 %v148_v33, %v139_v34  ;;  %v149_v37 = vmul.f32 %v148_v33, %v135_v35 }
 0x119   :  { %v155_v38 = vsub.f32 %v132_v17, %v151_v36  ;;  %v153_v39 = vsub.f32 %v130_v18, %v149_v37  ;;  %v306_v17 = vld [vmem:[%s431_s5] ss:$0 sm:$0xff] }
 0x11b   :  { %v159_v40 = vmul.f32 %v155_v38, %v155_v38  ;;  %v157_v41 = vmul.f32 %v153_v39, %v153_v39 }
 0x11d   :  { %165 = vadd.xlane.f32.xlu0 %v159_v40  ;;  %161 = vadd.xlane.f32.xlu2 %v157_v41 }
 0x11e   :  { %v141_v42 = vpop.xlane.xlu1 %140  ;;  %v137_v43 = vpop.xlane.xlu0 %136 }
 0x11f   :  { %v152_v44 = vmul.f32 %v148_v33, %v141_v42  ;;  %v150_v45 = vmul.f32 %v148_v33, %v137_v43 }
 0x121   :  { %v398_v46 = vsub.f32 %v133_v25, %v152_v44  ;;  %v400_v47 = vsub.f32 %v131_v26, %v150_v45 }
 0x123   :  { %v160_v48 = vmul.f32 %v398_v46, %v398_v46  ;;  %v158_v49 = vmul.f32 %v400_v47, %v400_v47 }
 0x125   :  { %167 = vadd.xlane.f32.xlu1 %v160_v48  ;;  %163 = vadd.xlane.f32.xlu2 %v158_v49 }
 0x190   :  { %v162_v50 = vpop.xlane.xlu2 %161  ;;  %v166_v51 = vpop.xlane.xlu0 %165 }
 0x191   :  { %v169_v52 = vmul.f32 %v162_v50, %v148_v33  ;;  %v171_v53 = vmul.f32 %v166_v51, %v148_v33 }
 0x193   :  { %v173_v54 = vadd.f32 1e-05, %v169_v52  ;;  %v175_v55 = vadd.f32 1e-05, %v171_v53 }
 0x195   :  { %309 = vrsqrt.f32 %v173_v54  ;;  %vm183_vm3 = vweird.f32 %v173_v54  ;;  %vm203_vm5 = vweird.f32 %v175_v55 }
 0x196   :  { %311 = vrsqrt.f32 %v175_v55 }
 0x198   :  { %v168_v56 = vpop.xlane.xlu1 %167  ;;  %v164_v57 = vpop.xlane.xlu2 %163 }
 0x199   :  { %v172_v58 = vmul.f32 %v168_v56, %v148_v33  ;;  %v170_v59 = vmul.f32 %v164_v57, %v148_v33 }
 0x19b   :  { %v310_v60 = vpop.eup %309  ;;  %v176_v61 = vadd.f32 1e-05, %v172_v58  ;;  %v174_v62 = vadd.f32 1e-05, %v170_v59 }
 0x19c   :  { %v312_v63 = vpop.eup %311  ;;  %v178_v0 = vmul.f32 %v310_v60, %v173_v54  ;;  %vm184_vm1 = vweird.f32 %v310_v60 }
 0x19d   :  { %v198_v1 = vmul.f32 %v312_v63, %v175_v55  ;;  %313 = vrsqrt.f32 %v176_v61  ;;  %vm204_vm2 = vweird.f32 %v312_v63  ;;  %vm185_vm4 = vmor %vm183_vm3, %vm184_vm1  ;;  %vm213_vm9 = vweird.f32 %v176_v61 }
 0x19e   :  { %v179_v2 = vmul.f32 %v310_v60, %v178_v0  ;;  %315 = vrsqrt.f32 %v174_v62  ;;  %vm205_vm6 = vmor %vm203_vm5, %vm204_vm2  ;;  %vm193_vm11 = vweird.f32 %v174_v62 }
 0x19f   :  { %v199_v3 = vmul.f32 %v312_v63, %v198_v1 }
 0x1a0   :  { %v180_v4 = vmul.f32 0.5, %v179_v2 }
 0x1a1   :  { %v200_v5 = vmul.f32 0.5, %v199_v3 }
 0x1a2   :  { %v181_v6 = vsub.f32 1.5, %v180_v4 }
 0x1a3   :  { %v314_v7 = vpop.eup %313  ;;  %v201_v8 = vsub.f32 1.5, %v200_v5 }
 0x1a4   :  { %v316_v9 = vpop.eup %315  ;;  %v182_v10 = vmul.f32 %v310_v60, %v181_v6  ;;  %v208_v11 = vmul.f32 %v314_v7, %v176_v61  ;;  %vm214_vm7 = vweird.f32 %v314_v7 }
 0x1a5   :  { %v202_v13 = vmul.f32 %v312_v63, %v201_v8  ;;  %v188_v14 = vmul.f32 %v316_v9, %v174_v62  ;;  %vm194_vm8 = vweird.f32 %v316_v9  ;;  %vm215_vm10 = vmor %vm213_vm9, %vm214_vm7 }
 0x1a6   :  { %v186_v15 = vsel %vm185_vm4, %v310_v60, %v182_v10  ;;  %v209_v16 = vmul.f32 %v314_v7, %v208_v11  ;;  %vm195_vm12 = vmor %vm193_vm11, %vm194_vm8 }
 0x1a7   :  { %v217_v18 = vmul.f32 %v186_v15, %v153_v39  ;;  %v206_v19 = vsel %vm205_vm6, %v312_v63, %v202_v13  ;;  %v189_v20 = vmul.f32 %v316_v9, %v188_v14 }
 0x1a8   :  { %v219_v21 = vmul.f32 %v206_v19, %v155_v38  ;;  %v210_v22 = vmul.f32 0.5, %v209_v16 }
 0x1a9   :  { %v225_v23 = vmul.f32 %v305_v12, %v217_v18  ;;  %v190_v24 = vmul.f32 0.5, %v189_v20 }
 0x1aa   :  { %v227_v25 = vmul.f32 %v305_v12, %v219_v21  ;;  %v211_v26 = vsub.f32 1.5, %v210_v22 }
 0x1ab   :  { %v233_v27 = vadd.f32 %v306_v17, %v225_v23  ;;  %v191_v28 = vsub.f32 1.5, %v190_v24 }
 0x1ac   :  { %v235_v29 = vadd.f32 %v306_v17, %v227_v25  ;;  %v212_v30 = vmul.f32 %v314_v7, %v211_v26 }
 0x1ad   :  { %237 = vst [vmem:[%s432_s6] sm:$0xff] %v233_v27  ;;  %v192_v31 = vmul.f32 %v316_v9, %v191_v28 }
 0x1ae   :  { %239 = vst [vmem:[%s432_s6 + $0x10] sm:$0xff] %v235_v29  ;;  %v216_v32 = vsel %vm215_vm10, %v314_v7, %v212_v30 }
 0x1af   :  { %v220_v33 = vmul.f32 %v216_v32, %v398_v46  ;;  %v196_v34 = vsel %vm195_vm12, %v316_v9, %v192_v31 }
 0x1b0   :  { %v218_v35 = vmul.f32 %v196_v34, %v400_v47 }
 0x1b1   :  { %v228_v36 = vmul.f32 %v305_v12, %v220_v33 }
 0x1b2   :  { %v226_v37 = vmul.f32 %v305_v12, %v218_v35 }
 0x1b3   :  { %v236_v38 = vadd.f32 %v306_v17, %v228_v36 }
 0x1b4   :  { %v234_v39 = vadd.f32 %v306_v17, %v226_v37 }
 0x1b5   :  { %240 = vst [vmem:[%s432_s6 + $0x18] sm:$0xff] %v236_v38 }
 0x1b6   :  { %238 = vst [vmem:[%s432_s6 + $0x8] sm:$0xff] %v234_v39 }

// kernel: transformer_encoder_layer.7
= control target key start
LH: loop header
LB: loop body
LE: loop exit
PB: predicated region body
PF: predicated region fallthrough
CT: control target
= control target key end

     0   :  { %12 = vsyncpa [#allocation4], 0  ;;  %s1361_s0 = inlined_call_operand.vmem [shape: f32[32,128], index: 0, kind: input, shape index: {}]   ;;  %s1362_s1 = inlined_call_operand.hbm [shape: bf16[128,512], index: 1, kind: input, shape index: {}]   ;;  %s1363_s2 = inlined_call_operand.vmem [shape: f32[1,512], index: 2, kind: input, shape index: {}]   ;;  %s1364_s3 = inlined_call_operand.hbm [shape: bf16[512,128], index: 3, kind: input, shape index: {}]   ;;  %s1365_s4 = inlined_call_operand.vmem [shape: f32[1,128], index: 4, kind: input, shape index: {}]   ;;  %s1366_s5 = inlined_call_operand.vmem [shape: f32[1,128], index: 5, kind: input, shape index: {}]   ;;  %s1367_s6 = inlined_call_operand.vmem [shape: f32[1,128], index: 6, kind: input, shape index: {}]   ;;  %s1368_s7 = inlined_call_operand.vmem [shape: f32[32,128], index: 7, kind: output, shape index: {}]  }
   0x1   :  { %s20_s26 = sshll.u32 %s1362_s1, 4  ;;  %s21_s26 = int_to_ptr.hbm [resolvable:$true] %s20_s26 }
   0x2   :  { %13 = vsyncpa [#allocation6], 0  ;;  %s1246_s27 = smov [#allocation3]   ;;  %s35_s8 = sshll.u32 %s1364_s3, 4  ;;  %s36_s8 = int_to_ptr.hbm [resolvable:$true] %s35_s8 }
   0x3   :  { %s22_s28 = sshll.u32 %s1246_s27, 4  ;;  %s1247_s9 = smov 256   ;;  %s23_s28 = int_to_ptr.vmem [resolvable:$true] %s22_s28 }
   0x4   :  { %s1248_s10 = smov 16   ;;  %s1249_s11 = smov [#allocation5]  }
   0x5   :  { %28 = dma.hbm_to_vmem [thread:$0]  %s21_s26, 4096, %s23_s28, [#allocation4], %s1247_s9, %s1247_s9, %s1248_s10  }
   0x6   :  { %s37_s12 = sshll.u32 %s1249_s11, 4  ;;  %s1250_s13 = smov 64   ;;  %s38_s12 = int_to_ptr.vmem [resolvable:$true] %s37_s12 }
   0x7   :  { %s1251_s14 = smov 4  }
   0x8   :  { %43 = dma.hbm_to_vmem [thread:$0]  %s36_s8, 4096, %s38_s12, [#allocation6], %s1250_s13, %s1250_s13, %s1251_s14  }
   0x9   :  { %1242 = dma.done.wait [#allocation4], 4096  }
   0xa   :  { %1243 = vsyncadd [#allocation4], 4294963200 }
   0xb   :  { %1244 = dma.done.wait [#allocation6], 4096  }
   0xc   :  { %1245 = vsyncadd [#allocation6], 4294963200  ;;  %v968_v0 = vld [vmem:[#allocation3 + $0xe0] sm:$0xf]  ;;  %v1140_v1 = vld [vmem:[#allocation3 + $0xec] sm:$0xf0] }
   0xd   :  { %v1138_v2 = vld [vmem:[#allocation3 + $0xe4] sm:$0xf]  ;;  %v969_v3 = vor.u32 %v1140_v1, %v968_v0  ;;  %v970_v4 = vld [vmem:[#allocation3 + $0xf0] sm:$0xf0]  ;;  %v976_v5 = vld [vmem:[#allocation3 + $0xe8] sm:$0xf] }
   0xe   :  { %v1141_v6 = vld [vmem:[#allocation3 + $0xf4] sm:$0xf0]  ;;  %v973_v7 = vor.u32 %v1138_v2, %v970_v4  ;;  %v1139_v9 = vld [vmem:[#allocation3 + $0xec] sm:$0xf]  ;;  %v978_v10 = vld [vmem:[#allocation3 + $0xf8] sm:$0xf0] }
   0xf   :  { %v977_v8 = vor.u32 %v1141_v6, %v976_v5  ;;  %v952_v11 = vld [vmem:[#allocation3 + $0xc0] sm:$0xf]  ;;  %274 = vmatpush.bf16.msra.mxu0 %v969_v3  ;;  %v981_v12 = vor.u32 %v1139_v9, %v978_v10  ;;  %v1136_v13 = vld [vmem:[#allocation3 + $0xcc] sm:$0xf0]  ;;  %v1134_v14 = vld [vmem:[#allocation3 + $0xc4] sm:$0xf] }
  0x10   :  { %v954_v15 = vld [vmem:[#allocation3 + $0xd0] sm:$0xf0]  ;;  %293 = vmatpush.bf16.msra.mxu1 %v973_v7  ;;  %v953_v16 = vor.u32 %v1136_v13, %v952_v11  ;;  %v960_v18 = vld [vmem:[#allocation3 + $0xc8] sm:$0xf]  ;;  %v1137_v19 = vld [vmem:[#allocation3 + $0xd4] sm:$0xf0] }
  0x11   :  { %312 = vmatpush.bf16.msra.mxu2 %v977_v8  ;;  %v957_v17 = vor.u32 %v1134_v14, %v954_v15  ;;  %v1135_v20 = vld [vmem:[#allocation3 + $0xcc] sm:$0xf]  ;;  %331 = vmatpush.bf16.msra.mxu3 %v981_v12  ;;  %v961_v21 = vor.u32 %v1137_v19, %v960_v18  ;;  %v962_v22 = vld [vmem:[#allocation3 + $0xd8] sm:$0xf0]  ;;  %v936_v23 = vld [vmem:[#allocation3 + $0xa0] sm:$0xf] }
  0x12   :  { %v1132_v24 = vld [vmem:[#allocation3 + $0xac] sm:$0xf0]  ;;  %v965_v25 = vor.u32 %v1135_v20, %v962_v22  ;;  %v1130_v26 = vld [vmem:[#allocation3 + $0xa4] sm:$0xf]  ;;  %v938_v27 = vld [vmem:[#allocation3 + $0xb0] sm:$0xf0] }
  0x13   :  { %v944_v28 = vld [vmem:[#allocation3 + $0xa8] sm:$0xf]  ;;  %275 = vmatpush.bf16.msra.mxu0 %v953_v16  ;;  %v937_v29 = vor.u32 %v1132_v24, %v936_v23  ;;  %v1133_v30 = vld [vmem:[#allocation3 + $0xb4] sm:$0xf0]  ;;  %v1131_v31 = vld [vmem:[#allocation3 + $0xac] sm:$0xf]  ;;  %v941_v33 = vor.u32 %v1130_v26, %v938_v27 }
  0x14   :  { %v946_v32 = vld [vmem:[#allocation3 + $0xb8] sm:$0xf0]  ;;  %294 = vmatpush.bf16.msra.mxu1 %v957_v17  ;;  %v945_v34 = vor.u32 %v1133_v30, %v944_v28  ;;  %v920_v35 = vld [vmem:[#allocation3 + $0x80] sm:$0xf]  ;;  %v1128_v36 = vld [vmem:[#allocation3 + $0x8c] sm:$0xf0] }
  0x15   :  { %313 = vmatpush.bf16.msra.mxu2 %v961_v21  ;;  %v1126_v37 = vld [vmem:[#allocation3 + $0x84] sm:$0xf]  ;;  %332 = vmatpush.bf16.msra.mxu3 %v965_v25  ;;  %v949_v38 = vor.u32 %v1131_v31, %v946_v32  ;;  %v922_v39 = vld [vmem:[#allocation3 + $0x90] sm:$0xf0]  ;;  %v928_v40 = vld [vmem:[#allocation3 + $0x88] sm:$0xf]  ;;  %v921_v44 = vor.u32 %v1128_v36, %v920_v35 }
  0x16   :  { %v1129_v41 = vld [vmem:[#allocation3 + $0x94] sm:$0xf0]  ;;  %v1127_v42 = vld [vmem:[#allocation3 + $0x8c] sm:$0xf]  ;;  %v930_v43 = vld [vmem:[#allocation3 + $0x98] sm:$0xf0]  ;;  %v925_v45 = vor.u32 %v1126_v37, %v922_v39 }
  0x17   :  { %276 = vmatpush.bf16.msra.mxu0 %v937_v29  ;;  %v929_v46 = vor.u32 %v1129_v41, %v928_v40  ;;  %v904_v47 = vld [vmem:[#allocation3 + $0x60] sm:$0xf]  ;;  %v1124_v48 = vld [vmem:[#allocation3 + $0x6c] sm:$0xf0]  ;;  %v1122_v49 = vld [vmem:[#allocation3 + $0x64] sm:$0xf]  ;;  %v933_v50 = vor.u32 %v1127_v42, %v930_v43 }
  0x18   :  { %295 = vmatpush.bf16.msra.mxu1 %v941_v33  ;;  %v906_v51 = vld [vmem:[#allocation3 + $0x70] sm:$0xf0]  ;;  %v912_v52 = vld [vmem:[#allocation3 + $0x68] sm:$0xf]  ;;  %v1125_v53 = vld [vmem:[#allocation3 + $0x74] sm:$0xf0]  ;;  %v905_v56 = vor.u32 %v1124_v48, %v904_v47 }
  0x19   :  { %314 = vmatpush.bf16.msra.mxu2 %v945_v34  ;;  %333 = vmatpush.bf16.msra.mxu3 %v949_v38  ;;  %v1123_v54 = vld [vmem:[#allocation3 + $0x6c] sm:$0xf]  ;;  %v914_v55 = vld [vmem:[#allocation3 + $0x78] sm:$0xf0]  ;;  %v909_v57 = vor.u32 %v1122_v49, %v906_v51  ;;  %v913_v58 = vor.u32 %v1125_v53, %v912_v52  ;;  %v888_v59 = vld [vmem:[#allocation3 + $0x40] sm:$0xf] }
  0x1a   :  { %v1120_v60 = vld [vmem:[#allocation3 + $0x4c] sm:$0xf0]  ;;  %v1118_v61 = vld [vmem:[#allocation3 + $0x44] sm:$0xf]  ;;  %v917_v62 = vor.u32 %v1123_v54, %v914_v55  ;;  %v890_v63 = vld [vmem:[#allocation3 + $0x50] sm:$0xf0] }
  0x1b   :  { %277 = vmatpush.bf16.msra.mxu0 %v921_v44  ;;  %v896_v0 = vld [vmem:[#allocation3 + $0x48] sm:$0xf]  ;;  %v1121_v1 = vld [vmem:[#allocation3 + $0x54] sm:$0xf0]  ;;  %v1119_v2 = vld [vmem:[#allocation3 + $0x4c] sm:$0xf]  ;;  %v889_v4 = vor.u32 %v1120_v60, %v888_v59  ;;  %v893_v5 = vor.u32 %v1118_v61, %v890_v63 }
  0x1c   :  { %296 = vmatpush.bf16.msra.mxu1 %v925_v45  ;;  %v898_v3 = vld [vmem:[#allocation3 + $0x58] sm:$0xf0]  ;;  %v897_v6 = vor.u32 %v1121_v1, %v896_v0  ;;  %v872_v7 = vld [vmem:[#allocation3 + $0x20] sm:$0xf]  ;;  %v1116_v8 = vld [vmem:[#allocation3 + $0x2c] sm:$0xf0] }
  0x1d   :  { %315 = vmatpush.bf16.msra.mxu2 %v929_v46  ;;  %334 = vmatpush.bf16.msra.mxu3 %v933_v50  ;;  %v1114_v9 = vld [vmem:[#allocation3 + $0x24] sm:$0xf]  ;;  %v901_v10 = vor.u32 %v1119_v2, %v898_v3  ;;  %v874_v11 = vld [vmem:[#allocation3 + $0x30] sm:$0xf0]  ;;  %v880_v12 = vld [vmem:[#allocation3 + $0x28] sm:$0xf]  ;;  %v873_v16 = vor.u32 %v1116_v8, %v872_v7 }
  0x1e   :  { %v1117_v13 = vld [vmem:[#allocation3 + $0x34] sm:$0xf0]  ;;  %v1115_v14 = vld [vmem:[#allocation3 + $0x2c] sm:$0xf]  ;;  %v882_v15 = vld [vmem:[#allocation3 + $0x38] sm:$0xf0]  ;;  %v877_v17 = vor.u32 %v1114_v9, %v874_v11 }
  0x1f   :  { %278 = vmatpush.bf16.msra.mxu0 %v905_v56  ;;  %v881_v18 = vor.u32 %v1117_v13, %v880_v12  ;;  %v856_v19 = vld [vmem:[#allocation3] sm:$0xf]  ;;  %v1112_v20 = vld [vmem:[#allocation3 + $0xc] sm:$0xf0]  ;;  %v1110_v21 = vld [vmem:[#allocation3 + $0x4] sm:$0xf]  ;;  %v885_v22 = vor.u32 %v1115_v14, %v882_v15 }
  0x20   :  { %297 = vmatpush.bf16.msra.mxu1 %v909_v57  ;;  %v858_v23 = vld [vmem:[#allocation3 + $0x10] sm:$0xf0]  ;;  %v864_v24 = vld [vmem:[#allocation3 + $0x8] sm:$0xf]  ;;  %v1113_v25 = vld [vmem:[#allocation3 + $0x14] sm:$0xf0]  ;;  %v857_v28 = vor.u32 %v1112_v20, %v856_v19 }
  0x21   :  { %316 = vmatpush.bf16.msra.mxu2 %v913_v58  ;;  %335 = vmatpush.bf16.msra.mxu3 %v917_v62  ;;  %v1111_v26 = vld [vmem:[#allocation3 + $0xc] sm:$0xf]  ;;  %v866_v27 = vld [vmem:[#allocation3 + $0x18] sm:$0xf0]  ;;  %v1302_v29 = vld [vmem:[%s1361_s0] sm:$0xff]  ;;  %v861_v31 = vor.u32 %v1110_v21, %v858_v23  ;;  %v865_v32 = vor.u32 %v1113_v25, %v864_v24 }
  0x22   :  { %v1307_v30 = vld [vmem:[%s1361_s0 + $0x8] sm:$0xff]  ;;  %v869_v33 = vor.u32 %v1111_v26, %v866_v27  ;;  %v1149_v34 = vld [vmem:[#allocation5 + $0x38] sm:$0xff]  ;;  %v1148_v38 = vld [vmem:[#allocation5 + $0x30] sm:$0xff] }
  0x23   :  { %279 = vmatpush.bf16.msra.mxu0 %v889_v4  ;;  %v70_v35 = vpack.c.bf16 %v1307_v30, %v1302_v29  ;;  %v1157_v36 = vld [vmem:[#allocation5 + $0x78] sm:$0xff]  ;;  %v1156_v40 = vld [vmem:[#allocation5 + $0x70] sm:$0xff]  ;;  %v1147_v42 = vld [vmem:[#allocation5 + $0x28] sm:$0xff] }
  0x24   :  { %298 = vmatpush.bf16.msra.mxu1 %v893_v5  ;;  %v1165_v37 = vld [vmem:[#allocation5 + $0xb8] sm:$0xff]  ;;  %v1164_v41 = vld [vmem:[#allocation5 + $0xb0] sm:$0xff]  ;;  %v1155_v44 = vld [vmem:[#allocation5 + $0x68] sm:$0xff] }
  0x25   :  { %317 = vmatpush.bf16.msra.mxu2 %v897_v6  ;;  %336 = vmatpush.bf16.msra.mxu3 %v901_v10  ;;  %v1173_v39 = vld [vmem:[#allocation5 + $0xf8] sm:$0xff]  ;;  %v1172_v43 = vld [vmem:[#allocation5 + $0xf0] sm:$0xff]  ;;  %v1163_v45 = vld [vmem:[#allocation5 + $0xa8] sm:$0xff] }
  0x26   :  { %v1146_v46 = vld [vmem:[#allocation5 + $0x20] sm:$0xff]  ;;  %v1171_v47 = vld [vmem:[#allocation5 + $0xe8] sm:$0xff]  ;;  %v1314_v49 = vld [vmem:[%s1361_s0 + $0x10] sm:$0xff] }
  0x27   :  { %280 = vmatpush.bf16.msra.mxu0 %v873_v16  ;;  %v1154_v48 = vld [vmem:[#allocation5 + $0x60] sm:$0xff]  ;;  %v1319_v50 = vld [vmem:[%s1361_s0 + $0x18] sm:$0xff]  ;;  %v1144_v56 = vld [vmem:[#allocation5 + $0x10] sm:$0xff] }
  0x28   :  { %299 = vmatpush.bf16.msra.mxu1 %v877_v17  ;;  %v71_v51 = vpack.c.bf16 %v1319_v50, %v1314_v49  ;;  %v1145_v52 = vld [vmem:[#allocation5 + $0x18] sm:$0xff]  ;;  %v1162_v54 = vld [vmem:[#allocation5 + $0xa0] sm:$0xff]  ;;  %v1152_v57 = vld [vmem:[#allocation5 + $0x50] sm:$0xff] }
  0x29   :  { %318 = vmatpush.bf16.msra.mxu2 %v881_v18  ;;  %337 = vmatpush.bf16.msra.mxu3 %v885_v22  ;;  %v1153_v53 = vld [vmem:[#allocation5 + $0x58] sm:$0xff]  ;;  %v1170_v55 = vld [vmem:[#allocation5 + $0xe0] sm:$0xff]  ;;  %v1143_v60 = vld [vmem:[#allocation5 + $0x8] sm:$0xff] }
  0x2a   :  { %v1161_v58 = vld [vmem:[#allocation5 + $0x98] sm:$0xff]  ;;  %v1151_v61 = vld [vmem:[#allocation5 + $0x48] sm:$0xff]  ;;  %v1160_v62 = vld [vmem:[#allocation5 + $0x90] sm:$0xff] }
  0x2b   :  { %281 = vmatpush.bf16.msra.mxu0 %v857_v28  ;;  %v1169_v59 = vld [vmem:[#allocation5 + $0xd8] sm:$0xff]  ;;  %v1168_v63 = vld [vmem:[#allocation5 + $0xd0] sm:$0xff]  ;;  %v1142_v0 = vld [vmem:[#allocation5] sm:$0xff] }
  0x2c   :  { %300 = vmatpush.bf16.msra.mxu1 %v861_v31  ;;  %v1150_v1 = vld [vmem:[#allocation5 + $0x40] sm:$0xff]  ;;  %v1159_v2 = vld [vmem:[#allocation5 + $0x88] sm:$0xff] }
  0x2d   :  { %319 = vmatpush.bf16.msra.mxu2 %v865_v32  ;;  %338 = vmatpush.bf16.msra.mxu3 %v869_v33  ;;  %v1167_v3 = vld [vmem:[#allocation5 + $0xc8] sm:$0xff]  ;;  %v1158_v4 = vld [vmem:[#allocation5 + $0x80] sm:$0xff] }
  0x2e   :  { %282 = vmatmul.bf16.vlgmr.msra.gmra.mxu0 %v70_v35  ;;  %v1166_v5 = vld [vmem:[#allocation5 + $0xc0] sm:$0xff] }
  0x2f   :  { %634 = vmatpush.bf16.msrb.mxu0 %v1149_v34  ;;  %301 = vmatmul.bf16.vlgmr.msra.gmra.mxu1 %v70_v35  ;;  %v104_v6 = vld [vmem:[%s1363_s2] sm:$0xf] }
  0x30   :  { %653 = vmatpush.bf16.msrb.mxu1 %v1157_v36  ;;  %320 = vmatmul.bf16.vlgmr.msra.gmra.mxu2 %v70_v35  ;;  %v106_v8 = vperm.slane %v104_v6, 0  ;;  %v107_v10 = vperm.slane %v104_v6, 1  ;;  %v108_v20 = vperm.slane %v104_v6, 2  ;;  %v109_v22 = vperm.slane %v104_v6, 3 }
  0x31   :  { %339 = vmatmul.bf16.vlgmr.msra.gmra.mxu3 %v70_v35  ;;  %672 = vmatpush.bf16.msrb.mxu2 %v1165_v37 }
  0x32   :  { %691 = vmatpush.bf16.msrb.mxu3 %v1173_v39 }
  0x33   :  { %635 = vmatpush.bf16.msrb.mxu0 %v1148_v38 }
  0x34   :  { %654 = vmatpush.bf16.msrb.mxu1 %v1156_v40 }
  0x35   :  { %673 = vmatpush.bf16.msrb.mxu2 %v1164_v41 }
  0x36   :  { %692 = vmatpush.bf16.msrb.mxu3 %v1172_v43 }
  0x37   :  { %636 = vmatpush.bf16.msrb.mxu0 %v1147_v42 }
  0x38   :  { %655 = vmatpush.bf16.msrb.mxu1 %v1155_v44 }
  0x39   :  { %674 = vmatpush.bf16.msrb.mxu2 %v1163_v45 }
  0x3a   :  { %693 = vmatpush.bf16.msrb.mxu3 %v1171_v47 }
  0x3b   :  { %637 = vmatpush.bf16.msrb.mxu0 %v1146_v46 }
  0x3c   :  { %656 = vmatpush.bf16.msrb.mxu1 %v1154_v48 }
  0x3d   :  { %675 = vmatpush.bf16.msrb.mxu2 %v1162_v54 }
  0x3e   :  { %287 = vmatmul.bf16.gmra.mxu0 %v71_v51  ;;  %694 = vmatpush.bf16.msrb.mxu3 %v1170_v55 }
  0x3f   :  { %306 = vmatmul.bf16.gmra.mxu1 %v71_v51  ;;  %638 = vmatpush.bf16.msrb.mxu0 %v1145_v52 }
  0x40   :  { %325 = vmatmul.bf16.gmra.mxu2 %v71_v51  ;;  %657 = vmatpush.bf16.msrb.mxu1 %v1153_v53 }
  0x41   :  { %344 = vmatmul.bf16.gmra.mxu3 %v71_v51  ;;  %676 = vmatpush.bf16.msrb.mxu2 %v1161_v58 }
  0x42   :  { %695 = vmatpush.bf16.msrb.mxu3 %v1169_v59 }
  0x43   :  { %639 = vmatpush.bf16.msrb.mxu0 %v1144_v56 }
  0x44   :  { %658 = vmatpush.bf16.msrb.mxu1 %v1152_v57 }
  0x45   :  { %677 = vmatpush.bf16.msrb.mxu2 %v1160_v62 }
  0x46   :  { %696 = vmatpush.bf16.msrb.mxu3 %v1168_v63 }
  0x47   :  { %640 = vmatpush.bf16.msrb.mxu0 %v1143_v60 }
  0x48   :  { %659 = vmatpush.bf16.msrb.mxu1 %v1151_v61 }
  0x49   :  { %678 = vmatpush.bf16.msrb.mxu2 %v1159_v2 }
  0x4a   :  { %697 = vmatpush.bf16.msrb.mxu3 %v1167_v3 }
  0x4b   :  { %641 = vmatpush.bf16.msrb.mxu0 %v1142_v0 }
  0x4c   :  { %660 = vmatpush.bf16.msrb.mxu1 %v1150_v1 }
  0x4d   :  { %679 = vmatpush.bf16.msrb.mxu2 %v1158_v4 }
  0x4e   :  { %698 = vmatpush.bf16.msrb.mxu3 %v1166_v5 }
  0xab   :  { %v283_v7 = vpop.f32.mrf.mxu0 }
  0xac   :  { %v302_v9 = vpop.f32.mrf.mxu1  ;;  %v284_v11 = vadd.f32 %v283_v7, %v106_v8 }
  0xad   :  { %v303_v12 = vadd.f32 %v302_v9, %v107_v10 }
  0xae   :  { %v350_v16 = vmax.f32 %v284_v11, 0.0 }
  0xaf   :  { %v351_v19 = vmax.f32 %v303_v12, 0.0 }
  0xb3   :  { %v321_v13 = vpop.f32.mrf.mxu2  ;;  %v285_v15 = vpop.f32.mrf.mxu0 }
  0xb4   :  { %v340_v14 = vpop.f32.mrf.mxu3  ;;  %v286_v17 = vadd.f32 %v285_v15, %v106_v8  ;;  %v304_v18 = vpop.f32.mrf.mxu1  ;;  %v322_v26 = vadd.f32 %v321_v13, %v108_v20  ;;  %v1181_v15 = vld [vmem:[%s1365_s4] ss:$0 sm:$0xff] }
  0xb5   :  { %v305_v21 = vadd.f32 %v304_v18, %v107_v10  ;;  %v341_v28 = vadd.f32 %v340_v14, %v109_v22 }
  0xb6   :  { %v354_v23 = vmax.f32 %v286_v17, 0.0  ;;  %v352_v37 = vmax.f32 %v322_v26, 0.0 }
  0xb7   :  { %v355_v24 = vmax.f32 %v305_v21, 0.0  ;;  %v353_v39 = vmax.f32 %v341_v28, 0.0 }
  0xb8   :  { %v370_v25 = vpack.c.bf16 %v354_v23, %v350_v16 }
  0xb9   :  { %v371_v27 = vpack.c.bf16 %v355_v24, %v351_v19 }
  0xba   :  { %642 = vmatmul.bf16.vlgmr.msrb.gmra.mxu0 %v370_v25 }
  0xbb   :  { %v323_v31 = vpop.f32.mrf.mxu2  ;;  %661 = vmatmul.bf16.vlgmr.msrb.gmra.mxu1 %v371_v27  ;;  %v288_v34 = vpop.f32.mrf.mxu0 }
  0xbc   :  { %v324_v32 = vadd.f32 %v323_v31, %v108_v20  ;;  %v342_v33 = vpop.f32.mrf.mxu3  ;;  %v307_v36 = vpop.f32.mrf.mxu1  ;;  %v289_v43 = vadd.f32 %v288_v34, %v106_v8 }
  0xbd   :  { %v343_v35 = vadd.f32 %v342_v33, %v109_v22  ;;  %v308_v44 = vadd.f32 %v307_v36, %v107_v10 }
  0xbe   :  { %v356_v38 = vmax.f32 %v324_v32, 0.0  ;;  %v358_v48 = vmax.f32 %v289_v43, 0.0 }
  0xbf   :  { %v357_v40 = vmax.f32 %v343_v35, 0.0  ;;  %v359_v53 = vmax.f32 %v308_v44, 0.0 }
  0xc0   :  { %v372_v41 = vpack.c.bf16 %v356_v38, %v352_v37 }
  0xc1   :  { %v373_v42 = vpack.c.bf16 %v357_v40, %v353_v39 }
  0xc2   :  { %680 = vmatmul.bf16.vlgmr.msrb.gmra.mxu2 %v372_v41 }
  0xc3   :  { %699 = vmatmul.bf16.vlgmr.msrb.gmra.mxu3 %v373_v42  ;;  %v326_v45 = vpop.f32.mrf.mxu2  ;;  %v290_v47 = vpop.f32.mrf.mxu0 }
  0xc4   :  { %v345_v46 = vpop.f32.mrf.mxu3  ;;  %v291_v51 = vadd.f32 %v290_v47, %v106_v8  ;;  %v309_v52 = vpop.f32.mrf.mxu1  ;;  %v327_v58 = vadd.f32 %v326_v45, %v108_v20 }
  0xc5   :  { %v310_v54 = vadd.f32 %v309_v52, %v107_v10  ;;  %v346_v60 = vadd.f32 %v345_v46, %v109_v22 }
  0xc6   :  { %v362_v55 = vmax.f32 %v291_v51, 0.0  ;;  %v360_v1 = vmax.f32 %v327_v58, 0.0 }
  0xc7   :  { %v363_v56 = vmax.f32 %v310_v54, 0.0  ;;  %v361_v3 = vmax.f32 %v346_v60, 0.0 }
  0xc8   :  { %v374_v57 = vpack.c.bf16 %v362_v55, %v358_v48 }
  0xc9   :  { %v375_v59 = vpack.c.bf16 %v363_v56, %v359_v53 }
  0xca   :  { %647 = vmatmul.bf16.gmra.mxu0 %v374_v57 }
  0xcb   :  { %v328_v61 = vpop.f32.mrf.mxu2  ;;  %666 = vmatmul.bf16.gmra.mxu1 %v375_v59 }
  0xcc   :  { %v329_v62 = vadd.f32 %v328_v61, %v108_v20  ;;  %v347_v63 = vpop.f32.mrf.mxu3 }
  0xcd   :  { %v348_v0 = vadd.f32 %v347_v63, %v109_v22 }
  0xce   :  { %v364_v2 = vmax.f32 %v329_v62, 0.0 }
  0xcf   :  { %v365_v4 = vmax.f32 %v348_v0, 0.0 }
  0xd0   :  { %v376_v5 = vpack.c.bf16 %v364_v2, %v360_v1 }
  0xd1   :  { %v377_v6 = vpack.c.bf16 %v365_v4, %v361_v3 }
  0xd2   :  { %685 = vmatmul.bf16.gmra.mxu2 %v376_v5 }
  0xd3   :  { %704 = vmatmul.bf16.gmra.mxu3 %v377_v6 }
 0x137   :  { %v643_v7 = vpop.f32.mrf.mxu0 }
 0x138   :  { %v662_v8 = vpop.f32.mrf.mxu1 }
 0x139   :  { %v663_v9 = vadd.f32 %v662_v8, %v643_v7 }
 0x13f   :  { %v645_v10 = vpop.f32.mrf.mxu0 }
 0x140   :  { %v664_v11 = vpop.f32.mrf.mxu1 }
 0x141   :  { %v665_v18 = vadd.f32 %v664_v11, %v645_v10 }
 0x145   :  { %v681_v12 = vpop.f32.mrf.mxu2 }
 0x146   :  { %v682_v13 = vadd.f32 %v681_v12, %v663_v9  ;;  %v700_v14 = vpop.f32.mrf.mxu3 }
 0x147   :  { %v648_v23 = vpop.f32.mrf.mxu0 }
 0x148   :  { %v701_v16 = vadd.f32 %v700_v14, %v682_v13  ;;  %v667_v24 = vpop.f32.mrf.mxu1 }
 0x149   :  { %v668_v27 = vadd.f32 %v667_v24, %v648_v23  ;;  %v1183_v23 = vld [vmem:[%s1367_s6] ss:$0 sm:$0xff] }
 0x14a   :  { %v729_v17 = vadd.f32 %v1181_v15, %v701_v16 }
 0x14c   :  { %v737_v19 = vadd.f32 %v729_v17, %v1302_v29 }
 0x14d   :  { %v683_v20 = vpop.f32.mrf.mxu2 }
 0x14e   :  { %v684_v21 = vadd.f32 %v683_v20, %v665_v18  ;;  %v702_v22 = vpop.f32.mrf.mxu3  ;;  %741 = vadd.xlane.f32.xlu0 %v737_v19  ;;  %v1182_v20 = vld [vmem:[%s1366_s5] ss:$0 sm:$0xff] }
 0x14f   :  { %v650_v35 = vpop.f32.mrf.mxu0 }
 0x150   :  { %v703_v25 = vadd.f32 %v702_v22, %v684_v21  ;;  %v669_v36 = vpop.f32.mrf.mxu1 }
 0x151   :  { %v670_v29 = vadd.f32 %v669_v36, %v650_v35 }
 0x152   :  { %v730_v26 = vadd.f32 %v1181_v15, %v703_v25 }
 0x154   :  { %v738_v28 = vadd.f32 %v730_v26, %v1307_v30  ;;  %v1252_v30 = vmov 128.0  }
 0x155   :  { %v686_v31 = vpop.f32.mrf.mxu2  ;;  %1184 = vrcp.f32 %v1252_v30 }
 0x156   :  { %v687_v32 = vadd.f32 %v686_v31, %v668_v27  ;;  %v705_v33 = vpop.f32.mrf.mxu3  ;;  %743 = vadd.xlane.f32.xlu0 %v738_v28 }
 0x158   :  { %v706_v34 = vadd.f32 %v705_v33, %v687_v32 }
 0x15a   :  { %v731_v37 = vadd.f32 %v1181_v15, %v706_v34 }
 0x15b   :  { %v1185_v45 = vpop.eup %1184 }
 0x15c   :  { %v739_v38 = vadd.f32 %v731_v37, %v1314_v49  ;;  %v750_v46 = vmul.f32 128.0, %v1185_v45  ;;  %vm754_vm0 = vweird.f32 %v1185_v45 }
 0x15d   :  { %v688_v39 = vpop.f32.mrf.mxu2 }
 0x15e   :  { %v689_v40 = vadd.f32 %v688_v39, %v670_v29  ;;  %745 = vadd.xlane.f32.xlu1 %v739_v38  ;;  %v707_v41 = vpop.f32.mrf.mxu3  ;;  %v751_v47 = vsub.f32 1.0, %v750_v46 }
 0x160   :  { %v708_v42 = vadd.f32 %v707_v41, %v689_v40  ;;  %v752_v48 = vmul.f32 %v1185_v45, %v751_v47 }
 0x162   :  { %v732_v43 = vadd.f32 %v1181_v15, %v708_v42  ;;  %v753_v51 = vadd.f32 %v1185_v45, %v752_v48 }
 0x164   :  { %v740_v44 = vadd.f32 %v732_v43, %v1319_v50  ;;  %v755_v52 = vsel %vm754_vm0, %v1185_v45, %v753_v51 }
 0x166   :  { %747 = vadd.xlane.f32.xlu1 %v740_v44 }
 0x1c1   :  { %v742_v53 = vpop.xlane.xlu0 %741 }
 0x1c2   :  { %v756_v49 = vmul.f32 %v755_v52, %v742_v53 }
 0x1c4   :  { %v760_v54 = vsub.f32 %v737_v19, %v756_v49 }
 0x1c6   :  { %v764_v55 = vmul.f32 %v760_v54, %v760_v54 }
 0x1c8   :  { %768 = vadd.xlane.f32.xlu2 %v764_v55 }
 0x1c9   :  { %v744_v56 = vpop.xlane.xlu0 %743 }
 0x1ca   :  { %v757_v57 = vmul.f32 %v755_v52, %v744_v56 }
 0x1cc   :  { %v761_v58 = vsub.f32 %v738_v28, %v757_v57 }
 0x1ce   :  { %v765_v59 = vmul.f32 %v761_v58, %v761_v58 }
 0x1d0   :  { %770 = vadd.xlane.f32.xlu2 %v765_v59 }
 0x1d1   :  { %v746_v50 = vpop.xlane.xlu1 %745 }
 0x1d2   :  { %v758_v60 = vmul.f32 %v755_v52, %v746_v50 }
 0x1d4   :  { %v1333_v61 = vsub.f32 %v739_v38, %v758_v60 }
 0x1d6   :  { %v766_v62 = vmul.f32 %v1333_v61, %v1333_v61 }
 0x1d8   :  { %772 = vadd.xlane.f32.xlu0 %v766_v62 }
 0x1d9   :  { %v748_v63 = vpop.xlane.xlu1 %747 }
 0x1da   :  { %v759_v0 = vmul.f32 %v755_v52, %v748_v63 }
 0x1dc   :  { %v1337_v1 = vsub.f32 %v740_v44, %v759_v0 }
 0x1de   :  { %v767_v2 = vmul.f32 %v1337_v1, %v1337_v1 }
 0x1e0   :  { %774 = vadd.xlane.f32.xlu1 %v767_v2 }
 0x23b   :  { %v769_v3 = vpop.xlane.xlu2 %768 }
 0x23c   :  { %v776_v4 = vmul.f32 %v769_v3, %v755_v52 }
 0x23e   :  { %v780_v5 = vadd.f32 1e-05, %v776_v4 }
 0x240   :  { %1186 = vrsqrt.f32 %v780_v5  ;;  %vm790_vm2 = vweird.f32 %v780_v5 }
 0x243   :  { %v771_v6 = vpop.xlane.xlu2 %770 }
 0x244   :  { %v777_v7 = vmul.f32 %v771_v6, %v755_v52 }
 0x246   :  { %v1187_v8 = vpop.eup %1186  ;;  %v781_v9 = vadd.f32 1e-05, %v777_v7 }
 0x247   :  { %v785_v10 = vmul.f32 %v1187_v8, %v780_v5  ;;  %vm791_vm1 = vweird.f32 %v1187_v8 }
 0x248   :  { %1188 = vrsqrt.f32 %v781_v9  ;;  %vm792_vm3 = vmor %vm790_vm2, %vm791_vm1  ;;  %vm800_vm5 = vweird.f32 %v781_v9 }
 0x249   :  { %v786_v11 = vmul.f32 %v1187_v8, %v785_v10 }
 0x24b   :  { %v787_v12 = vmul.f32 0.5, %v786_v11  ;;  %v773_v13 = vpop.xlane.xlu0 %772 }
 0x24c   :  { %v778_v14 = vmul.f32 %v773_v13, %v755_v52 }
 0x24d   :  { %v788_v15 = vsub.f32 1.5, %v787_v12 }
 0x24e   :  { %v1189_v16 = vpop.eup %1188  ;;  %v782_v17 = vadd.f32 1e-05, %v778_v14 }
 0x24f   :  { %v789_v18 = vmul.f32 %v1187_v8, %v788_v15  ;;  %v795_v19 = vmul.f32 %v1189_v16, %v781_v9  ;;  %vm801_vm4 = vweird.f32 %v1189_v16 }
 0x250   :  { %1190 = vrsqrt.f32 %v782_v17  ;;  %vm802_vm6 = vmor %vm800_vm5, %vm801_vm4  ;;  %vm810_vm8 = vweird.f32 %v782_v17 }
 0x251   :  { %v793_v21 = vsel %vm792_vm3, %v1187_v8, %v789_v18  ;;  %v796_v22 = vmul.f32 %v1189_v16, %v795_v19 }
 0x252   :  { %v824_v24 = vmul.f32 %v793_v21, %v760_v54 }
 0x253   :  { %v797_v25 = vmul.f32 0.5, %v796_v22  ;;  %v775_v26 = vpop.xlane.xlu1 %774 }
 0x254   :  { %v832_v27 = vmul.f32 %v1182_v20, %v824_v24  ;;  %v779_v28 = vmul.f32 %v775_v26, %v755_v52 }
 0x255   :  { %v798_v31 = vsub.f32 1.5, %v797_v25 }
 0x256   :  { %v1191_v32 = vpop.eup %1190  ;;  %v840_v33 = vadd.f32 %v1183_v23, %v832_v27  ;;  %v783_v34 = vadd.f32 1e-05, %v779_v28 }
 0x257   :  { %v799_v35 = vmul.f32 %v1189_v16, %v798_v31  ;;  %v805_v36 = vmul.f32 %v1191_v32, %v782_v17  ;;  %vm811_vm7 = vweird.f32 %v1191_v32 }
 0x258   :  { %844 = vst [vmem:[%s1368_s7] sm:$0xff] %v840_v33  ;;  %1192 = vrsqrt.f32 %v783_v34  ;;  %vm812_vm9 = vmor %vm810_vm8, %vm811_vm7  ;;  %vm820_vm11 = vweird.f32 %v783_v34 }
 0x259   :  { %v803_v37 = vsel %vm802_vm6, %v1189_v16, %v799_v35  ;;  %v806_v29 = vmul.f32 %v1191_v32, %v805_v36 }
 0x25a   :  { %v825_v38 = vmul.f32 %v803_v37, %v761_v58 }
 0x25b   :  { %v807_v39 = vmul.f32 0.5, %v806_v29 }
 0x25c   :  { %v833_v40 = vmul.f32 %v1182_v20, %v825_v38 }
 0x25d   :  { %v808_v41 = vsub.f32 1.5, %v807_v39 }
 0x25e   :  { %v1193_v42 = vpop.eup %1192  ;;  %v841_v43 = vadd.f32 %v1183_v23, %v833_v40 }
 0x25f   :  { %v809_v44 = vmul.f32 %v1191_v32, %v808_v41  ;;  %v815_v30 = vmul.f32 %v1193_v42, %v783_v34  ;;  %vm821_vm10 = vweird.f32 %v1193_v42 }
 0x260   :  { %845 = vst [vmem:[%s1368_s7 + $0x8] sm:$0xff] %v841_v43  ;;  %vm822_vm12 = vmor %vm820_vm11, %vm821_vm10 }
 0x261   :  { %v813_v45 = vsel %vm812_vm9, %v1191_v32, %v809_v44  ;;  %v816_v46 = vmul.f32 %v1193_v42, %v815_v30 }
 0x262   :  { %v826_v47 = vmul.f32 %v813_v45, %v1333_v61 }
 0x263   :  { %v817_v48 = vmul.f32 0.5, %v816_v46 }
 0x264   :  { %v834_v51 = vmul.f32 %v1182_v20, %v826_v47 }
 0x265   :  { %v818_v52 = vsub.f32 1.5, %v817_v48 }
 0x266   :  { %v842_v53 = vadd.f32 %v1183_v23, %v834_v51 }
 0x267   :  { %v819_v49 = vmul.f32 %v1193_v42, %v818_v52 }
 0x268   :  { %846 = vst [vmem:[%s1368_s7 + $0x10] sm:$0xff] %v842_v53 }
 0x269   :  { %v823_v54 = vsel %vm822_vm12, %v1193_v42, %v819_v49 }
 0x26a   :  { %v827_v55 = vmul.f32 %v823_v54, %v1337_v1 }
 0x26c   :  { %v835_v56 = vmul.f32 %v1182_v20, %v827_v55 }
 0x26e   :  { %v843_v57 = vadd.f32 %v1183_v23, %v835_v56 }
 0x270   :  { %847 = vst [vmem:[%s1368_s7 + $0x18] sm:$0xff] %v843_v57 }
 0x271   :  { %852 = vsyncpa [#allocation4], 1 }
 0x272   :  { %853 = vsyncpa [#allocation6], 1 }

// kernel: transformer_encoder_layer.5
= control target key start
LH: loop header
LB: loop body
LE: loop exit
PB: predicated region body
PF: predicated region fallthrough
CT: control target
= control target key end

     0   :  { %s2430_s15 = smov 0   ;;  %s2432_s16 = smov 0   ;;  %s3132_s0 = inlined_call_operand.vmem [shape: bf16[2,16,384], index: 0, kind: input, shape index: {}, may-alias: {0,1,2}]   ;;  %s3133_s1 = inlined_call_operand.vmem [shape: bf16[2,16,384], index: 1, kind: input, shape index: {}, may-alias: {0,1,2}]   ;;  %s3134_s2 = inlined_call_operand.vmem [shape: bf16[2,16,384], index: 2, kind: input, shape index: {}, may-alias: {0,1,2}]   ;;  %s3135_s3 = inlined_call_operand.vmem [shape: f32[2,1,16], index: 3, kind: input, shape index: {}]   ;;  %s3136_s4 = inlined_call_operand.vmem [shape: bf16[2,16,128], index: 4, kind: output, shape index: {}]  }
   0x1   :  { %s2434_s17 = smov 0   ;;  %s2436_s18 = smov 0  }
   0x2   :  { %s2438_s19 = smov 0  }
   0x3 LB: > { %s33_s20 = sadd.s32 1, %s2391_s18  ;;  %p49_p1 = scmp.ne.s32.totalorder %s2383_s16, %s2379_s15  ;;  %s2395_s19 = sphi %s2438_s19, %s14_s19   ;;  %s2391_s18 = sphi %s2436_s18, %s3141_s18   ;;  %s2387_s17 = sphi %s2434_s17, %s3140_s17   ;;  %s2383_s16 = sphi %s2432_s16, %s3139_s16   ;;  %s2379_s15 = sphi %s2430_s15, %s3138_s15  }
   0x4   : > { %p35_p0 = scmp.ge.s32.totalorder %s33_s20, 2  ;;  %p50_p2 = scmp.eq.s32.totalorder %s2395_s19, 0 }
   0x5   : > { %s42_s23 = sadd.s32 1, %s2383_s16  ;;  %p2208_p5 = scmp.ge.s32.totalorder %s2395_s19, 2 }
   0x6   : > { %s3143_s20 = smov (%p35_p0, %s33_s20), 0  ;;  %p2461_p3 = por %p50_p2, %p49_p1 }
   0x7   : > { %s37_s22 = ssub.s32 %s2391_s18, %s3143_s20  ;;  %187 = sbr.rel (%p2208_p5) target bundleno = 33 (0x21), region = 16 }
   0x8   : > { %p40_p4 = scmp.eq.s32.totalorder %s37_s22, 0 }
   0xa   : > { %s2469_s24 = scalar_select %p40_p4, %s2383_s16, %s42_s23  }
   0xc   : > { %190 = sbr.rel (!%p2461_p3) target bundleno = 19 (0x13), region = 20  ;;  %s192_s25 = sand.u32 (%p2461_p3), 1, %s2383_s16  }
   0xd   : > { %s2241_s26 = smul.u32 (%p2461_p3), 24, %s2391_s18  ;;  %s2209_s27 = sshll.u32 (%p2461_p3), %s192_s25, 3 }
   0xe   : > { %s194_s5 = scalar_lea.vmem (%p2461_p3), [#allocation5], %s2209_s27 }
   0xf   : > { %s200_s30 = scalar_lea.vmem (%p2461_p3), %s3132_s0, %s2241_s26 }
  0x10   : > { %v217_v0 = vld [vmem:[%s200_s30] sm:$0xf] (%p2461_p3)  ;;  %v219_v1 = vld [vmem:[%s200_s30 + $0xc] sm:$0xf] (%p2461_p3) }
  0x11   : > { %218 = vst [vmem:[%s194_s5] sm:$0xf] %v217_v0 }
  0x12   : > { %220 = vst [vmem:[%s194_s5 + $0x4] sm:$0xf] %v219_v1 }
  0x13 PF: > { %248 = sbr.rel (!%p2461_p3) target bundleno = 26 (0x1a), region = 61  ;;  %s250_s6 = sand.u32 (%p2461_p3), 1, %s2383_s16  }
  0x14   : > { %s2212_s7 = smul.u32 (%p2461_p3), 24, %s2391_s18  ;;  %s2211_s8 = sshll.u32 (%p2461_p3), %s250_s6, 3 }
  0x15   : > { %s252_s12 = scalar_lea.vmem (%p2461_p3), [#allocation6], %s2211_s8 }
  0x16   : > { %s2099_s11 = scalar_lea.vmem (%p2461_p3), %s3133_s1, %s2212_s7 }
  0x17   : > { %v2213_v2 = vld [vmem:[%s2099_s11 + $0x4] sm:$0xf] (%p2461_p3)  ;;  %v2214_v3 = vld [vmem:[%s2099_s11 + $0x10] sm:$0xf] (%p2461_p3) }
  0x18   : > { %277 = vst [vmem:[%s252_s12] sm:$0xf] %v2213_v2 }
  0x19   : > { %279 = vst [vmem:[%s252_s12 + $0x4] sm:$0xf] %v2214_v3 }
  0x1a PF: > { %307 = sbr.rel (!%p2461_p3) target bundleno = 33 (0x21), region = 102  ;;  %s309_s13 = sand.u32 (%p2461_p3), 1, %s2383_s16  }
  0x1b   : > { %s2216_s14 = smul.u32 (%p2461_p3), 24, %s2391_s18  ;;  %s2215_s22 = sshll.u32 (%p2461_p3), %s309_s13, 3 }
  0x1c   : > { %s311_s27 = scalar_lea.vmem (%p2461_p3), [#allocation7], %s2215_s22 }
  0x1d   : > { %s2107_s26 = scalar_lea.vmem (%p2461_p3), %s3134_s2, %s2216_s14 }
  0x1e   : > { %v2217_v4 = vld [vmem:[%s2107_s26 + $0x8] sm:$0xf] (%p2461_p3)  ;;  %v2218_v5 = vld [vmem:[%s2107_s26 + $0x14] sm:$0xf] (%p2461_p3) }
  0x1f   : > { %336 = vst [vmem:[%s311_s27] sm:$0xf] %v2217_v4 }
  0x20   : > { %338 = vst [vmem:[%s311_s27 + $0x4] sm:$0xf] %v2218_v5 }
  0x21 PF: > { %p2219_p6 = scmp.ge.s32.totalorder %s2395_s19, 1  ;;  %p374_p7 = scmp.lt.s32.totalorder %s2395_s19, 3 }
  0x23   : > { %p375_p8 = pnand %p2219_p6, %p374_p7 }
  0x24   : > { %s381_s21 = sand.u32 (!%p375_p8), 1, %s2379_s15   ;;  %s2397_s30 = smov (!%p375_p8), 64  }
  0x25   : > { %378 = sbr.rel (%p375_p8) target bundleno = 1051 (0x41b), region = 147  ;;  %s2496_s28 = sshll.u32 (!%p375_p8), %s381_s21, 3 }
  0x26   : > { %s390_s29 = scalar_lea.vmem (!%p375_p8), [#allocation6], %s2496_s28  ;;  %s2398_s5 = smov (!%p375_p8), 96  }
  0x27   : > { %s2399_s6 = smov (!%p375_p8), 32   ;;  %s383_s15 = scalar_lea.vmem (!%p375_p8), [#allocation5], %s2496_s28 }
  0x28   : > { %s397_s7 = scalar_lea.vmem (!%p375_p8), [#allocation7], %s2496_s28  ;;  %p441_p9 = scmp.lt.s32.totalorder (!%p375_p8), %s2387_s17, 1 }
  0x2a   : > { %v733_v6 = vld [vmem:[%s390_s29] sm:$0xf]  ;;  %v2502_v7 = vld [vmem:[%s390_s29 + $0x4] sm:$0xf]  ;;  %v2511_v8 = vld [vmem:[%s383_s15 + $0x4] sm:$0xf] }
  0x2b   : > { %741 = vrot.lane.b32.xlu1 %v733_v6, %s2397_s30  ;;  %737 = vrot.lane.b32.xlu0 %v733_v6, %s2398_s5  ;;  %v2513_v9 = vld [vmem:[%s383_s15] sm:$0xf]  ;;  %v2400_v12 = vmov 1983009808   ;;  %v752_v16 = vshrl.u32 %v733_v6, 16  ;;  %vm539_vm0 = vcmask 1047556  }
  0x2c   : > { %745 = vrot.lane.b32.xlu2 %v733_v6, %s2399_s6  ;;  %v530_v13 = vunpack.c.l.s4 %v2400_v12  ;;  %v2401_v19 = vmov 1934713408   ;;  %v764_v36 = vshrl.u32 %v2502_v7, 16  ;;  %v519_v45 = vshrl.u32 %v2511_v8, 16  ;;  %s3145_s17 = smov (!%p441_p9, %s2387_s17), 1 }
  0x2d   : > { %v544_v20 = vunpack.c.l.s4 %v2401_v19  ;;  %v507_v46 = vshrl.u32 %v2513_v9, 16  ;;  %vm479_vm1 = vcmask 261120   ;;  %s446_s10 = scalar_lea.vmem %s3135_s3, %s3145_s17  ;;  %vm1354_vm2 = vcmask 130048   ;;  %s2235_s11 = sshll.u32 %s3145_s17, 3 }
  0x2e   : > { %v2527_v15 = vunpack.c.0.s8 %v530_v13  ;;  %vm462_vm3 = vcmask 7168   ;;  %vm2046_vm4 = vcmask 523264   ;;  %vm2049_vm5 = vcmask 785408   ;;  %s455_s14 = scalar_lea.vmem %s3136_s4, %s2235_s11 }
  0x2f   : > { %v2533_v30 = vunpack.c.0.s8 %v544_v20 }
  0x33   : > { %743 = vrot.lane.b32.xlu1 %v2502_v7, %s2397_s30  ;;  %739 = vrot.lane.b32.xlu0 %v2502_v7, %s2398_s5 }
  0x34   : > { %747 = vrot.lane.b32.xlu2 %v2502_v7, %s2399_s6 }
  0x3b   : > { %494 = vrot.lane.b32.xlu1 %v2511_v8, %s2398_s5  ;;  %492 = vrot.lane.b32.xlu0 %v2513_v9, %s2398_s5 }
  0x3c   : > { %496 = vrot.lane.b32.xlu2 %v2513_v9, %s2397_s30 }
  0x43   : > { %500 = vrot.lane.b32.xlu1 %v2513_v9, %s2399_s6  ;;  %498 = vrot.lane.b32.xlu0 %v2511_v8, %s2397_s30 }
  0x44   : > { %502 = vrot.lane.b32.xlu2 %v2511_v8, %s2399_s6 }
  0x86   : > { %v746_v10 = vpop.permute.xlu2 %745 }
  0x87   : > { %v759_v14 = vshrl.u32 %v746_v10, 16 }
  0x8e   : > { %v748_v11 = vpop.permute.xlu2 %747 }
  0x8f   : > { %v771_v35 = vshrl.u32 %v748_v11, 16 }
  0x96   : > { %v2529_v17 = vpop.permute.xlu2 %496 }
  0x97   : > { %v513_v63 = vshrl.u32 %v2529_v17, 16 }
  0x9d   : > { %v742_v18 = vpop.permute.xlu1 %741  ;;  %v738_v21 = vpop.permute.xlu0 %737 }
  0x9e   : > { %v757_v22 = vpack.i.b16 %v746_v10, %v742_v18  ;;  %v758_v23 = vshrl.u32 %v742_v18, 16  ;;  %v751_v24 = vpack.i.b16 %v738_v21, %v733_v6  ;;  %v753_v25 = vshrl.u32 %v738_v21, 16  ;;  %v2550_v55 = vpop.permute.xlu2 %502 }
  0x9f   : > { %v526_v3 = vshrl.u32 %v2550_v55, 16 }
  0xa0   : > { %v760_v26 = vpack.i.b16 %v759_v14, %v758_v23  ;;  %v782_v27 = vperm.slane %v757_v22, %v2527_v15  ;;  %v754_v28 = vpack.i.b16 %v753_v25, %v752_v16  ;;  %v777_v29 = vperm.slane %v751_v24, %v2527_v15 }
  0xa2   : > { %v783_v31 = vrot.slane %v782_v27, 4  ;;  %v808_v32 = vperm.slane %v760_v26, %v2527_v15  ;;  %v785_v33 = vrot.slane %v777_v29, 4  ;;  %v803_v34 = vperm.slane %v754_v28, %v2527_v15 }
  0xa4   : > { %v809_v37 = vrot.slane %v808_v32, 4  ;;  %v784_v38 = vsel %vm539_vm0, %v783_v31, %v777_v29  ;;  %v786_v39 = vsel %vm539_vm0, %v782_v27, %v785_v33  ;;  %v811_v40 = vrot.slane %v803_v34, 4 }
  0xa5   : > { %v790_v41 = vperm.slane %v784_v38, %v2533_v30  ;;  %v794_v42 = vperm.slane %v786_v39, %v2533_v30  ;;  %v744_v43 = vpop.permute.xlu1 %743  ;;  %v740_v44 = vpop.permute.xlu0 %739 }
  0xa6   : > { %v810_v47 = vsel %vm539_vm0, %v809_v37, %v803_v34  ;;  %v812_v48 = vsel %vm539_vm0, %v808_v32, %v811_v40  ;;  %v769_v49 = vpack.i.b16 %v748_v11, %v744_v43  ;;  %v770_v50 = vshrl.u32 %v744_v43, 16 }
  0xa7   : > { %v795_v51 = vrot.slane %v790_v41, 4  ;;  %v797_v52 = vrot.slane %v794_v42, 4  ;;  %v2547_v53 = vperm.slane %v810_v47, %v2533_v30  ;;  %v820_v54 = vperm.slane %v812_v48, %v2533_v30 }
  0xa8   : > { %v772_v56 = vpack.i.b16 %v771_v35, %v770_v50  ;;  %v834_v57 = vperm.slane %v769_v49, %v2527_v15  ;;  %v763_v58 = vpack.i.b16 %v740_v44, %v2502_v7  ;;  %v765_v59 = vshrl.u32 %v740_v44, 16 }
  0xa9   : > { %v798_v60 = vsel %vm539_vm0, 0, %v797_v52  ;;  %v821_v61 = vrot.slane %v2547_v53, 4  ;;  %v2556_v62 = vrot.slane %v820_v54, 4  ;;  %v796_v4 = vsel %vm539_vm0, 0, %v795_v51 }
  0xaa   : > { %v882_v0 = vrot.slane %v798_v60, 4  ;;  %v835_v1 = vrot.slane %v834_v57, 4  ;;  %v860_v2 = vperm.slane %v772_v56, %v2527_v15  ;;  %v766_v6 = vpack.i.b16 %v765_v59, %v764_v36 }
  0xab   : > { %v2564_v5 = vsel %vm539_vm0, 0, %v2556_v62  ;;  %v829_v7 = vperm.slane %v763_v58, %v2527_v15  ;;  %v2568_v10 = vsel %vm539_vm0, 0, %v821_v61  ;;  %v877_v11 = vsel %vm539_vm0, %v797_v52, %v790_v41 }
  0xac   : > { %v883_v12 = vsel %vm539_vm0, %v882_v0, %v796_v4  ;;  %v861_v13 = vrot.slane %v860_v2, 4  ;;  %v901_v14 = vrot.slane %v2564_v5, 4  ;;  %v855_v19 = vperm.slane %v766_v6, %v2527_v15 }
  0xad   : > { %v836_v16 = vsel %vm539_vm0, %v835_v1, %v829_v7  ;;  %v837_v18 = vrot.slane %v829_v7, 4  ;;  %v495_v20 = vpop.permute.xlu1 %494  ;;  %v493_v21 = vpop.permute.xlu0 %492  ;;  %v881_v40 = vperm.slane %v877_v11, %v2527_v15  ;;  %v887_v56 = vperm.slane %v883_v12, %v2527_v15 }
  0xae   : > { %v842_v22 = vperm.slane %v836_v16, %v2533_v30  ;;  %v518_v23 = vpack.i.b16 %v495_v20, %v2511_v8  ;;  %v520_v24 = vshrl.u32 %v495_v20, 16  ;;  %v506_v25 = vpack.i.b16 %v493_v21, %v2513_v9 }
  0xaf   : > { %v838_v26 = vsel %vm539_vm0, %v834_v57, %v837_v18  ;;  %v862_v27 = vsel %vm539_vm0, %v861_v13, %v855_v19  ;;  %v863_v28 = vrot.slane %v855_v19, 4  ;;  %v508_v29 = vshrl.u32 %v493_v21, 16 }
  0xb0   : > { %v846_v31 = vperm.slane %v838_v26, %v2533_v30  ;;  %v847_v32 = vrot.slane %v842_v22, 4  ;;  %v2582_v33 = vperm.slane %v862_v27, %v2533_v30  ;;  %v521_v34 = vpack.i.b16 %v520_v24, %v519_v45 }
  0xb1   : > { %v864_v35 = vsel %vm539_vm0, %v860_v2, %v863_v28  ;;  %v585_v8 = vperm.slane %v518_v23, %v2527_v15  ;;  %v509_v36 = vpack.i.b16 %v508_v29, %v507_v46  ;;  %v532_v9 = vperm.slane %v506_v25, %v2527_v15 }
  0xb2   : > { %v849_v37 = vrot.slane %v846_v31, 4  ;;  %v872_v38 = vperm.slane %v864_v35, %v2533_v30  ;;  %v873_v39 = vrot.slane %v2582_v33, 4  ;;  %v848_v41 = vsel %vm539_vm0, 0, %v847_v32 }
  0xb3   : > { %v593_v42 = vrot.slane %v585_v8, 4  ;;  %v2592_v43 = vperm.slane %v521_v34, %v2527_v15  ;;  %v559_v44 = vperm.slane %v509_v36, %v2527_v15  ;;  %v541_v48 = vrot.slane %v532_v9, 4 }
  0xb4   : > { %v850_v45 = vsel %vm539_vm0, 0, %v849_v37  ;;  %v2597_v46 = vsel %vm539_vm0, 0, %v873_v39  ;;  %v2599_v47 = vrot.slane %v872_v38, 4  ;;  %v2602_v49 = vsel %vm539_vm0, %v849_v37, %v842_v22 }
  0xb5   : > { %v920_v50 = vrot.slane %v850_v45, 4  ;;  %v619_v51 = vrot.slane %v2592_v43, 4  ;;  %v501_v52 = vpop.permute.xlu1 %500  ;;  %v499_v54 = vpop.permute.xlu0 %498  ;;  %v567_v0 = vrot.slane %v559_v44, 4  ;;  %v888_v2 = vrot.slane %v887_v56, 4 }
  0xb6   : > { %v2608_v57 = vsel %vm539_vm0, 0, %v2599_v47  ;;  %v512_v58 = vpack.i.b16 %v501_v52, %v2529_v17  ;;  %v514_v59 = vshrl.u32 %v501_v52, 16  ;;  %v524_v60 = vpack.i.b16 %v2550_v55, %v499_v54 }
  0xb7   : > { %v2613_v61 = vsel %vm539_vm0, %v920_v50, %v848_v41  ;;  %v525_v1 = vshrl.u32 %v499_v54, 16  ;;  %v2620_v11 = vsel %vm539_vm0, %v2556_v62, %v2547_v53  ;;  %v939_v17 = vrot.slane %v2608_v57, 4 }
  0xb8   : > { %v515_v4 = vpack.i.b16 %v514_v59, %v513_v63  ;;  %v537_v6 = vperm.slane %v512_v58, %v2527_v15  ;;  %v590_v7 = vperm.slane %v524_v60, %v2527_v15  ;;  %v889_v55 = vsel %vm539_vm0, %v888_v2, %v881_v40 }
  0xb9   : > { %v527_v12 = vpack.i.b16 %v526_v3, %v525_v1  ;;  %v900_v13 = vperm.slane %v2620_v11, %v2527_v15  ;;  %v902_v62 = vsel %vm539_vm0, %v901_v14, %v2568_v10  ;;  %v893_v41 = vperm.slane %v889_v55, %v2533_v30 }
  0xba   : > { %v538_v16 = vrot.slane %v537_v6, 4  ;;  %v542_v63 = vsel %vm539_vm0, %v537_v6, %v541_v48  ;;  %v564_v18 = vperm.slane %v515_v4, %v2527_v15  ;;  %v591_v19 = vrot.slane %v590_v7, 4 }
  0xbb   : > { %v550_v20 = vperm.slane %v542_v63, %v2533_v30  ;;  %v594_v21 = vsel %vm539_vm0, %v590_v7, %v593_v42  ;;  %v616_v53 = vperm.slane %v527_v12, %v2527_v15  ;;  %v906_v60 = vperm.slane %v902_v62, %v2527_v15 }
  0xbc   : > { %v540_v3 = vsel %vm539_vm0, %v538_v16, %v532_v9  ;;  %v565_v22 = vrot.slane %v564_v18, 4  ;;  %v568_v23 = vsel %vm539_vm0, %v564_v18, %v567_v0  ;;  %v592_v24 = vsel %vm539_vm0, %v591_v19, %v585_v8 }
  0xbd   : > { %v546_v25 = vperm.slane %v540_v3, %v2533_v30  ;;  %v553_v26 = vrot.slane %v550_v20, 4  ;;  %v576_v27 = vperm.slane %v568_v23, %v2533_v30  ;;  %v598_v28 = vperm.slane %v592_v24, %v2533_v30 }
  0xbe   : > { %v566_v29 = vsel %vm539_vm0, %v565_v22, %v559_v44  ;;  %v602_v5 = vperm.slane %v594_v21, %v2533_v30  ;;  %v617_v31 = vrot.slane %v616_v53, 4  ;;  %v620_v10 = vsel %vm539_vm0, %v616_v53, %v619_v51  ;;  %v2702_v53 = vld [vmem:[%s397_s7] sm:$0xf] }
  0xbf   : > { %v551_v14 = vrot.slane %v546_v25, 4  ;;  %v554_v32 = vsel %vm539_vm0, 0, %v553_v26  ;;  %v572_v34 = vperm.slane %v566_v29, %v2533_v30  ;;  %v579_v35 = vrot.slane %v576_v27, 4  ;;  %981 = vrot.lane.b32.xlu1 %v2702_v53, %s2398_s5  ;;  %985 = vrot.lane.b32.xlu0 %v2702_v53, %s2397_s30 }
  0xc0   : > { %v2647_v8 = vsel %vm539_vm0, %v553_v26, %v546_v25  ;;  %v638_v36 = vrot.slane %v554_v32, 4  ;;  %v603_v9 = vrot.slane %v598_v28, 4  ;;  %v605_v37 = vrot.slane %v602_v5, 4 }
  0xc1   : > { %v552_v38 = vsel %vm539_vm0, 0, %v551_v14  ;;  %v577_v39 = vrot.slane %v572_v34, 4  ;;  %v2651_v40 = vsel %vm539_vm0, 0, %v579_v35  ;;  %v637_v42 = vperm.slane %v2647_v8, %v2527_v15 }
  0xc2   : > { %v639_v44 = vsel %vm539_vm0, %v638_v36, %v552_v38  ;;  %v2658_v45 = vsel %vm539_vm0, %v579_v35, %v572_v34  ;;  %v657_v48 = vrot.slane %v2651_v40, 4  ;;  %v604_v50 = vsel %vm539_vm0, 0, %v603_v9 }
  0xc3   : > { %v606_v51 = vsel %vm539_vm0, 0, %v605_v37  ;;  %v618_v52 = vsel %vm539_vm0, %v617_v31, %v2592_v43  ;;  %v628_v54 = vperm.slane %v620_v10, %v2533_v30  ;;  %v2668_v58 = vsel %vm539_vm0, %v605_v37, %v598_v28 }
  0xc4   : > { %v624_v56 = vperm.slane %v618_v52, %v2533_v30  ;;  %v676_v59 = vrot.slane %v606_v51, 4  ;;  %v578_v0 = vsel %vm539_vm0, 0, %v577_v39  ;;  %v675_v2 = vperm.slane %v2668_v58, %v2527_v15 }
  0xc5   : > { %v631_v1 = vrot.slane %v628_v54, 4  ;;  %v925_v4 = vperm.slane %v2613_v61, %v2527_v15  ;;  %v907_v6 = vrot.slane %v906_v60, 4  ;;  %v919_v7 = vperm.slane %v2602_v49, %v2527_v15 }
  0xc6   : > { %v629_v43 = vrot.slane %v624_v56, 4  ;;  %v934_v11 = vsel %vm539_vm0, %v2599_v47, %v2582_v33  ;;  %v677_v55 = vsel %vm539_vm0, %v676_v59, %v604_v50  ;;  %v940_v33 = vsel %vm539_vm0, %v939_v17, %v2597_v46  ;;  %v2710_v46 = vld [vmem:[%s397_s7 + $0x4] sm:$0xf] }
  0xc7   : > { %v2682_v12 = vsel %vm539_vm0, 0, %v631_v1  ;;  %v2686_v16 = vsel %vm539_vm0, %v631_v1, %v624_v56  ;;  %v926_v63 = vrot.slane %v925_v4, 4  ;;  %v908_v18 = vsel %vm539_vm0, %v907_v6, %v900_v13  ;;  %983 = vrot.lane.b32.xlu2 %v2710_v46, %s2398_s5  ;;  %987 = vrot.lane.b32.xlu1 %v2710_v46, %s2397_s30 }
  0xc8   : > { %v2689_v61 = vsel %vm539_vm0, 0, %v629_v43  ;;  %v938_v49 = vperm.slane %v934_v11, %v2527_v15  ;;  %v695_v47 = vrot.slane %v2682_v12, 4  ;;  %v912_v19 = vperm.slane %v908_v18, %v2533_v30  ;;  %989 = vrot.lane.b32.xlu0 %v2702_v53, %s2399_s6 }
  0xc9   : > { %v927_v20 = vsel %vm539_vm0, %v926_v63, %v919_v7  ;;  %v944_v21 = vperm.slane %v940_v33, %v2527_v15  ;;  %v956_v62 = vshrl.u32 %v893_v41, 16  ;;  %v894_v3 = vrot.slane %v893_v41, 4 }
  0xca   : > { %v931_v13 = vperm.slane %v927_v20, %v2533_v30  ;;  %v643_v22 = vperm.slane %v639_v44, %v2527_v15  ;;  %v955_v17 = vpack.i.b16 %v912_v19, %v893_v41  ;;  %v957_v23 = vshrl.u32 %v912_v19, 16 }
  0xcb   : > { %v945_v57 = vrot.slane %v944_v21, 4  ;;  %v913_v24 = vrot.slane %v912_v19, 4  ;;  %v895_v25 = vsel %vm539_vm0, 0, %v894_v3  ;;  %v656_v28 = vperm.slane %v2658_v45, %v2527_v15 }
  0xcc   : > { %v932_v26 = vrot.slane %v931_v13, 4  ;;  %v644_v27 = vrot.slane %v643_v22, 4  ;;  %v958_v5 = vpack.i.b16 %v957_v23, %v956_v62  ;;  %v968_v31 = vshrl.u32 %v931_v13, 16 }
  0xcd   : > { %v946_v29 = vsel %vm539_vm0, %v945_v57, %v938_v49  ;;  %v914_v10 = vsel %vm539_vm0, 0, %v913_v24  ;;  %v1224_v32 = vunpack.c.l.b16 %v955_v17  ;;  %v962_v9 = vshrl.u32 %v895_v25, 16 }
  0xce   : > { %v950_v14 = vperm.slane %v946_v29, %v2533_v30  ;;  %v933_v34 = vsel %vm539_vm0, 0, %v932_v26  ;;  %v961_v35 = vpack.i.b16 %v914_v10, %v895_v25  ;;  %v1251_v36 = vunpack.c.l.b16 %v958_v5 }
  0xcf   : > { %v963_v37 = vshrl.u32 %v914_v10, 16  ;;  %v974_v38 = vshrl.u32 %v933_v34, 16  ;;  %v645_v45 = vsel %vm539_vm0, %v644_v27, %v637_v42  ;;  %v658_v52 = vsel %vm539_vm0, %v657_v48, %v578_v0  ;;  %991 = vrot.lane.b32.xlu2 %v2710_v46, %s2399_s6 }
  0xd0   : > { %v967_v39 = vpack.i.b16 %v950_v14, %v931_v13  ;;  %v969_v41 = vshrl.u32 %v950_v14, 16  ;;  %v951_v44 = vrot.slane %v950_v14, 4  ;;  %v1277_v50 = vunpack.c.l.b16 %v961_v35 }
  0xd1   : > { %v964_v51 = vpack.i.b16 %v963_v37, %v962_v9  ;;  %v681_v54 = vperm.slane %v677_v55, %v2527_v15  ;;  %v662_v1 = vperm.slane %v658_v52, %v2527_v15  ;;  %v649_v40 = vperm.slane %v645_v45, %v2533_v30 }
  0xd2   : > { %v1225_v56 = vunpack.c.l.b16 %v967_v39  ;;  %v970_v59 = vpack.i.b16 %v969_v41, %v968_v31  ;;  %v952_v60 = vsel %vm539_vm0, 0, %v951_v44  ;;  %v696_v55 = vsel %vm539_vm0, %v695_v47, %v2689_v61 }
  0xd3   : > { %v973_v8 = vpack.i.b16 %v952_v60, %v933_v34  ;;  %v975_v42 = vshrl.u32 %v952_v60, 16  ;;  %v682_v4 = vrot.slane %v681_v54, 4  ;;  %v1303_v43 = vunpack.c.l.b16 %v964_v51 }
  0xd4   : > { %v1226_v48 = vpack.c.b16 %v1225_v56, %v1224_v32  ;;  %v1252_v0 = vunpack.c.l.b16 %v970_v59  ;;  %v663_v6 = vrot.slane %v662_v1, 4  ;;  %v700_v13 = vperm.slane %v696_v55, %v2527_v15 }
  0xd5   : > { %v1278_v7 = vunpack.c.l.b16 %v973_v8  ;;  %v976_v11 = vpack.i.b16 %v975_v42, %v974_v38  ;;  %v683_v12 = vsel %vm539_vm0, %v682_v4, %v675_v2  ;;  %v694_v2 = vperm.slane %v2686_v16, %v2527_v15 }
  0xd6   : > { %v1232_v63 = vsel %vm479_vm1, %v1226_v48, 0  ;;  %v1253_v18 = vpack.c.b16 %v1252_v0, %v1251_v36  ;;  %v664_v49 = vsel %vm539_vm0, %v663_v6, %v656_v28  ;;  %v687_v33 = vperm.slane %v683_v12, %v2533_v30 }
  0xd7   : > { %1241 = vmatpush.bf16.xpose.msra.mxu0 %v1232_v63  ;;  %v1279_v19 = vpack.c.b16 %v1278_v7, %v1277_v50  ;;  %v1304_v20 = vunpack.c.l.b16 %v976_v11  ;;  %v668_v21 = vperm.slane %v664_v49, %v2533_v30  ;;  %v712_v61 = vshrl.u32 %v649_v40, 16 }
  0xd8   : > { %v1258_v58 = vsel %vm479_vm1, %v1253_v18, 0  ;;  %v650_v47 = vrot.slane %v649_v40, 4  ;;  %v701_v22 = vrot.slane %v700_v13, 4  ;;  %v688_v25 = vrot.slane %v687_v33, 4 }
  0xd9   : > { %1267 = vmatpush.bf16.xpose.msra.mxu1 %v1258_v58  ;;  %v1284_v62 = vsel %vm479_vm1, %v1279_v19, 0  ;;  %v1305_v3 = vpack.c.b16 %v1304_v20, %v1303_v43  ;;  %v711_v57 = vpack.i.b16 %v668_v21, %v649_v40  ;;  %v713_v17 = vshrl.u32 %v668_v21, 16  ;;  %v2778_v19 = vld [vmem:[%s446_s10] ss:$0 sm:$0xff] }
  0xda   : > { %1293 = vmatpush.bf16.xpose.msra.mxu2 %v1284_v62  ;;  %v651_v23 = vsel %vm539_vm0, 0, %v650_v47  ;;  %v669_v24 = vrot.slane %v668_v21, 4  ;;  %v702_v27 = vsel %vm539_vm0, %v701_v22, %v694_v2  ;;  %v724_v29 = vshrl.u32 %v687_v33, 16 }
  0xdb   : > { %v1310_v26 = vsel %vm479_vm1, %v1305_v3, 0  ;;  %v706_v16 = vperm.slane %v702_v27, %v2533_v30  ;;  %v714_v28 = vpack.i.b16 %v713_v17, %v712_v61  ;;  %v1221_v31 = vunpack.c.l.b16 %v711_v57 }
  0xdc   : > { %1319 = vmatpush.bf16.xpose.msra.mxu3 %v1310_v26  ;;  %v670_v5 = vsel %vm539_vm0, 0, %v669_v24  ;;  %v718_v14 = vshrl.u32 %v651_v23, 16  ;;  %v689_v36 = vsel %vm539_vm0, 0, %v688_v25  ;;  %v1008_v0 = vshrl.u32 %v2710_v46, 16 }
  0xdd   : > { %v717_v10 = vpack.i.b16 %v670_v5, %v651_v23  ;;  %v719_v32 = vshrl.u32 %v670_v5, 16  ;;  %v723_v34 = vpack.i.b16 %v706_v16, %v687_v33  ;;  %v725_v35 = vshrl.u32 %v706_v16, 16 }
  0xde   : > { %v707_v9 = vrot.slane %v706_v16, 4  ;;  %v1248_v41 = vunpack.c.l.b16 %v714_v28  ;;  %v730_v51 = vshrl.u32 %v689_v36, 16  ;;  %v996_v63 = vshrl.u32 %v2702_v53, 16 }
  0xdf   : > { %v720_v37 = vpack.i.b16 %v719_v32, %v718_v14  ;;  %v1222_v38 = vunpack.c.l.b16 %v723_v34  ;;  %v726_v39 = vpack.i.b16 %v725_v35, %v724_v29  ;;  %v1274_v50 = vunpack.c.l.b16 %v717_v10 }
  0xe0   : > { %v708_v44 = vsel %vm539_vm0, 0, %v707_v9 }
  0xe1   : > { %v729_v45 = vpack.i.b16 %v708_v44, %v689_v36  ;;  %v731_v52 = vshrl.u32 %v708_v44, 16  ;;  %v1223_v54 = vpack.c.b16 %v1222_v38, %v1221_v31  ;;  %v1249_v56 = vunpack.c.l.b16 %v726_v39 }
  0xe2   : > { %v1300_v1 = vunpack.c.l.b16 %v720_v37 }
  0xe3   : > { %v1275_v59 = vunpack.c.l.b16 %v729_v45  ;;  %v732_v60 = vpack.i.b16 %v731_v52, %v730_v51  ;;  %2225 = vmatmul.msk.bf16.vlgmr.msra.gmra.mxu0 %vm479_vm1, %v1223_v54  ;;  %v1250_v8 = vpack.c.b16 %v1249_v56, %v1248_v41 }
  0xe5   : > { %v1276_v42 = vpack.c.b16 %v1275_v59, %v1274_v50  ;;  %v1301_v40 = vunpack.c.l.b16 %v732_v60  ;;  %2226 = vmatmul.msk.bf16.vlgmr.msra.gmra.mxu1 %vm479_vm1, %v1250_v8 }
  0xe7   : > { %2227 = vmatmul.msk.bf16.vlgmr.msra.gmra.mxu2 %vm479_vm1, %v1276_v42  ;;  %v1302_v4 = vpack.c.b16 %v1301_v40, %v1300_v1 }
  0xe9   : > { %2228 = vmatmul.msk.bf16.vlgmr.msra.gmra.mxu3 %vm479_vm1, %v1302_v4 }
 0x121   : > { %v984_v43 = vpop.permute.xlu2 %983 }
 0x122   : > { %v1007_v7 = vpack.i.b16 %v984_v43, %v2710_v46  ;;  %v1009_v11 = vshrl.u32 %v984_v43, 16 }
 0x124   : > { %v1010_v55 = vpack.i.b16 %v1009_v11, %v1008_v0  ;;  %v1073_v33 = vperm.slane %v1007_v7, %v2527_v15 }
 0x126   : > { %v1099_v21 = vperm.slane %v1010_v55, %v2527_v15  ;;  %v1081_v3 = vrot.slane %v1073_v33, 4 }
 0x128   : > { %v1107_v27 = vrot.slane %v1099_v21, 4 }
 0x129   : > { %v992_v47 = vpop.permute.xlu2 %991 }
 0x12a   : > { %v1015_v57 = vshrl.u32 %v992_v47, 16 }
 0x131   : > { %v982_v48 = vpop.permute.xlu1 %981  ;;  %v986_v12 = vpop.permute.xlu0 %985 }
 0x132   : > { %v995_v6 = vpack.i.b16 %v982_v48, %v2702_v53  ;;  %v997_v18 = vshrl.u32 %v982_v48, 16  ;;  %v1002_v46 = vshrl.u32 %v986_v12, 16 }
 0x134   : > { %v1021_v49 = vperm.slane %v995_v6, %v2527_v15  ;;  %v998_v58 = vpack.i.b16 %v997_v18, %v996_v63 }
 0x136   : > { %v1029_v2 = vrot.slane %v1021_v49, 4  ;;  %v2791_v31 = vperm.slane %v998_v58, %v2527_v15 }
 0x139   : > { %v988_v61 = vpop.permute.xlu1 %987 }
 0x13a   : > { %v1014_v53 = vshrl.u32 %v988_v61, 16  ;;  %v1013_v22 = vpack.i.b16 %v992_v47, %v988_v61  ;;  %v990_v17 = vpop.permute.xlu0 %989 }
 0x13b   : > { %v1001_v25 = vpack.i.b16 %v990_v17, %v986_v12  ;;  %v1003_v26 = vshrl.u32 %v990_v17, 16 }
 0x13c   : > { %v1016_v16 = vpack.i.b16 %v1015_v57, %v1014_v53  ;;  %v1078_v28 = vperm.slane %v1013_v22, %v2527_v15 }
 0x13d   : > { %v1026_v10 = vperm.slane %v1001_v25, %v2527_v15  ;;  %v1004_v35 = vpack.i.b16 %v1003_v26, %v1002_v46 }
 0x13e   : > { %v1079_v14 = vrot.slane %v1078_v28, 4  ;;  %v1082_v32 = vsel %vm539_vm0, %v1078_v28, %v1081_v3  ;;  %v1104_v34 = vperm.slane %v1016_v16, %v2527_v15 }
 0x13f   : > { %v1090_v9 = vperm.slane %v1082_v32, %v2533_v30  ;;  %v1027_v37 = vrot.slane %v1026_v10, 4  ;;  %v1030_v38 = vsel %vm539_vm0, %v1026_v10, %v1029_v2  ;;  %v1052_v22 = vperm.slane %v1004_v35, %v2527_v15 }
 0x140   : > { %v1080_v41 = vsel %vm539_vm0, %v1079_v14, %v1073_v33  ;;  %v1105_v44 = vrot.slane %v1104_v34, 4  ;;  %v1108_v45 = vsel %vm539_vm0, %v1104_v34, %v1107_v27  ;;  %v1038_v50 = vperm.slane %v1030_v38, %v2533_v30 }
 0x141   : > { %v1086_v54 = vperm.slane %v1080_v41, %v2533_v30  ;;  %v1093_v56 = vrot.slane %v1090_v9, 4  ;;  %v1116_v59 = vperm.slane %v1108_v45, %v2533_v30  ;;  %v1028_v42 = vsel %vm539_vm0, %v1027_v37, %v1021_v49 }
 0x142   : > { %v1106_v8 = vsel %vm539_vm0, %v1105_v44, %v1099_v21  ;;  %v1041_v40 = vrot.slane %v1038_v50, 4  ;;  %v1055_v49 = vrot.slane %v2791_v31, 4  ;;  %v1034_v47 = vperm.slane %v1028_v42, %v2533_v30 }
 0x143   : > { %v1091_v43 = vrot.slane %v1086_v54, 4  ;;  %v1094_v6 = vsel %vm539_vm0, 0, %v1093_v56  ;;  %v1112_v12 = vperm.slane %v1106_v8, %v2533_v30  ;;  %v1119_v55 = vrot.slane %v1116_v59, 4 }
 0x144   : > { %v1159_v46 = vsel %vm539_vm0, %v1093_v56, %v1086_v54  ;;  %v1164_v61 = vrot.slane %v1094_v6, 4  ;;  %v1042_v53 = vsel %vm539_vm0, 0, %v1041_v40  ;;  %v1121_v25 = vsel %vm539_vm0, %v1041_v40, %v1034_v47 }
 0x145   : > { %v1092_v33 = vsel %vm539_vm0, 0, %v1091_v43  ;;  %v1120_v58 = vsel %vm539_vm0, 0, %v1119_v55  ;;  %v1126_v26 = vrot.slane %v1042_v53, 4  ;;  %v1053_v16 = vrot.slane %v1052_v22, 4 }
 0x146   : > { %v1183_v3 = vrot.slane %v1120_v58, 4  ;;  %v1056_v28 = vsel %vm539_vm0, %v1052_v22, %v1055_v49  ;;  %v1165_v34 = vsel %vm539_vm0, %v1164_v61, %v1092_v33  ;;  %v1178_v35 = vsel %vm539_vm0, %v1119_v55, %v1112_v12 }
 0x147   : > { %v1064_v32 = vperm.slane %v1056_v28, %v2533_v30  ;;  %v1054_v37 = vsel %vm539_vm0, %v1053_v16, %v2791_v31  ;;  %v1169_v45 = vperm.slane %v1165_v34, %v2527_v15  ;;  %v2402_v33 = vmov -inf  }
 0x148   : > { %463 = vst.msk [vmem:[#allocation2] sm:$0xff] %vm462_vm3, %v2402_v33 }
 0x149   : > { %v1067_v41 = vrot.slane %v1064_v32, 4  ;;  %464 = vst.msk [vmem:[#allocation2 + $0x8] sm:$0xff] %vm462_vm3, %v2402_v33 }
 0x14a   : > { %465 = vst.msk [vmem:[#allocation2 + $0x10] sm:$0xff] %vm462_vm3, %v2402_v33 }
 0x14b   : > { %v1068_v56 = vsel %vm539_vm0, 0, %v1067_v41  ;;  %466 = vst.msk [vmem:[#allocation2 + $0x18] sm:$0xff] %vm462_vm3, %v2402_v33 }
 0x14c   : > { %v1145_v8 = vrot.slane %v1068_v56, 4  ;;  %467 = vst.msk [vmem:[#allocation2 + $0x20] sm:$0xff] %vm462_vm3, %v2402_v33 }
 0x14d   : > { %468 = vst.msk [vmem:[#allocation2 + $0x28] sm:$0xff] %vm462_vm3, %v2402_v33 }
 0x14e   : > { %469 = vst.msk [vmem:[#allocation2 + $0x30] sm:$0xff] %vm462_vm3, %v2402_v33 }
 0x14f   : > { %470 = vst.msk [vmem:[#allocation2 + $0x38] sm:$0xff] %vm462_vm3, %v2402_v33 }
 0x160   : > { %v1243_v20 = vpop.f32.mrf.mxu0 }
 0x161   : > { %v1326_v13 = vmul.f32 0.17677669, %v1243_v20 }
 0x162   : > { %v1269_v62 = vpop.f32.mrf.mxu1 }
 0x163   : > { %v1328_v23 = vmul.f32 0.17677669, %v1269_v62  ;;  %v2782_v24 = vadd.f32 %v2778_v19, %v1326_v13  ;;  %v1117_v13 = vrot.slane %v1112_v12, 4 }
 0x165   : > { %v1355_v29 = vsel %vm1354_vm2, %v2782_v24, -inf  ;;  %v2788_v5 = vadd.f32 %v2778_v19, %v1328_v23  ;;  %v1118_v17 = vsel %vm539_vm0, 0, %v1117_v13  ;;  %v1039_v23 = vrot.slane %v1034_v47, 4 }
 0x166   : > { %1356 = vmax.xlane.f32.xlu0 %v1355_v29  ;;  %v1125_v29 = vperm.slane %v1121_v25, %v2527_v15  ;;  %v1184_v54 = vsel %vm539_vm0, %v1183_v3, %v1118_v17 }
 0x167   : > { %v1361_v36 = vsel %vm1354_vm2, %v2788_v5, -inf  ;;  %v1040_v14 = vsel %vm539_vm0, 0, %v1039_v23 }
 0x168   : > { %1362 = vmax.xlane.f32.xlu2 %v1361_v36  ;;  %v1245_v39 = vpop.f32.mrf.mxu0  ;;  %v1127_v38 = vsel %vm539_vm0, %v1126_v26, %v1040_v14 }
 0x169   : > { %v1327_v51 = vmul.f32 0.17677669, %v1245_v39  ;;  %v1060_v39 = vperm.slane %v1054_v37, %v2533_v30  ;;  %v1131_v44 = vperm.slane %v1127_v38, %v2527_v15 }
 0x16a   : > { %v1295_v52 = vpop.f32.mrf.mxu2  ;;  %v1271_v1 = vpop.f32.mrf.mxu1 }
 0x16b   : > { %v1330_v60 = vmul.f32 0.17677669, %v1295_v52  ;;  %v1329_v4 = vmul.f32 0.17677669, %v1271_v1  ;;  %v2808_v0 = vadd.f32 %v2778_v19, %v1327_v51  ;;  %v1163_v52 = vperm.slane %v1159_v46, %v2527_v15 }
 0x16c   : > { %v1321_v48 = vpop.f32.mrf.mxu3  ;;  %v1065_v31 = vrot.slane %v1060_v39, 4  ;;  %v1132_v59 = vrot.slane %v1131_v44, 4  ;;  %v1140_v42 = vsel %vm539_vm0, %v1067_v41, %v1060_v39 }
 0x16d   : > { %v1332_v7 = vmul.f32 0.17677669, %v1321_v48  ;;  %v2812_v11 = vadd.f32 %v2778_v19, %v1330_v60  ;;  %v1358_v63 = vsel %vm1354_vm2, %v2808_v0, -inf  ;;  %v2818_v18 = vadd.f32 %v2778_v19, %v1329_v4 }
 0x16e   : > { %1359 = vmax.xlane.f32.xlu1 %v1358_v63  ;;  %v1182_v60 = vperm.slane %v1178_v35, %v2527_v15  ;;  %v1066_v40 = vsel %vm539_vm0, 0, %v1065_v31  ;;  %v1133_v4 = vsel %vm539_vm0, %v1132_v59, %v1125_v29  ;;  %v1188_v48 = vperm.slane %v1184_v54, %v2527_v15 }
 0x16f   : > { %v1367_v20 = vsel %vm1354_vm2, %v2812_v11, -inf  ;;  %v2825_v21 = vadd.f32 %v2778_v19, %v1332_v7  ;;  %v1364_v2 = vsel %vm1354_vm2, %v2818_v18, -inf  ;;  %v1137_v43 = vperm.slane %v1133_v4, %v2533_v30 }
 0x170   : > { %1368 = vmax.xlane.f32.xlu0 %v1367_v20  ;;  %v1146_v6 = vsel %vm539_vm0, %v1145_v8, %v1066_v40  ;;  %v1144_v12 = vperm.slane %v1140_v42, %v2527_v15  ;;  %v1189_v49 = vrot.slane %v1188_v48, 4  ;;  %v2403_v42 = vmov 0.0   ;;  %v1346_v40 = vld [vmem:[#allocation2] sm:$0xff]  ;;  %v2906_v48 = vld [vmem:[#allocation2 + $0x10] sm:$0xff] }
 0x171   : > { %v1373_v62 = vsel %vm1354_vm2, %v2825_v21, -inf  ;;  %v1150_v55 = vperm.slane %v1146_v6, %v2527_v15  ;;  %v1138_v58 = vrot.slane %v1137_v43, 4  ;;  %480 = vst.msk [vmem:[#allocation4] sm:$0xff] %vm479_vm1, %v2403_v42 }
 0x172   : > { %1374 = vmax.xlane.f32.xlu2 %v1373_v62  ;;  %v1297_v57 = vpop.f32.mrf.mxu2  ;;  %v1190_v13 = vsel %vm539_vm0, %v1189_v49, %v1182_v60  ;;  %v1200_v62 = vshrl.u32 %v1137_v43, 16  ;;  %471 = vst.msk [vmem:[#allocation3] sm:$0xff] %vm462_vm3, %v2403_v42 }
 0x173   : > { %v1331_v27 = vmul.f32 0.17677669, %v1297_v57  ;;  %v1151_v20 = vrot.slane %v1150_v55, 4  ;;  %v1194_v46 = vperm.slane %v1190_v13, %v2533_v30  ;;  %v1139_v23 = vsel %vm539_vm0, 0, %v1138_v58  ;;  %472 = vst.msk [vmem:[#allocation3 + $0x8] sm:$0xff] %vm462_vm3, %v2403_v42  ;;  %v1347_v55 = vld [vmem:[#allocation2 + $0x8] sm:$0xff] }
 0x174   : > { %v1323_v10 = vpop.f32.mrf.mxu3  ;;  %v1206_v37 = vshrl.u32 %v1139_v23, 16  ;;  %473 = vst.msk [vmem:[#allocation3 + $0x10] sm:$0xff] %vm462_vm3, %v2403_v42  ;;  %v2916_v13 = vld [vmem:[#allocation2 + $0x30] sm:$0xff] }
 0x175   : > { %v1333_v36 = vmul.f32 0.17677669, %v1323_v10  ;;  %v2845_v9 = vadd.f32 %v2778_v19, %v1331_v27  ;;  %v1152_v47 = vsel %vm539_vm0, %v1151_v20, %v1144_v12  ;;  %v1213_v57 = vshrl.u32 %v1194_v46, 16  ;;  %474 = vst.msk [vmem:[#allocation3 + $0x18] sm:$0xff] %vm462_vm3, %v2403_v42 }
 0x176   : > { %v1156_v53 = vperm.slane %v1152_v47, %v2533_v30  ;;  %v1195_v17 = vrot.slane %v1194_v46, 4  ;;  %475 = vst.msk [vmem:[#allocation3 + $0x20] sm:$0xff] %vm462_vm3, %v2403_v42  ;;  %v2928_v47 = vld [vmem:[#allocation2 + $0x18] sm:$0xff] }
 0x177   : > { %v1370_v50 = vsel %vm1354_vm2, %v2845_v9, -inf  ;;  %v2856_v51 = vadd.f32 %v2778_v19, %v1333_v36  ;;  %v1170_v19 = vrot.slane %v1169_v45, 4  ;;  %476 = vst.msk [vmem:[#allocation3 + $0x28] sm:$0xff] %vm462_vm3, %v2403_v42 }
 0x178   : > { %1365 = vmax.xlane.f32.xlu0 %v1364_v2  ;;  %1371 = vmax.xlane.f32.xlu1 %v1370_v50  ;;  %v1199_v25 = vpack.i.b16 %v1156_v53, %v1137_v43  ;;  %v1201_v27 = vshrl.u32 %v1156_v53, 16  ;;  %v1157_v28 = vrot.slane %v1156_v53, 4  ;;  %v1196_v29 = vsel %vm539_vm0, 0, %v1195_v17  ;;  %477 = vst.msk [vmem:[#allocation3 + $0x30] sm:$0xff] %vm462_vm3, %v2403_v42 }
 0x179   : > { %v1376_v1 = vsel %vm1354_vm2, %v2856_v51, -inf  ;;  %v1171_v7 = vsel %vm539_vm0, %v1170_v19, %v1163_v52  ;;  %v1219_v38 = vshrl.u32 %v1196_v29, 16  ;;  %v2404_v19 = vmov 0   ;;  %478 = vst.msk [vmem:[#allocation3 + $0x38] sm:$0xff] %vm462_vm3, %v2403_v42 }
 0x17a   : > { %1377 = vmax.xlane.f32.xlu2 %v1376_v1  ;;  %v1175_v63 = vperm.slane %v1171_v7, %v2533_v30  ;;  %v1601_v14 = vunpack.c.l.b16 %v1199_v25  ;;  %v1202_v32 = vpack.i.b16 %v1201_v27, %v1200_v62  ;;  %v1158_v36 = vsel %vm539_vm0, 0, %v1157_v28  ;;  %2290 = vset.pattern.permute.xlu1 %v2404_v19  ;;  %481 = vst.msk [vmem:[#allocation4 + $0x8] sm:$0xff] %vm479_vm1, %v2403_v42  ;;  %v1351_v62 = vld [vmem:[#allocation2 + $0x28] sm:$0xff] }
 0x17b   : > { %v1205_v44 = vpack.i.b16 %v1158_v36, %v1139_v23  ;;  %v1207_v50 = vshrl.u32 %v1158_v36, 16  ;;  %2292 = vset.pattern.permute.xlu2 %v2404_v19  ;;  %2291 = vset.pattern.permute.xlu0 %v2404_v19  ;;  %482 = vst.msk [vmem:[#allocation4 + $0x10] sm:$0xff] %vm479_vm1, %v2403_v42 }
 0x17c   : > { %v1176_v2 = vrot.slane %v1175_v63, 4  ;;  %v1212_v61 = vshrl.u32 %v1175_v63, 16  ;;  %v1211_v22 = vpack.i.b16 %v1194_v46, %v1175_v63  ;;  %v1627_v41 = vunpack.c.l.b16 %v1202_v32  ;;  %483 = vst.msk [vmem:[#allocation4 + $0x18] sm:$0xff] %vm479_vm1, %v2403_v42  ;;  %v1350_v63 = vld [vmem:[#allocation2 + $0x20] sm:$0xff] }
 0x17d   : > { %v1653_v31 = vunpack.c.l.b16 %v1205_v44  ;;  %v1208_v56 = vpack.i.b16 %v1207_v50, %v1206_v37  ;;  %484 = vst.msk [vmem:[#allocation4 + $0x20] sm:$0xff] %vm479_vm1, %v2403_v42 }
 0x17e   : > { %v1177_v3 = vsel %vm539_vm0, 0, %v1176_v2  ;;  %v1602_v26 = vunpack.c.l.b16 %v1211_v22  ;;  %v1214_v16 = vpack.i.b16 %v1213_v57, %v1212_v61  ;;  %485 = vst.msk [vmem:[#allocation4 + $0x28] sm:$0xff] %vm479_vm1, %v2403_v42  ;;  %v2930_v22 = vld [vmem:[#allocation2 + $0x38] sm:$0xff] }
 0x17f   : > { %v1218_v10 = vshrl.u32 %v1177_v3, 16  ;;  %v1217_v35 = vpack.i.b16 %v1196_v29, %v1177_v3  ;;  %v1679_v1 = vunpack.c.l.b16 %v1208_v56  ;;  %486 = vst.msk [vmem:[#allocation4 + $0x30] sm:$0xff] %vm479_vm1, %v2403_v42 }
 0x180   : > { %v1628_v34 = vunpack.c.l.b16 %v1214_v16  ;;  %v1603_v39 = vpack.c.b16 %v1602_v26, %v1601_v14  ;;  %487 = vst.msk [vmem:[#allocation4 + $0x38] sm:$0xff] %vm479_vm1, %v2403_v42 }
 0x181   : > { %v1654_v45 = vunpack.c.l.b16 %v1217_v35  ;;  %v1220_v52 = vpack.i.b16 %v1219_v38, %v1218_v10 }
 0x182   : > { %1615 = vmatpush.bf16.msrb.mxu0 %v1603_v39  ;;  %v1629_v54 = vpack.c.b16 %v1628_v34, %v1627_v41 }
 0x183   : > { %v1680_v59 = vunpack.c.l.b16 %v1220_v52  ;;  %v1655_v60 = vpack.c.b16 %v1654_v45, %v1653_v31 }
 0x184   : > { %1641 = vmatpush.bf16.msrb.mxu1 %v1629_v54 }
 0x185   : > { %1667 = vmatpush.bf16.msrb.mxu2 %v1655_v60  ;;  %v1681_v8 = vpack.c.b16 %v1680_v59, %v1679_v1 }
 0x187   : > { %1693 = vmatpush.bf16.msrb.mxu3 %v1681_v8 }
 0x1d9   : > { %v1357_v4 = vpop.xlane.xlu0 %1356 }
 0x1da   : > { %v1379_v43 = vmax.f32 %v1346_v40, %v1357_v4 }
 0x1db   : > { %v1363_v6 = vpop.xlane.xlu2 %1362 }
 0x1dc   : > { %1716 = vst.msk [vmem:[#allocation2] sm:$0xff] %vm462_vm3, %v1379_v43  ;;  %v2910_v7 = vmax.f32 %v2906_v48, %v1363_v6  ;;  %v1387_v16 = vsub.f32 %v1346_v40, %v1379_v43 }
 0x1de   : > { %v1389_v12 = vsub.f32 %v2906_v48, %v2910_v7  ;;  %1718 = vst.msk [vmem:[#allocation2 + $0x10] sm:$0xff] %vm462_vm3, %v2910_v7  ;;  %v1395_v14 = vmul.f32 1.442695, %v1387_v16 }
 0x1e1   : > { %v1360_v49 = vpop.xlane.xlu1 %1359 }
 0x1e2   : > { %v1380_v33 = vmax.f32 %v1347_v55, %v1360_v49 }
 0x1e3   : > { %v1369_v20 = vpop.xlane.xlu0 %1368 }
 0x1e4   : > { %v1383_v58 = vmax.f32 %v1350_v63, %v1369_v20  ;;  %1717 = vst.msk [vmem:[#allocation2 + $0x8] sm:$0xff] %vm462_vm3, %v1380_v33  ;;  %v1388_v34 = vsub.f32 %v1347_v55, %v1380_v33 }
 0x1e5   : > { %v1375_v2 = vpop.xlane.xlu2 %1374 }
 0x1e6   : > { %1720 = vst.msk [vmem:[#allocation2 + $0x20] sm:$0xff] %vm462_vm3, %v1383_v58  ;;  %v2921_v46 = vmax.f32 %v2916_v13, %v1375_v2  ;;  %1433 = vperm.xlu1 %2290, %v1383_v58   ;;  %v1391_v29 = vsub.f32 %v1350_v63, %v1383_v58  ;;  %v1397_v36 = vmul.f32 1.442695, %v1388_v34 }
 0x1e8   : > { %v1393_v61 = vsub.f32 %v2916_v13, %v2921_v46  ;;  %1722 = vst.msk [vmem:[#allocation2 + $0x30] sm:$0xff] %vm462_vm3, %v2921_v46  ;;  %1443 = vperm.xlu2 %2292, %v2921_v46   ;;  %v1403_v32 = vmul.f32 1.442695, %v1391_v29 }
 0x1eb   : > { %v1366_v3 = vpop.xlane.xlu0 %1365  ;;  %v1372_v53 = vpop.xlane.xlu1 %1371 }
 0x1ec   : > { %v2933_v57 = vmax.f32 %v2928_v47, %v1366_v3  ;;  %v1384_v17 = vmax.f32 %v1351_v62, %v1372_v53 }
 0x1ed   : > { %v1378_v23 = vpop.xlane.xlu2 %1377 }
 0x1ee   : > { %v1390_v25 = vsub.f32 %v2928_v47, %v2933_v57  ;;  %1719 = vst.msk [vmem:[#allocation2 + $0x18] sm:$0xff] %vm462_vm3, %v2933_v57  ;;  %v2940_v26 = vmax.f32 %v2930_v22, %v1378_v23  ;;  %1438 = vperm.xlu0 %2291, %v1384_v17   ;;  %v1392_v27 = vsub.f32 %v1351_v62, %v1384_v17 }
 0x1ef   : > { %1721 = vst.msk [vmem:[#allocation2 + $0x28] sm:$0xff] %vm462_vm3, %v1384_v17 }
 0x1f0   : > { %v1394_v28 = vsub.f32 %v2930_v22, %v2940_v26  ;;  %1723 = vst.msk [vmem:[#allocation2 + $0x38] sm:$0xff] %vm462_vm3, %v2940_v26  ;;  %1413 = vperm.xlu2 %2292, %v1379_v43   ;;  %1448 = vperm.xlu1 %2290, %v2940_v26   ;;  %v1405_v10 = vmul.f32 1.442695, %v1392_v27  ;;  %v1401_v13 = vmul.f32 1.442695, %v1390_v25 }
 0x1f2   : > { %2309 = vpow2.f32 %v1405_v10 }
 0x1f3   : > { %2311 = vpow2.f32 %v1395_v14 }
 0x1f4   : > { %2313 = vpow2.f32 %v1403_v32 }
 0x1f5   : > { %2315 = vpow2.f32 %v1397_v36 }
 0x1f6   : > { %1423 = vperm.xlu0 %2291, %v2910_v7   ;;  %v1409_v7 = vmul.f32 1.442695, %v1394_v28 }
 0x1f8   : > { %1428 = vperm.xlu2 %2292, %v2933_v57   ;;  %1418 = vperm.xlu1 %2290, %v1380_v33   ;;  %v2950_v35 = vpop.eup %2309  ;;  %v1475_v57 = vld [vmem:[#allocation3] sm:$0xff] }
 0x1f9   : > { %v2952_v37 = vpop.eup %2311 }
 0x1fa   : > { %v2955_v38 = vpop.eup %2313  ;;  %v1483_v25 = vmul.f32 %v2952_v37, %v1475_v57 }
 0x1fb   : > { %v2959_v39 = vpop.eup %2315 }
 0x1fe   : > { %1567 = vperm.xlu0 %2291, %v2950_v35  }
 0x200   : > { %1542 = vperm.xlu2 %2292, %v2952_v37   ;;  %1562 = vperm.xlu1 %2290, %v2955_v38   ;;  %v1480_v37 = vld [vmem:[#allocation3 + $0x28] sm:$0xff] }
 0x208   : > { %1547 = vperm.xlu2 %2292, %v2959_v39  }
 0x242   : > { %v1444_v41 = vpop.permute.xlu2 %1443 }
 0x243   : > { %v1457_v56 = vsub.f32 %v2825_v21, %v1444_v41 }
 0x245   : > { %v1471_v8 = vmul.f32 1.442695, %v1457_v56 }
 0x24a   : > { %v1414_v44 = vpop.permute.xlu2 %1413 }
 0x24b   : > { %v1451_v45 = vsub.f32 %v2782_v24, %v1414_v44 }
 0x24d   : > { %v1459_v50 = vmul.f32 1.442695, %v1451_v45 }
 0x24f   : > { %2317 = vpow2.f32 %v1459_v50 }
 0x252   : > { %v1429_v52 = vpop.permute.xlu2 %1428 }
 0x253   : > { %v1454_v54 = vsub.f32 %v2818_v18, %v1429_v52 }
 0x255   : > { %v2964_v31 = vpop.eup %2317  ;;  %v1465_v59 = vmul.f32 1.442695, %v1454_v54 }
 0x256   : > { %v1491_v60 = vsel %vm1354_vm2, %v2964_v31, 0.0  ;;  %v1588_v44 = vpack.c.bf16 %v2964_v31, %v2964_v31 }
 0x257   : > { %2319 = vpow2.f32 %v1465_v59  ;;  %1492 = vadd.xlane.f32.xlu2 %v1491_v60  ;;  %v1407_v60 = vmul.f32 1.442695, %v1393_v61 }
 0x258   : > { %v1434_v1 = vpop.permute.xlu1 %1433  ;;  %2321 = vpow2.f32 %v1471_v8 }
 0x259   : > { %v1455_v42 = vsub.f32 %v2812_v11, %v1434_v1  ;;  %v1598_v1 = vunpack.c.l.b16 %v1588_v44 }
 0x25b   : > { %v1467_v24 = vmul.f32 1.442695, %v1455_v42 }
 0x25d   : > { %v2320_v19 = vpop.eup %2319  ;;  %2323 = vpow2.f32 %v1467_v24  ;;  %v1399_v24 = vmul.f32 1.442695, %v1389_v12 }
 0x25e   : > { %v1500_v40 = vsel %vm1354_vm2, %v2320_v19, 0.0  ;;  %v2322_v43 = vpop.eup %2321  ;;  %v1591_v36 = vpack.c.bf16 %v2320_v19, %v2320_v19 }
 0x25f   : > { %1501 = vadd.xlane.f32.xlu0 %v1500_v40  ;;  %v1509_v11 = vsel %vm1354_vm2, %v2322_v43, 0.0  ;;  %v1594_v53 = vpack.c.bf16 %v2322_v43, %v2322_v43 }
 0x260   : > { %v1439_v18 = vpop.permute.xlu0 %1438  ;;  %v1625_v54 = vunpack.c.l.b16 %v1591_v36 }
 0x261   : > { %v1456_v21 = vsub.f32 %v2845_v9, %v1439_v18  ;;  %v2999_v18 = vpop.permute.xlu2 %1542 }
 0x262   : > { %v1449_v4 = vpop.permute.xlu1 %1448 }
 0x263   : > { %v1469_v6 = vmul.f32 1.442695, %v1456_v21  ;;  %v1458_v55 = vsub.f32 %v2856_v51, %v1449_v4  ;;  %v2324_v49 = vpop.eup %2323 }
 0x264   : > { %v1592_v20 = vpack.c.bf16 %v2324_v49, %v2324_v49  ;;  %v1503_v61 = vsel %vm1354_vm2, %v2324_v49, 0.0 }
 0x265   : > { %2325 = vpow2.f32 %v1469_v6  ;;  %v1473_v63 = vmul.f32 1.442695, %v1458_v55  ;;  %v1478_v6 = vld [vmem:[#allocation3 + $0x18] sm:$0xff] }
 0x266   : > { %v1650_v51 = vunpack.c.l.b16 %v1592_v20 }
 0x267   : > { %2327 = vpow2.f32 %v1473_v63  ;;  %1510 = vadd.xlane.f32.xlu0 %v1509_v11  ;;  %v1481_v63 = vld [vmem:[#allocation3 + $0x30] sm:$0xff] }
 0x268   : > { %v1424_v33 = vpop.permute.xlu0 %1423 }
 0x269   : > { %v1453_v58 = vsub.f32 %v2788_v5, %v1424_v33  ;;  %v1676_v5 = vunpack.c.l.b16 %v1594_v53  ;;  %v3001_v47 = vpop.permute.xlu2 %1547 }
 0x26a   : > { %v1419_v2 = vpop.permute.xlu1 %1418 }
 0x26b   : > { %v2326_v62 = vpop.eup %2325  ;;  %v1463_v3 = vmul.f32 1.442695, %v1453_v58  ;;  %v1452_v9 = vsub.f32 %v2808_v0, %v1419_v2  ;;  %v1482_v58 = vld [vmem:[#allocation3 + $0x38] sm:$0xff] }
 0x26c   : > { %v1593_v17 = vpack.c.bf16 %v2326_v62, %v2326_v62  ;;  %v1506_v10 = vsel %vm1354_vm2, %v2326_v62, 0.0  ;;  %v1488_v62 = vmul.f32 %v2950_v35, %v1480_v37  ;;  %v1476_v35 = vld [vmem:[#allocation3 + $0x8] sm:$0xff] }
 0x26d   : > { %v2328_v23 = vpop.eup %2327  ;;  %2329 = vpow2.f32 %v1463_v3  ;;  %v1461_v27 = vmul.f32 1.442695, %v1452_v9 }
 0x26e   : > { %v1651_v16 = vunpack.c.l.b16 %v1593_v17  ;;  %v1595_v29 = vpack.c.bf16 %v2328_v23, %v2328_v23  ;;  %v1512_v14 = vsel %vm1354_vm2, %v2328_v23, 0.0 }
 0x26f   : > { %2331 = vpow2.f32 %v1461_v27  ;;  %1507 = vadd.xlane.f32.xlu0 %v1506_v10  ;;  %1513 = vadd.xlane.f32.xlu2 %v1512_v14 }
 0x270   : > { %v1677_v32 = vunpack.c.l.b16 %v1595_v29  ;;  %v1652_v34 = vpack.c.b16 %v1651_v16, %v1650_v51  ;;  %2333 = vpow2.f32 %v1407_v60  ;;  %v3004_v21 = vpop.permute.xlu0 %1567  ;;  %v1477_v51 = vld [vmem:[#allocation3 + $0x10] sm:$0xff]  ;;  %v1479_v60 = vld [vmem:[#allocation3 + $0x20] sm:$0xff] }
 0x271   : > { %2335 = vpow2.f32 %v1399_v24 }
 0x272   : > { %2231 = vmatmul.msk.bf16.vlgmr.msrb.gmra.mxu2 %vm1354_vm2, %v1652_v34  ;;  %v1678_v0 = vpack.c.b16 %v1677_v32, %v1676_v5  ;;  %2337 = vpow2.f32 %v1401_v13  ;;  %v1563_v2 = vpop.permute.xlu1 %1562  ;;  %v1484_v34 = vmul.f32 %v2959_v39, %v1476_v35 }
 0x273   : > { %v2330_v41 = vpop.eup %2329  ;;  %2339 = vpow2.f32 %v1409_v7 }
 0x274   : > { %v1590_v45 = vpack.c.bf16 %v2330_v41, %v2330_v41  ;;  %2232 = vmatmul.msk.bf16.vlgmr.msrb.gmra.mxu3 %vm1354_vm2, %v1678_v0  ;;  %v1497_v50 = vsel %vm1354_vm2, %v2330_v41, 0.0  ;;  %v1536_v0 = vld [vmem:[#allocation4 + $0x20] sm:$0xff] }
 0x275   : > { %v2332_v52 = vpop.eup %2331  ;;  %1498 = vadd.xlane.f32.xlu1 %v1497_v50  ;;  %v1534_v50 = vld [vmem:[#allocation4 + $0x10] sm:$0xff] }
 0x276   : > { %v1624_v56 = vunpack.c.l.b16 %v1590_v45  ;;  %v1589_v59 = vpack.c.bf16 %v2332_v52, %v2332_v52  ;;  %v1494_v19 = vsel %vm1354_vm2, %v2332_v52, 0.0  ;;  %v2334_v46 = vpop.eup %2333 }
 0x277   : > { %v2336_v40 = vpop.eup %2335  ;;  %v1489_v49 = vmul.f32 %v2334_v46, %v1481_v63 }
 0x278   : > { %v1599_v8 = vunpack.c.l.b16 %v1589_v59  ;;  %v1626_v42 = vpack.c.b16 %v1625_v54, %v1624_v56  ;;  %v2338_v48 = vpop.eup %2337  ;;  %v1485_v16 = vmul.f32 %v2336_v40, %v1477_v51  ;;  %v1538_v54 = vld [vmem:[#allocation4 + $0x30] sm:$0xff]  ;;  %v1584_v59 = vmul.f32 %v1563_v2, %v1536_v0 }
 0x279   : > { %v2340_v12 = vpop.eup %2339  ;;  %v1486_v55 = vmul.f32 %v2338_v48, %v1478_v6 }
 0x27a   : > { %2230 = vmatmul.msk.bf16.vlgmr.msrb.gmra.mxu1 %vm1354_vm2, %v1626_v42  ;;  %v1600_v31 = vpack.c.b16 %v1599_v8, %v1598_v1  ;;  %v1490_v3 = vmul.f32 %v2340_v12, %v1482_v58  ;;  %v1532_v1 = vld [vmem:[#allocation4] sm:$0xff] }
 0x27c   : > { %2229 = vmatmul.msk.bf16.vlgmr.msrb.gmra.mxu0 %vm1354_vm2, %v1600_v31 }
 0x27d   : > { %1495 = vadd.xlane.f32.xlu1 %v1494_v19 }
 0x283   : > { %1572 = vperm.xlu0 %2291, %v2334_v46   ;;  %v1487_v46 = vmul.f32 %v2955_v38, %v1479_v60 }
 0x285   : > { %1504 = vadd.xlane.f32.xlu1 %v1503_v61  ;;  %v1580_v61 = vmul.f32 %v2999_v18, %v1532_v1  ;;  %v1533_v18 = vld [vmem:[#allocation4 + $0x8] sm:$0xff] }
 0x287   : > { %1552 = vperm.xlu2 %2292, %v2336_v40  }
 0x28b   : > { %1557 = vperm.xlu0 %2291, %v2338_v48  }
 0x29e   : > { %1577 = vperm.xlu1 %2290, %v2340_v12   ;;  %v1537_v12 = vld [vmem:[#allocation4 + $0x28] sm:$0xff] }
 0x29f   : > { %v1585_v38 = vmul.f32 %v3004_v21, %v1537_v12 }
 0x2ca   : > { %v1493_v4 = vpop.xlane.xlu2 %1492 }
 0x2cb   : > { %v1515_v43 = vadd.f32 %v1493_v4, %v1483_v25 }
 0x2cd   : > { %1524 = vst.msk [vmem:[#allocation3] sm:$0xff] %vm462_vm3, %v1515_v43 }
 0x2d2   : > { %v1502_v22 = vpop.xlane.xlu0 %1501 }
 0x2d3   : > { %v1518_v26 = vadd.f32 %v1502_v22, %v1486_v55  ;;  %v1535_v55 = vld [vmem:[#allocation4 + $0x18] sm:$0xff] }
 0x2d4   : > { %v1735_v28 = vld [vmem:[#allocation3] sm:$0xff] }
 0x2d5   : > { %1527 = vst.msk [vmem:[#allocation3 + $0x18] sm:$0xff] %vm462_vm3, %v1518_v26  ;;  %2341 = vrcp.f32 %v1735_v28 }
 0x2da   : > { %v1511_v11 = vpop.xlane.xlu0 %1510 }
 0x2db   : > { %v2342_v33 = vpop.eup %2341  ;;  %v1521_v20 = vadd.f32 %v1511_v11, %v1489_v49  ;;  %v1581_v11 = vmul.f32 %v3001_v47, %v1533_v18 }
 0x2dc   : > { %1753 = vperm.xlu0 %2291, %v2342_v33   ;;  %v1738_v44 = vld [vmem:[#allocation3 + $0x18] sm:$0xff] }
 0x2dd   : > { %1530 = vst.msk [vmem:[#allocation3 + $0x30] sm:$0xff] %vm462_vm3, %v1521_v20 }
 0x2e2   : > { %v1508_v9 = vpop.xlane.xlu0 %1507  ;;  %v1514_v53 = vpop.xlane.xlu2 %1513 }
 0x2e3   : > { %v1520_v17 = vadd.f32 %v1508_v9, %v1488_v62  ;;  %v1522_v23 = vadd.f32 %v1514_v53, %v1490_v3  ;;  %v1539_v3 = vld [vmem:[#allocation4 + $0x38] sm:$0xff] }
 0x2e4   : > { %v1741_v27 = vld [vmem:[#allocation3 + $0x30] sm:$0xff] }
 0x2e5   : > { %1529 = vst.msk [vmem:[#allocation3 + $0x28] sm:$0xff] %vm462_vm3, %v1520_v17  ;;  %2343 = vrcp.f32 %v1741_v27 }
 0x2e6   : > { %1531 = vst.msk [vmem:[#allocation3 + $0x38] sm:$0xff] %vm462_vm3, %v1522_v23 }
 0x2e8   : > { %v1499_v29 = vpop.xlane.xlu1 %1498 }
 0x2e9   : > { %v1517_v10 = vadd.f32 %v1499_v29, %v1485_v16 }
 0x2ea   : > { %v1553_v52 = vpop.permute.xlu2 %1552 }
 0x2eb   : > { %v2344_v14 = vpop.eup %2343  ;;  %1526 = vst.msk [vmem:[#allocation3 + $0x10] sm:$0xff] %vm462_vm3, %v1517_v10  ;;  %v1582_v39 = vmul.f32 %v1553_v52, %v1534_v50 }
 0x2ec   : > { %1783 = vperm.xlu2 %2292, %v2344_v14   ;;  %v1740_v5 = vld [vmem:[#allocation3 + $0x28] sm:$0xff] }
 0x2ed   : > { %2345 = vrcp.f32 %v1740_v5  ;;  %v1742_v32 = vld [vmem:[#allocation3 + $0x38] sm:$0xff] }
 0x2ee   : > { %2347 = vrcp.f32 %v1742_v32 }
 0x2ef   : > { %2349 = vrcp.f32 %v1738_v44 }
 0x2f0   : > { %v1496_v36 = vpop.xlane.xlu1 %1495 }
 0x2f1   : > { %v1516_v41 = vadd.f32 %v1496_v36, %v1484_v34 }
 0x2f2   : > { %v1737_v2 = vld [vmem:[#allocation3 + $0x10] sm:$0xff] }
 0x2f3   : > { %v2346_v45 = vpop.eup %2345  ;;  %1525 = vst.msk [vmem:[#allocation3 + $0x8] sm:$0xff] %vm462_vm3, %v1516_v41 }
 0x2f4   : > { %v2348_v56 = vpop.eup %2347  ;;  %1778 = vperm.xlu2 %2292, %v2346_v45  }
 0x2f5   : > { %1788 = vperm.xlu0 %2291, %v2348_v56   ;;  %v1573_v8 = vpop.permute.xlu0 %1572  ;;  %v1669_v42 = vpop.f32.mrf.mxu2 }
 0x2f6   : > { %v1586_v31 = vmul.f32 %v1573_v8, %v1538_v54  ;;  %v1704_v24 = vadd.f32 %v1669_v42, %v1584_v59  ;;  %v2350_v6 = vpop.eup %2349 }
 0x2f7   : > { %v1643_v19 = vpop.f32.mrf.mxu1  ;;  %v1695_v13 = vpop.f32.mrf.mxu3 }
 0x2f8   : > { %1712 = vst.msk [vmem:[#allocation4 + $0x20] sm:$0xff] %vm479_vm1, %v1704_v24  ;;  %v1702_v40 = vadd.f32 %v1643_v19, %v1582_v39  ;;  %v1706_v48 = vadd.f32 %v1695_v13, %v1586_v31  ;;  %v1505_v7 = vpop.xlane.xlu1 %1504 }
 0x2f9   : > { %v1519_v57 = vadd.f32 %v1505_v7, %v1487_v46  ;;  %v1617_v25 = vpop.f32.mrf.mxu0 }
 0x2fa   : > { %1710 = vst.msk [vmem:[#allocation4 + $0x10] sm:$0xff] %vm479_vm1, %v1702_v40  ;;  %v1700_v4 = vadd.f32 %v1617_v25, %v1580_v61  ;;  %v1736_v43 = vld [vmem:[#allocation3 + $0x8] sm:$0xff] }
 0x2fb   : > { %1714 = vst.msk [vmem:[#allocation4 + $0x30] sm:$0xff] %vm479_vm1, %v1706_v48  ;;  %2351 = vrcp.f32 %v1736_v43 }
 0x2fc   : > { %1528 = vst.msk [vmem:[#allocation3 + $0x20] sm:$0xff] %vm462_vm3, %v1519_v57  ;;  %1768 = vperm.xlu2 %2292, %v2350_v6  }
 0x2fd   : > { %1708 = vst.msk [vmem:[#allocation4] sm:$0xff] %vm479_vm1, %v1700_v4  ;;  %v1558_v22 = vpop.permute.xlu0 %1557  ;;  %v1671_v26 = vpop.f32.mrf.mxu2 }
 0x2fe   : > { %v1583_v28 = vmul.f32 %v1558_v22, %v1535_v55  ;;  %v1705_v63 = vadd.f32 %v1671_v26, %v1585_v38 }
 0x2ff   : > { %v1645_v49 = vpop.f32.mrf.mxu1  ;;  %v1697_v17 = vpop.f32.mrf.mxu3  ;;  %v1731_v43 = vld [vmem:[#allocation4 + $0x20] sm:$0xff] }
 0x300   : > { %1713 = vst.msk [vmem:[#allocation4 + $0x28] sm:$0xff] %vm479_vm1, %v1705_v63  ;;  %v1703_v33 = vadd.f32 %v1645_v49, %v1583_v28 }
 0x301   : > { %v2352_v20 = vpop.eup %2351  ;;  %v1619_v37 = vpop.f32.mrf.mxu0 }
 0x302   : > { %1711 = vst.msk [vmem:[#allocation4 + $0x18] sm:$0xff] %vm479_vm1, %v1703_v33  ;;  %v1701_v21 = vadd.f32 %v1619_v37, %v1581_v11  ;;  %1758 = vperm.xlu1 %2290, %v2352_v20   ;;  %v1733_v18 = vld [vmem:[#allocation4 + $0x30] sm:$0xff] }
 0x303   : > { %v1739_v58 = vld [vmem:[#allocation3 + $0x20] sm:$0xff] }
 0x304   : > { %1709 = vst.msk [vmem:[#allocation4 + $0x8] sm:$0xff] %vm479_vm1, %v1701_v21  ;;  %2353 = vrcp.f32 %v1739_v58  ;;  %v1727_v40 = vld [vmem:[#allocation4] sm:$0xff] }
 0x305   : > { %2355 = vrcp.f32 %v1737_v2 }
 0x307   : > { %v1732_v36 = vld [vmem:[#allocation4 + $0x28] sm:$0xff] }
 0x309   : > { %v1730_v5 = vld [vmem:[#allocation4 + $0x18] sm:$0xff] }
 0x30a   : > { %v2354_v62 = vpop.eup %2353 }
 0x30b   : > { %1773 = vperm.xlu1 %2290, %v2354_v62   ;;  %v2356_v53 = vpop.eup %2355  ;;  %v1728_v52 = vld [vmem:[#allocation4 + $0x8] sm:$0xff] }
 0x310   : > { %v1578_v9 = vpop.permute.xlu1 %1577 }
 0x311   : > { %v1587_v47 = vmul.f32 %v1578_v9, %v1539_v3 }
 0x313   : > { %v1707_v23 = vadd.f32 %v1697_v17, %v1587_v47  ;;  %1763 = vperm.xlu1 %2290, %v2356_v53  }
 0x315   : > { %1715 = vst.msk [vmem:[#allocation4 + $0x38] sm:$0xff] %vm479_vm1, %v1707_v23 }
 0x31c   : > { %v1734_v10 = vld [vmem:[#allocation4 + $0x38] sm:$0xff] }
 0x346   : > { %v1784_v51 = vpop.permute.xlu2 %1783 }
 0x347   : > { %v1797_v63 = vmul.f32 %v1784_v51, %v1733_v18 }
 0x349   : > { %v1812_v53 = vrot.slane %v1797_v63, 4 }
 0x34e   : > { %v1754_v27 = vpop.permute.xlu0 %1753  ;;  %v1779_v16 = vpop.permute.xlu2 %1778 }
 0x34f   : > { %v1796_v0 = vmul.f32 %v1779_v16, %v1732_v36  ;;  %v1791_v57 = vmul.f32 %v1754_v27, %v1727_v40 }
 0x351   : > { %v1856_v56 = vrot.slane %v1796_v0, 4  ;;  %v1802_v11 = vrot.slane %v1791_v57, 4 }
 0x356   : > { %v1769_v35 = vpop.permute.xlu2 %1768 }
 0x357   : > { %v1794_v32 = vmul.f32 %v1769_v35, %v1730_v5 }
 0x359   : > { %v1870_v41 = vrot.slane %v1794_v32, 4 }
 0x367   : > { %v1789_v29 = vpop.permute.xlu0 %1788 }
 0x368   : > { %v1798_v14 = vmul.f32 %v1789_v29, %v1734_v10  ;;  %v1729_v29 = vld [vmem:[#allocation4 + $0x10] sm:$0xff] }
 0x36a   : > { %v1868_v34 = vrot.slane %v1798_v14, 4  ;;  %v1871_v45 = vsel %vm539_vm0, %v1798_v14, %v1870_v41 }
 0x36b   : > { %v1879_v60 = vperm.slane %v1871_v45, %v2527_v15 }
 0x36c   : > { %v1869_v44 = vsel %vm539_vm0, %v1868_v34, %v1794_v32 }
 0x36d   : > { %v1875_v50 = vperm.slane %v1869_v44, %v2527_v15  ;;  %v1892_v24 = vrot.slane %v1879_v60, 4 }
 0x36f   : > { %v1880_v42 = vrot.slane %v1875_v50, 4 }
 0x374   : > { %v1759_v54 = vpop.permute.xlu1 %1758 }
 0x375   : > { %v1792_v59 = vmul.f32 %v1759_v54, %v1728_v52 }
 0x377   : > { %v1857_v1 = vsel %vm539_vm0, %v1856_v56, %v1792_v59  ;;  %v1858_v8 = vrot.slane %v1792_v59, 4 }
 0x378   : > { %v1863_v39 = vperm.slane %v1857_v1, %v2527_v15 }
 0x379   : > { %v1859_v31 = vsel %vm539_vm0, %v1796_v0, %v1858_v8 }
 0x37a   : > { %v1867_v19 = vperm.slane %v1859_v31, %v2527_v15  ;;  %v1881_v13 = vsel %vm539_vm0, %v1880_v42, %v1863_v39  ;;  %v1882_v46 = vrot.slane %v1863_v39, 4 }
 0x37b   : > { %v1887_v61 = vperm.slane %v1881_v13, %v2533_v30 }
 0x37c   : > { %v1883_v48 = vsel %vm539_vm0, %v1875_v50, %v1882_v46  ;;  %v1893_v7 = vsel %vm539_vm0, %v1892_v24, %v1867_v19  ;;  %v1894_v12 = vrot.slane %v1867_v19, 4 }
 0x37d   : > { %v1891_v25 = vperm.slane %v1883_v48, %v2533_v30  ;;  %v1899_v4 = vperm.slane %v1893_v7, %v2533_v30  ;;  %v1774_v6 = vpop.permute.xlu1 %1773  ;;  %v1904_v26 = vrot.slane %v1887_v61, 4 }
 0x37e   : > { %v1895_v55 = vsel %vm539_vm0, %v1879_v60, %v1894_v12  ;;  %v1795_v38 = vmul.f32 %v1774_v6, %v1731_v43 }
 0x37f   : > { %v1903_v22 = vperm.slane %v1895_v55, %v2533_v30  ;;  %v1906_v28 = vrot.slane %v1891_v25, 4  ;;  %v1908_v20 = vrot.slane %v1899_v4, 4  ;;  %v1905_v62 = vsel %vm539_vm0, 0.0, %v1904_v26 }
 0x380   : > { %v1799_v49 = vrot.slane %v1795_v38, 4  ;;  %v1803_v9 = vsel %vm539_vm0, %v1795_v38, %v1802_v11 }
 0x381   : > { %v1907_v33 = vsel %vm539_vm0, 0.0, %v1906_v28  ;;  %v1910_v37 = vrot.slane %v1903_v22, 4  ;;  %v1966_v21 = vsel %vm539_vm0, %v1906_v28, %v1887_v61  ;;  %v1909_v51 = vsel %vm539_vm0, 0.0, %v1908_v20 }
 0x382   : > { %v1971_v58 = vrot.slane %v1907_v33, 4  ;;  %v1801_v2 = vsel %vm539_vm0, %v1799_v49, %v1791_v57  ;;  %v1970_v27 = vperm.slane %v1966_v21, %v2527_v15  ;;  %v1811_v35 = vperm.slane %v1803_v9, %v2527_v15 }
 0x383   : > { %v1911_v3 = vsel %vm539_vm0, 0.0, %v1910_v37  ;;  %v1977_v47 = vsel %vm539_vm0, %v1910_v37, %v1899_v4  ;;  %v1807_v16 = vperm.slane %v1801_v2, %v2527_v15 }
 0x384   : > { %v1972_v17 = vsel %vm539_vm0, %v1971_v58, %v1905_v62  ;;  %v1982_v23 = vrot.slane %v1911_v3, 4  ;;  %v1981_v32 = vperm.slane %v1977_v47, %v2527_v15  ;;  %v1838_v54 = vrot.slane %v1811_v35, 4 }
 0x385   : > { %v1764_v10 = vpop.permute.xlu1 %1763  ;;  %v1976_v14 = vperm.slane %v1972_v17, %v2527_v15  ;;  %v1826_v45 = vrot.slane %v1807_v16, 4  ;;  %v1990_v59 = vrot.slane %v1970_v27, 4 }
 0x386   : > { %v1793_v5 = vmul.f32 %v1764_v10, %v1729_v29  ;;  %v1983_v34 = vsel %vm539_vm0, %v1982_v23, %v1909_v51  ;;  %v2002_v60 = vrot.slane %v1981_v32, 4 }
 0x387   : > { %v1987_v36 = vperm.slane %v1983_v34, %v2527_v15  ;;  %v1988_v44 = vrot.slane %v1976_v14, 4  ;;  %v1991_v12 = vsel %vm539_vm0, %v1976_v14, %v1990_v59 }
 0x388   : > { %v1813_v0 = vsel %vm539_vm0, %v1812_v53, %v1793_v5  ;;  %v1814_v41 = vrot.slane %v1793_v5, 4  ;;  %v1999_v28 = vperm.slane %v1991_v12, %v2533_v30 }
 0x389   : > { %v1819_v50 = vperm.slane %v1813_v0, %v2527_v15  ;;  %v2000_v52 = vrot.slane %v1987_v36, 4  ;;  %v1989_v24 = vsel %vm539_vm0, %v1988_v44, %v1970_v27  ;;  %v2003_v25 = vsel %vm539_vm0, %v1987_v36, %v2002_v60 }
 0x38a   : > { %v1815_v56 = vsel %vm539_vm0, %v1797_v63, %v1814_v41  ;;  %v1995_v4 = vperm.slane %v1989_v24, %v2533_v30  ;;  %v2011_v2 = vperm.slane %v2003_v25, %v2533_v30  ;;  %v2018_v17 = vrot.slane %v1999_v28, 4 }
 0x38b   : > { %v1823_v1 = vperm.slane %v1815_v56, %v2527_v15  ;;  %v1824_v8 = vrot.slane %v1819_v50, 4  ;;  %v1827_v42 = vsel %vm539_vm0, %v1819_v50, %v1826_v45  ;;  %v2001_v39 = vsel %vm539_vm0, %v2000_v52, %v1981_v32 }
 0x38c   : > { %v1835_v31 = vperm.slane %v1827_v42, %v2533_v30  ;;  %v2007_v19 = vperm.slane %v2001_v39, %v2533_v30  ;;  %v2016_v14 = vrot.slane %v2011_v2, 4  ;;  %v2014_v0 = vrot.slane %v1995_v4, 4 }
 0x38d   : > { %v1825_v13 = vsel %vm539_vm0, %v1824_v8, %v1807_v16  ;;  %v1836_v46 = vrot.slane %v1823_v1, 4  ;;  %v1839_v61 = vsel %vm539_vm0, %v1823_v1, %v1838_v54 }
 0x38e   : > { %v1831_v40 = vperm.slane %v1825_v13, %v2533_v30  ;;  %v1847_v48 = vperm.slane %v1839_v61, %v2533_v30  ;;  %v1850_v7 = vrot.slane %v1835_v31, 4  ;;  %v2012_v43 = vrot.slane %v2007_v19, 4 }
 0x38f   : > { %v1837_v57 = vsel %vm539_vm0, %v1836_v46, %v1811_v35  ;;  %v2017_v56 = vsel %vm539_vm0, %v2016_v14, %v1999_v28  ;;  %v2015_v8 = vsel %vm539_vm0, %v2007_v19, %v2014_v0 }
 0x390   : > { %v1843_v6 = vperm.slane %v1837_v57, %v2533_v30  ;;  %v1848_v55 = vrot.slane %v1831_v40, 4  ;;  %v1851_v38 = vsel %vm539_vm0, 0.0, %v1850_v7  ;;  %v1854_v18 = vrot.slane %v1847_v48, 4 }
 0x391   : > { %v1912_v22 = vsel %vm539_vm0, %v1850_v7, %v1831_v40  ;;  %v1917_v26 = vrot.slane %v1851_v38, 4  ;;  %v2013_v63 = vsel %vm539_vm0, %v2012_v43, %v1995_v4 }
 0x392   : > { %v1849_v49 = vsel %vm539_vm0, 0.0, %v1848_v55  ;;  %v1852_v11 = vrot.slane %v1843_v6, 4  ;;  %v1855_v33 = vsel %vm539_vm0, 0.0, %v1854_v18  ;;  %v1916_v20 = vperm.slane %v1912_v22, %v2527_v15 }
 0x393   : > { %v1928_v37 = vrot.slane %v1855_v33, 4  ;;  %v1918_v21 = vsel %vm539_vm0, %v1917_v26, %v1849_v49  ;;  %v1923_v58 = vsel %vm539_vm0, %v1854_v18, %v1843_v6 }
 0x394   : > { %v1853_v62 = vsel %vm539_vm0, 0.0, %v1852_v11  ;;  %v1922_v3 = vperm.slane %v1918_v21, %v2527_v15  ;;  %v1927_v9 = vperm.slane %v1923_v58, %v2527_v15  ;;  %v1936_v47 = vrot.slane %v1916_v20, 4 }
 0x395   : > { %v1929_v53 = vsel %vm539_vm0, %v1928_v37, %v1853_v62 }
 0x396   : > { %v1933_v23 = vperm.slane %v1929_v53, %v2527_v15  ;;  %v1937_v51 = vsel %vm539_vm0, %v1922_v3, %v1936_v47  ;;  %v1948_v27 = vrot.slane %v1927_v9, 4  ;;  %v1934_v16 = vrot.slane %v1922_v3, 4 }
 0x397   : > { %v1945_v29 = vperm.slane %v1937_v51, %v2533_v30  ;;  %v2019_v15 = vsel %vm539_vm0, %v2011_v2, %v2018_v17 }
 0x398   : > { %v1949_v10 = vsel %vm539_vm0, %v1933_v23, %v1948_v27  ;;  %v1935_v35 = vsel %vm539_vm0, %v1934_v16, %v1916_v20  ;;  %v1946_v5 = vrot.slane %v1933_v23, 4 }
 0x399   : > { %v1957_v32 = vperm.slane %v1949_v10, %v2533_v30  ;;  %v1964_v34 = vrot.slane %v1945_v29, 4  ;;  %v1941_v36 = vperm.slane %v1935_v35, %v2533_v30 }
 0x39a   : > { %v1947_v41 = vsel %vm539_vm0, %v1946_v5, %v1927_v9 }
 0x39b   : > { %v1965_v44 = vsel %vm539_vm0, %v1957_v32, %v1964_v34  ;;  %v1962_v45 = vrot.slane %v1957_v32, 4  ;;  %v1953_v50 = vperm.slane %v1947_v41, %v2533_v30  ;;  %v1960_v52 = vrot.slane %v1941_v36, 4 }
 0x39c   : > { %v2303_v54 = vpack.i.bf16 %v2019_v15, %v1965_v44 }
 0x39d   : > { %v1963_v59 = vsel %vm539_vm0, %v1962_v45, %v1945_v29  ;;  %v1958_v60 = vrot.slane %v1953_v50, 4  ;;  %v1961_v1 = vsel %vm539_vm0, %v1953_v50, %v1960_v52 }
 0x39e   : > { %2304 = vrot.lane.b32.xlu2 %v2303_v54, %s2398_s5  ;;  %v2298_v42 = vpack.i.bf16 %v2017_v56, %v1963_v59  ;;  %v2293_v39 = vpack.i.bf16 %v2015_v8, %v1961_v1 }
 0x39f   : > { %v1959_v31 = vsel %vm539_vm0, %v1958_v60, %v1941_v36 }
 0x3a0   : > { %2299 = vrot.lane.b32.xlu1 %v2298_v42, %s2397_s30  ;;  %2294 = vrot.lane.b32.xlu0 %v2293_v39, %s2399_s6 }
 0x3f8   : > { %v2305_v30 = vpop.permute.xlu2 %2304 }
 0x3f9   : > { %v2307_v19 = vunpack.i.h.bf16 %v2305_v30  ;;  %v2306_v7 = vunpack.i.l.bf16 %v2305_v30 }
 0x412   : > { %v2300_v24 = vpop.permute.xlu1 %2299  ;;  %v2295_v13 = vpop.permute.xlu0 %2294 }
 0x413   : > { %v2302_v46 = vunpack.i.h.bf16 %v2300_v24  ;;  %v2301_v61 = vunpack.i.l.bf16 %v2300_v24  ;;  %v2297_v40 = vunpack.i.h.bf16 %v2295_v13  ;;  %v2296_v48 = vunpack.i.l.bf16 %v2295_v13 }
 0x415   : > { %v2045_v12 = vsel %vm479_vm1, %v2013_v63, %v2297_v40  ;;  %v2044_v57 = vsel %vm479_vm1, %v1959_v31, %v2296_v48 }
 0x416   : > { %v2048_v25 = vsel %vm2046_vm4, %v2045_v12, %v2302_v46  ;;  %v2047_v4 = vsel %vm2046_vm4, %v2044_v57, %v2301_v61 }
 0x417   : > { %v2051_v43 = vsel %vm2049_vm5, %v2048_v25, %v2307_v19  ;;  %v2050_v6 = vsel %vm2049_vm5, %v2047_v4, %v2306_v7 }
 0x418   : > { %v2239_v55 = vpack.c.bf16 %v2051_v43, %v2050_v6 }
 0x41a   : > { %2240 = vst [vmem:[%s455_s14] sm:$0xff] %v2239_v55  }
 0x41b PF: > { %s14_s19 = sadd.s32 1, %s2395_s19   ;;  %s3138_s15 = smov %s2383_s16 }
 0x41c   : > { %p11_p10 = scmp.ge.s32.totalorder %s14_s19, 4   ;;  %s3139_s16 = smov %s2469_s24 }
 0x41d   : > { %s3140_s17 = smov %s2391_s18  ;;  %s3141_s18 = smov %s3143_s20 }
 0x41e   :  { %13 = sbr.rel (!%p11_p10) target bundleno = 3 (0x3), region = 221 }

</bundles_post_ra>
